<compile_context>
chip_gen: v7x
topology: tpu7x:2x2x1
jax: 0.10.0
libtpu: 0.0.40
codegen_flags: <defaults>
</compile_context>

<pallas_src>
import functools

import jax
import jax.numpy as jnp
from jax.experimental import pallas as pl
from jax.experimental.pallas import tpu as pltpu


# ----------------------------------------------------------------------------
# Kernel A: tiled QKV projection + Gemma3 q/k RMSNorm + RoPE (roll-based).
# ----------------------------------------------------------------------------
def qkv_norm_rope_kernel(h_ref, w_ref, qw_ref, kw_ref, cos_ref, sin_ref,
                         q_ref, k_ref, v_ref, acc_ref, *,
                         num_heads, num_kv_heads, head_dim, eps):
    kk = pl.program_id(1)

    @pl.when(kk == 0)
    def _():
        acc_ref[...] = jnp.zeros_like(acc_ref)

    # bf16 x bf16 -> fp32 accumulate on the MXU.
    acc_ref[...] += jnp.dot(h_ref[...], w_ref[...],
                            preferred_element_type=jnp.float32)

    @pl.when(kk == pl.num_programs(1) - 1)
    def _():
        d = head_dim
        half = d // 2
        qkv = acc_ref[...]                      # (tm, n_qkv) fp32
        cos = cos_ref[...]                      # (tm, d)  full-width cos
        sin = sin_ref[...]                      # (tm, d)  full-width sin
        qw = qw_ref[...]                        # (1, d)
        kw = kw_ref[...]
        # rotate_half sign: [-1]*half ++ [+1]*half (hoisted out of the head loop).
        sign = jnp.where(
            jax.lax.broadcasted_iota(jnp.int32, (1, d), 1) < half,
            jnp.float32(-1.0), jnp.float32(1.0))

        def rmsnorm(x, w):
            var = jnp.mean(x * x, axis=-1, keepdims=True)
            return x * jax.lax.rsqrt(var + eps) * w

        def rope(x):
            # roll by d//2 swaps halves (XLU); sign makes it rotate_half.
            rot = pltpu.roll(x, shift=half, axis=1) * sign
            return x * cos + rot * sin

        k_off = num_heads * d
        v_off = k_off + num_kv_heads * d
        # Static loops over heads; every slice is a 128-lane-aligned column slab.
        for h in range(num_heads):
            x = qkv[:, h * d:(h + 1) * d]
            q_ref[:, h * d:(h + 1) * d] = rope(rmsnorm(x, qw)).astype(q_ref.dtype)
        for h in range(num_kv_heads):
            x = qkv[:, k_off + h * d:k_off + (h + 1) * d]
            k_ref[:, h * d:(h + 1) * d] = rope(rmsnorm(x, kw)).astype(k_ref.dtype)
            v_ref[:, h * d:(h + 1) * d] = (
                qkv[:, v_off + h * d:v_off + (h + 1) * d].astype(v_ref.dtype))


# ----------------------------------------------------------------------------
# Kernel B: flash-style causal attention with GQA group folding.
#   grid = (num_kv_heads, T // tq, T // tkv)   (kv axis last / "arbitrary")
# ----------------------------------------------------------------------------
def flash_attn_kernel(q_ref, k_ref, v_ref, o_ref, m_ref, l_ref, acc_ref, *,
                      tq, tkv, group, head_dim, scale):
    i = pl.program_id(1)          # query tile
    j = pl.program_id(2)          # kv tile
    nj = pl.num_programs(2)

    @pl.when(j == 0)
    def _():
        m_ref[...] = jnp.full(m_ref.shape, -jnp.inf, jnp.float32)
        l_ref[...] = jnp.zeros_like(l_ref)
        acc_ref[...] = jnp.zeros_like(acc_ref)

    # Skip kv tiles that are entirely above the causal diagonal.
    @pl.when(j * tkv <= i * tq + (tq - 1))
    def _():
        k = k_ref[...]                                            # (tkv, d) bf16
        v = v_ref[...]                                            # (tkv, d) bf16
        row_tok = i * tq + jax.lax.broadcasted_iota(jnp.int32, (tq, tkv), 0)
        col_tok = j * tkv + jax.lax.broadcasted_iota(jnp.int32, (tq, tkv), 1)
        causal = col_tok <= row_tok                               # hoisted, reused per head

        for u in range(group):                                    # static, small (G = nq / nkv)
            q = q_ref[:, u * head_dim:(u + 1) * head_dim]         # (tq, d) bf16, lane-aligned
            s = jnp.dot(q, k.T, preferred_element_type=jnp.float32) * scale
            s = jnp.where(causal, s, -jnp.inf)
            m_prev = m_ref[u]
            m_new = jnp.maximum(m_prev, jnp.max(s, axis=-1, keepdims=True))
            alpha = jnp.exp(m_prev - m_new)
            p = jnp.exp(s - m_new)                                # fp32 softmax math
            l_ref[u] = alpha * l_ref[u] + jnp.sum(p, axis=-1, keepdims=True)
            acc_ref[u] = alpha * acc_ref[u] + jnp.dot(
                p.astype(v.dtype), v, preferred_element_type=jnp.float32)
            m_ref[u] = m_new

    @pl.when(j == nj - 1)
    def _():
        for u in range(group):
            inv_l = pl.reciprocal(l_ref[u], approx=True)          # EUP slot, ~free
            o_ref[:, u * head_dim:(u + 1) * head_dim] = (
                acc_ref[u] * inv_l).astype(o_ref.dtype)


# ----------------------------------------------------------------------------
# Kernel C: tiled output projection.
# ----------------------------------------------------------------------------
def o_proj_kernel(a_ref, w_ref, o_ref, acc_ref):
    @pl.when(pl.program_id(2) == 0)
    def _():
        acc_ref[...] = jnp.zeros_like(acc_ref)

    acc_ref[...] += jnp.dot(a_ref[...], w_ref[...],
                            preferred_element_type=jnp.float32)

    @pl.when(pl.program_id(2) == pl.num_programs(2) - 1)
    def _():
        o_ref[...] = acc_ref[...].astype(o_ref.dtype)


# ----------------------------------------------------------------------------
# Wrapper: layout plumbing + pallas_call tiling decisions only.
# ----------------------------------------------------------------------------
def _fit(dim, cap, name):
    t = min(dim, cap)
    if dim % t != 0:
        raise ValueError(f"{name}={dim} not divisible by tile {t}")
    return t


def flash_gemma3_attention(hidden, wqkv, wo, q_norm_w, k_norm_w, cos, sin, *,
                           num_heads, num_kv_heads, head_dim, softmax_scale,
                           rms_eps=1e-6,
                           block_m=256, block_k=512,        # kernel A tiles
                           block_q=256, block_kv=256,       # kernel B tiles
                           block_om=256, block_on=256, block_ok=512,  # kernel C tiles
                           vmem_limit_bytes=48 * 1024 * 1024):
    T, H = hidden.shape
    d = head_dim
    group = num_heads // num_kv_heads
    n_qkv = (num_heads + 2 * num_kv_heads) * d
    k_proj = num_heads * d

    # bf16 for the MXU matmuls; accumulate in fp32; keep norm/softmax math fp32.
    hidden_bf = hidden.astype(jnp.bfloat16)
    wqkv_bf = wqkv.astype(jnp.bfloat16)
    wo_bf = wo.astype(jnp.bfloat16)
    qw2d = q_norm_w.reshape(1, d).astype(jnp.float32)
    kw2d = k_norm_w.reshape(1, d).astype(jnp.float32)
    # Full-width cos/sin so RoPE is a roll + fused multiply-adds (no in-kernel concat).
    cos_full = jnp.concatenate([cos, cos], axis=-1).astype(jnp.float32)
    sin_full = jnp.concatenate([sin, sin], axis=-1).astype(jnp.float32)

    tm = _fit(T, block_m, "T")
    tk = _fit(H, block_k, "hidden")
    tq = _fit(T, block_q, "T")
    tkv = _fit(T, block_kv, "T")
    tmo = _fit(T, block_om, "T")
    tno = _fit(H, block_on, "hidden")
    tko = _fit(k_proj, block_ok, "nq*head_dim")

    cparams = lambda sem: pltpu.CompilerParams(          # noqa: E731
        dimension_semantics=sem, vmem_limit_bytes=vmem_limit_bytes)

    # ---------------- Kernel A ----------------
    cost_a = pl.CostEstimate(
        flops=2 * T * H * n_qkv,
        transcendentals=T * (num_heads + num_kv_heads),
        bytes_accessed=2 * (T * H + (T // tm) * H * n_qkv + T * n_qkv))
    q, k, v = pl.pallas_call(
        functools.partial(qkv_norm_rope_kernel, num_heads=num_heads,
                          num_kv_heads=num_kv_heads, head_dim=d, eps=rms_eps),
        grid=(T // tm, H // tk),
        in_specs=[
            pl.BlockSpec((tm, tk), lambda i, kk: (i, kk)),
            pl.BlockSpec((tk, n_qkv), lambda i, kk: (kk, 0)),
            pl.BlockSpec((1, d), lambda i, kk: (0, 0)),
            pl.BlockSpec((1, d), lambda i, kk: (0, 0)),
            pl.BlockSpec((tm, d), lambda i, kk: (i, 0)),
            pl.BlockSpec((tm, d), lambda i, kk: (i, 0)),
        ],
        out_specs=(
            pl.BlockSpec((tm, num_heads * d), lambda i, kk: (i, 0)),
            pl.BlockSpec((tm, num_kv_heads * d), lambda i, kk: (i, 0)),
            pl.BlockSpec((tm, num_kv_heads * d), lambda i, kk: (i, 0)),
        ),
        out_shape=(
            jax.ShapeDtypeStruct((T, num_heads * d), jnp.bfloat16),
            jax.ShapeDtypeStruct((T, num_kv_heads * d), jnp.bfloat16),
            jax.ShapeDtypeStruct((T, num_kv_heads * d), jnp.bfloat16),
        ),
        scratch_shapes=[pltpu.VMEM((tm, n_qkv), jnp.float32)],
        compiler_params=cparams(("parallel", "arbitrary")),
        cost_estimate=cost_a,
    )(hidden_bf, wqkv_bf, qw2d, kw2d, cos_full, sin_full)

    # ---------------- Kernel B ----------------
    cost_b = pl.CostEstimate(
        flops=4 * num_heads * T * T * d,
        transcendentals=num_heads * T * T,
        bytes_accessed=2 * (2 * T * num_heads * d
                            + 2 * T * num_kv_heads * d * (T // tq)))
    attn = pl.pallas_call(
        functools.partial(flash_attn_kernel, tq=tq, tkv=tkv, group=group,
                          head_dim=d, scale=softmax_scale),
        grid=(num_kv_heads, T // tq, T // tkv),
        in_specs=[
            pl.BlockSpec((tq, group * d), lambda g, i, j: (i, g)),   # all q heads of group g
            pl.BlockSpec((tkv, d), lambda g, i, j: (j, g)),          # k, kv head g
            pl.BlockSpec((tkv, d), lambda g, i, j: (j, g)),          # v, kv head g
        ],
        out_specs=pl.BlockSpec((tq, group * d), lambda g, i, j: (i, g)),
        out_shape=jax.ShapeDtypeStruct((T, num_heads * d), jnp.bfloat16),
        scratch_shapes=[
            pltpu.VMEM((group, tq, 1), jnp.float32),   # running max
            pltpu.VMEM((group, tq, 1), jnp.float32),   # running denom
            pltpu.VMEM((group, tq, d), jnp.float32),   # output accumulator
        ],
        compiler_params=cparams(("parallel", "parallel", "arbitrary")),
        cost_estimate=cost_b,
    )(q, k, v)

    # ---------------- Kernel C ----------------
    cost_c = pl.CostEstimate(
        flops=2 * T * k_proj * H,
        transcendentals=0,
        bytes_accessed=2 * (T * k_proj + k_proj * H) + 4 * T * H)
    out = pl.pallas_call(
        o_proj_kernel,
        grid=(T // tmo, H // tno, k_proj // tko),
        in_specs=[
            pl.BlockSpec((tmo, tko), lambda i, j, kk: (i, kk)),
            pl.BlockSpec((tko, tno), lambda i, j, kk: (kk, j)),
        ],
        out_specs=pl.BlockSpec((tmo, tno), lambda i, j, kk: (i, j)),
        out_shape=jax.ShapeDtypeStruct((T, H), jnp.float32),
        scratch_shapes=[pltpu.VMEM((tmo, tno), jnp.float32)],
        compiler_params=cparams(("parallel", "parallel", "arbitrary")),
        cost_estimate=cost_c,
    )(attn, wo_bf)
    return out


# ----------------------------------------------------------------------------
# Pure-JAX fp32 reference (mirrors the PyTorch forward semantics).
# ----------------------------------------------------------------------------
def reference(hidden, wqkv, wo, q_norm_w, k_norm_w, cos, sin, *, num_heads,
              num_kv_heads, head_dim, softmax_scale, rms_eps=1e-6):
    T = hidden.shape[0]
    d = head_dim
    qkv = hidden @ wqkv
    q = qkv[:, : num_heads * d].reshape(T, num_heads, d)
    k = qkv[:, num_heads * d:(num_heads + num_kv_heads) * d].reshape(T, num_kv_heads, d)
    v = qkv[:, (num_heads + num_kv_heads) * d:].reshape(T, num_kv_heads, d)

    def rms(x, w):
        var = jnp.mean(x * x, axis=-1, keepdims=True)
        return x * jax.lax.rsqrt(var + rms_eps) * w

    q = rms(q, q_norm_w)
    k = rms(k, k_norm_w)

    def rope(x):
        x1, x2 = x[..., : d // 2], x[..., d // 2:]
        c, s = cos[:, None, :], sin[:, None, :]
        return jnp.concatenate([x1 * c - x2 * s, x2 * c + x1 * s], axis=-1)

    q, k = rope(q), rope(k)
    groups = num_heads // num_kv_heads
    k = jnp.repeat(k, groups, axis=1)
    v = jnp.repeat(v, groups, axis=1)
    qh, kh, vh = (jnp.transpose(x, (1, 0, 2)) for x in (q, k, v))
    s = jnp.einsum("hqd,hkd->hqk", qh, kh) * softmax_scale
    mask = jnp.tril(jnp.ones((T, T), dtype=bool))
    s = jnp.where(mask[None], s, -jnp.inf)
    p = jax.nn.softmax(s, axis=-1)
    o = jnp.einsum("hqk,hkd->hqd", p, vh)
    o = jnp.transpose(o, (1, 0, 2)).reshape(T, num_heads * d)
    return o @ wo


if __name__ == "__main__":
    # Small Gemma3-like config with the real (lane-aligned) head_dim:
    # hidden=256, 4 query heads, 2 kv heads, head_dim=128, seq len 256.
    T, HID, NQ, NKV, D = 256, 256, 4, 2, 128
    RMS_EPS = 1e-6
    query_pre_attn_scalar = 256.0
    softmax_scale = query_pre_attn_scalar ** -0.5
    rope_theta = 10000.0

    key = jax.random.PRNGKey(0)
    k1, k2, k3, k4, k5 = jax.random.split(key, 5)
    hidden = jax.random.normal(k1, (T, HID), jnp.float32) * 0.1
    wqkv = jax.random.normal(k2, (HID, (NQ + 2 * NKV) * D), jnp.float32) * 0.05
    wo = jax.random.normal(k3, (NQ * D, HID), jnp.float32) * 0.05
    # Gemma3FastRMSNorm loads (stored_weight + 1); emulate with raw + 1 host-side.
    q_norm_w = jax.random.normal(k4, (D,), jnp.float32) * 0.1 + 1.0
    k_norm_w = jax.random.normal(k5, (D,), jnp.float32) * 0.1 + 1.0

    pos = jnp.arange(T, dtype=jnp.float32)
    inv_freq = 1.0 / (rope_theta ** (jnp.arange(0, D, 2, dtype=jnp.float32) / D))
    freqs = pos[:, None] * inv_freq[None, :]
    cos = jnp.cos(freqs)
    sin = jnp.sin(freqs)

    out = flash_gemma3_attention(
        hidden, wqkv, wo, q_norm_w, k_norm_w, cos, sin,
        num_heads=NQ, num_kv_heads=NKV, head_dim=D,
        softmax_scale=softmax_scale, rms_eps=RMS_EPS,
        # Small tiles so the demo exercises multi-tile grids, accumulator init/finalize
        # and causal kv-tile skipping (real-size defaults are 256/512).
        block_m=128, block_k=128,
        block_q=128, block_kv=128,
        block_om=128, block_on=128, block_ok=256)
    out = jax.block_until_ready(out)

    ref = reference(
        hidden, wqkv, wo, q_norm_w, k_norm_w, cos, sin,
        num_heads=NQ, num_kv_heads=NKV, head_dim=D,
        softmax_scale=softmax_scale, rms_eps=RMS_EPS)

    assert out.shape == (T, HID)
    # bf16 MXU inputs + approx reciprocal vs fp32 reference -> loosened tolerance.
    assert jnp.allclose(out, ref, rtol=3e-2, atol=5e-3), "mismatch vs reference"
    print("KERNEL_OK")
</pallas_src>

<mosaic_0001>
module attributes {stable_mosaic.version = 11 : i64} {
  func.func @qkv_norm_rope_kernel(%arg0: i32, %arg1: i32, %arg2: memref<128x128xbf16, #tpu.memory_space<vmem>>, %arg3: memref<128x1024xbf16, #tpu.memory_space<vmem>>, %arg4: memref<1x128xf32, #tpu.memory_space<vmem>>, %arg5: memref<1x128xf32, #tpu.memory_space<vmem>>, %arg6: memref<128x128xf32, #tpu.memory_space<vmem>>, %arg7: memref<128x128xf32, #tpu.memory_space<vmem>>, %arg8: memref<128x512xbf16, #tpu.memory_space<vmem>>, %arg9: memref<128x256xbf16, #tpu.memory_space<vmem>>, %arg10: memref<128x256xbf16, #tpu.memory_space<vmem>>, %arg11: memref<128x1024xf32, #tpu.memory_space<vmem>>) attributes {dimension_semantics = [#tpu.dimension_semantics<parallel>, #tpu.dimension_semantics<arbitrary>], iteration_bounds = array<i64: 2, 2>, scalar_prefetch = 0 : i64, scratch_operands = 1 : i64, tpu.core_type = #tpu.core_type<tc>, window_params = [{transform_indices = @transform_0, window_bounds = array<i64: 128, 128>}, {transform_indices = @transform_1, window_bounds = array<i64: 128, 1024>}, {pipeline_mode = #tpu.pipeline_mode<synchronous>, transform_indices = @transform_2, window_bounds = array<i64: 1, 128>}, {pipeline_mode = #tpu.pipeline_mode<synchronous>, transform_indices = @transform_3, window_bounds = array<i64: 1, 128>}, {transform_indices = @transform_4, window_bounds = array<i64: 128, 128>}, {transform_indices = @transform_5, window_bounds = array<i64: 128, 128>}, {transform_indices = @transform_6, window_bounds = array<i64: 128, 512>}, {transform_indices = @transform_7, window_bounds = array<i64: 128, 256>}, {transform_indices = @transform_8, window_bounds = array<i64: 128, 256>}]} {
    %c0_i32 = arith.constant 0 : i32
    %0 = arith.cmpi eq, %arg1, %c0_i32 : i32
    %1 = arith.extui %0 : i1 to i32
    %c0_i32_0 = arith.constant 0 : i32
    %2 = arith.cmpi ne, %1, %c0_i32_0 : i32
    scf.if %2 {
      %cst_9 = arith.constant 0.000000e+00 : f32
      %12 = vector.broadcast %cst_9 : f32 to vector<128x1024xf32>
      %c0_10 = arith.constant 0 : index
      %c0_11 = arith.constant 0 : index
      %13 = vector.load %arg11[%c0_10, %c0_11] : memref<128x1024xf32, #tpu.memory_space<vmem>>, vector<128x1024xf32>
      tpu.vector_store %arg11[%c0_10, %c0_11], %12 {strides = array<i32>} : memref<128x1024xf32, #tpu.memory_space<vmem>>, vector<128x1024xf32>,
    } else {
    }
    %c0 = arith.constant 0 : index
    %c0_1 = arith.constant 0 : index
    %3 = vector.load %arg11[%c0, %c0_1] : memref<128x1024xf32, #tpu.memory_space<vmem>>, vector<128x1024xf32>
    %c0_2 = arith.constant 0 : index
    %c0_3 = arith.constant 0 : index
    %4 = vector.load %arg2[%c0_2, %c0_3] : memref<128x128xbf16, #tpu.memory_space<vmem>>, vector<128x128xbf16>
    %c0_4 = arith.constant 0 : index
    %c0_5 = arith.constant 0 : index
    %5 = vector.load %arg3[%c0_4, %c0_5] : memref<128x1024xbf16, #tpu.memory_space<vmem>>, vector<128x1024xbf16>
    %cst = arith.constant dense<0.000000e+00> : vector<128x1024xf32>
    %6 = tpu.matmul %4, %5, %cst {dimension_numbers = #tpu.dot_dimension_numbers<[1], [0], [0], [1], [0, 0, 1, 1], [], []>} : vector<128x128xbf16>, vector<128x1024xbf16>, vector<128x1024xf32> -> vector<128x1024xf32>
    %7 = arith.addf %3, %6 : vector<128x1024xf32>
    %c0_6 = arith.constant 0 : index
    %c0_7 = arith.constant 0 : index
    %8 = vector.load %arg11[%c0_6, %c0_7] : memref<128x1024xf32, #tpu.memory_space<vmem>>, vector<128x1024xf32>
    tpu.vector_store %arg11[%c0_6, %c0_7], %7 {strides = array<i32>} : memref<128x1024xf32, #tpu.memory_space<vmem>>, vector<128x1024xf32>,
    %c1_i32 = arith.constant 1 : i32
    %9 = arith.cmpi eq, %arg1, %c1_i32 : i32
    %10 = arith.extui %9 : i1 to i32
    %c0_i32_8 = arith.constant 0 : i32
    %11 = arith.cmpi ne, %10, %c0_i32_8 : i32
    scf.if %11 {
      %c0_9 = arith.constant 0 : index
      %c0_10 = arith.constant 0 : index
      %12 = vector.load %arg11[%c0_9, %c0_10] : memref<128x1024xf32, #tpu.memory_space<vmem>>, vector<128x1024xf32>
      %c0_11 = arith.constant 0 : index
      %c0_12 = arith.constant 0 : index
      %13 = vector.load %arg6[%c0_11, %c0_12] : memref<128x128xf32, #tpu.memory_space<vmem>>, vector<128x128xf32>
      %c0_13 = arith.constant 0 : index
      %c0_14 = arith.constant 0 : index
      %14 = vector.load %arg7[%c0_13, %c0_14] : memref<128x128xf32, #tpu.memory_space<vmem>>, vector<128x128xf32>
      %c0_15 = arith.constant 0 : index
      %c0_16 = arith.constant 0 : index
      %15 = vector.load %arg4[%c0_15, %c0_16] : memref<1x128xf32, #tpu.memory_space<vmem>>, vector<1x128xf32>
      %c0_17 = arith.constant 0 : index
      %c0_18 = arith.constant 0 : index
      %16 = vector.load %arg5[%c0_17, %c0_18] : memref<1x128xf32, #tpu.memory_space<vmem>>, vector<1x128xf32>
      %17 = tpu.iota {dimensions = array<i32: 1>} : vector<1x128xi32>
      %c64_i32 = arith.constant 64 : i32
      %18 = vector.broadcast %c64_i32 : i32 to vector<1x128xi32>
      %19 = arith.cmpi slt, %17, %18 : vector<1x128xi32>
      %cst_19 = arith.constant -1.000000e+00 : f32
      %cst_20 = arith.constant 1.000000e+00 : f32
      %20 = vector.broadcast %cst_19 : f32 to vector<1x128xf32>
      %21 = vector.broadcast %cst_20 : f32 to vector<1x128xf32>
      %22 = arith.select %19, %20, %21 : vector<1x128xi1>, vector<1x128xf32>
      %23 = vector.extract_strided_slice %12 {offsets = [0, 0], sizes = [128, 128], strides = [1, 1]} : vector<128x1024xf32> to vector<128x128xf32>
      %24 = arith.mulf %23, %23 : vector<128x128xf32>
      %cst_21 = arith.constant dense<0.000000e+00> : vector<128xf32>
      %25 = vector.multi_reduction <add>, %24, %cst_21 [1] : vector<128x128xf32> to vector<128xf32>
      %26 = vector.shape_cast %25 : vector<128xf32> to vector<128x1xf32>
      %cst_22 = arith.constant 1.280000e+02 : f32
      %27 = vector.broadcast %cst_22 : f32 to vector<128x1xf32>
      %28 = arith.divf %26, %27 : vector<128x1xf32>
      %cst_23 = arith.constant 9.99999997E-7 : f32
      %29 = vector.broadcast %cst_23 : f32 to vector<128x1xf32>
      %30 = arith.addf %28, %29 : vector<128x1xf32>
      %31 = math.rsqrt %30 : vector<128x1xf32>
      %32 = vector.broadcast %31 : vector<128x1xf32> to vector<128x128xf32>
      %33 = arith.mulf %23, %32 : vector<128x128xf32>
      %34 = vector.broadcast %15 : vector<1x128xf32> to vector<128x128xf32>
      %35 = arith.mulf %33, %34 : vector<128x128xf32>
      %c64_i32_24 = arith.constant 64 : i32
      %36 = tpu.dynamic_rotate %35 by %c64_i32_24 dim 1 : vector<128x128xf32>, i32 -> vector<128x128xf32>
      %37 = vector.broadcast %22 : vector<1x128xf32> to vector<128x128xf32>
      %38 = arith.mulf %36, %37 : vector<128x128xf32>
      %39 = arith.mulf %35, %13 : vector<128x128xf32>
      %40 = arith.mulf %38, %14 : vector<128x128xf32>
      %41 = arith.addf %39, %40 : vector<128x128xf32>
      %42 = arith.truncf %41 : vector<128x128xf32> to vector<128x128xbf16>
      %c0_25 = arith.constant 0 : index
      %c0_26 = arith.constant 0 : index
      %43 = vector.load %arg8[%c0_25, %c0_26] : memref<128x512xbf16, #tpu.memory_space<vmem>>, vector<128x128xbf16>
      tpu.vector_store %arg8[%c0_25, %c0_26], %42 {strides = array<i32>} : memref<128x512xbf16, #tpu.memory_space<vmem>>, vector<128x128xbf16>,
      %44 = vector.extract_strided_slice %12 {offsets = [0, 128], sizes = [128, 128], strides = [1, 1]} : vector<128x1024xf32> to vector<128x128xf32>
      %45 = arith.mulf %44, %44 : vector<128x128xf32>
      %cst_27 = arith.constant dense<0.000000e+00> : vector<128xf32>
      %46 = vector.multi_reduction <add>, %45, %cst_27 [1] : vector<128x128xf32> to vector<128xf32>
      %47 = vector.shape_cast %46 : vector<128xf32> to vector<128x1xf32>
      %cst_28 = arith.constant 1.280000e+02 : f32
      %48 = vector.broadcast %cst_28 : f32 to vector<128x1xf32>
      %49 = arith.divf %47, %48 : vector<128x1xf32>
      %cst_29 = arith.constant 9.99999997E-7 : f32
      %50 = vector.broadcast %cst_29 : f32 to vector<128x1xf32>
      %51 = arith.addf %49, %50 : vector<128x1xf32>
      %52 = math.rsqrt %51 : vector<128x1xf32>
      %53 = vector.broadcast %52 : vector<128x1xf32> to vector<128x128xf32>
      %54 = arith.mulf %44, %53 : vector<128x128xf32>
      %55 = vector.broadcast %15 : vector<1x128xf32> to vector<128x128xf32>
      %56 = arith.mulf %54, %55 : vector<128x128xf32>
      %c64_i32_30 = arith.constant 64 : i32
      %57 = tpu.dynamic_rotate %56 by %c64_i32_30 dim 1 : vector<128x128xf32>, i32 -> vector<128x128xf32>
      %58 = vector.broadcast %22 : vector<1x128xf32> to vector<128x128xf32>
      %59 = arith.mulf %57, %58 : vector<128x128xf32>
      %60 = arith.mulf %56, %13 : vector<128x128xf32>
      %61 = arith.mulf %59, %14 : vector<128x128xf32>
      %62 = arith.addf %60, %61 : vector<128x128xf32>
      %63 = arith.truncf %62 : vector<128x128xf32> to vector<128x128xbf16>
      %c0_31 = arith.constant 0 : index
      %c128 = arith.constant 128 : index
      %64 = vector.load %arg8[%c0_31, %c128] : memref<128x512xbf16, #tpu.memory_space<vmem>>, vector<128x128xbf16>
      tpu.vector_store %arg8[%c0_31, %c128], %63 {strides = array<i32>} : memref<128x512xbf16, #tpu.memory_space<vmem>>, vector<128x128xbf16>,
      %65 = vector.extract_strided_slice %12 {offsets = [0, 256], sizes = [128, 128], strides = [1, 1]} : vector<128x1024xf32> to vector<128x128xf32>
      %66 = arith.mulf %65, %65 : vector<128x128xf32>
      %cst_32 = arith.constant dense<0.000000e+00> : vector<128xf32>
      %67 = vector.multi_reduction <add>, %66, %cst_32 [1] : vector<128x128xf32> to vector<128xf32>
      %68 = vector.shape_cast %67 : vector<128xf32> to vector<128x1xf32>
      %cst_33 = arith.constant 1.280000e+02 : f32
      %69 = vector.broadcast %cst_33 : f32 to vector<128x1xf32>
      %70 = arith.divf %68, %69 : vector<128x1xf32>
      %cst_34 = arith.constant 9.99999997E-7 : f32
      %71 = vector.broadcast %cst_34 : f32 to vector<128x1xf32>
      %72 = arith.addf %70, %71 : vector<128x1xf32>
      %73 = math.rsqrt %72 : vector<128x1xf32>
      %74 = vector.broadcast %73 : vector<128x1xf32> to vector<128x128xf32>
      %75 = arith.mulf %65, %74 : vector<128x128xf32>
      %76 = vector.broadcast %15 : vector<1x128xf32> to vector<128x128xf32>
      %77 = arith.mulf %75, %76 : vector<128x128xf32>
      %c64_i32_35 = arith.constant 64 : i32
      %78 = tpu.dynamic_rotate %77 by %c64_i32_35 dim 1 : vector<128x128xf32>, i32 -> vector<128x128xf32>
      %79 = vector.broadcast %22 : vector<1x128xf32> to vector<128x128xf32>
      %80 = arith.mulf %78, %79 : vector<128x128xf32>
      %81 = arith.mulf %77, %13 : vector<128x128xf32>
      %82 = arith.mulf %80, %14 : vector<128x128xf32>
      %83 = arith.addf %81, %82 : vector<128x128xf32>
      %84 = arith.truncf %83 : vector<128x128xf32> to vector<128x128xbf16>
      %c0_36 = arith.constant 0 : index
      %c256 = arith.constant 256 : index
      %85 = vector.load %arg8[%c0_36, %c256] : memref<128x512xbf16, #tpu.memory_space<vmem>>, vector<128x128xbf16>
      tpu.vector_store %arg8[%c0_36, %c256], %84 {strides = array<i32>} : memref<128x512xbf16, #tpu.memory_space<vmem>>, vector<128x128xbf16>,
      %86 = vector.extract_strided_slice %12 {offsets = [0, 384], sizes = [128, 128], strides = [1, 1]} : vector<128x1024xf32> to vector<128x128xf32>
      %87 = arith.mulf %86, %86 : vector<128x128xf32>
      %cst_37 = arith.constant dense<0.000000e+00> : vector<128xf32>
      %88 = vector.multi_reduction <add>, %87, %cst_37 [1] : vector<128x128xf32> to vector<128xf32>
      %89 = vector.shape_cast %88 : vector<128xf32> to vector<128x1xf32>
      %cst_38 = arith.constant 1.280000e+02 : f32
      %90 = vector.broadcast %cst_38 : f32 to vector<128x1xf32>
      %91 = arith.divf %89, %90 : vector<128x1xf32>
      %cst_39 = arith.constant 9.99999997E-7 : f32
      %92 = vector.broadcast %cst_39 : f32 to vector<128x1xf32>
      %93 = arith.addf %91, %92 : vector<128x1xf32>
      %94 = math.rsqrt %93 : vector<128x1xf32>
      %95 = vector.broadcast %94 : vector<128x1xf32> to vector<128x128xf32>
      %96 = arith.mulf %86, %95 : vector<128x128xf32>
      %97 = vector.broadcast %15 : vector<1x128xf32> to vector<128x128xf32>
      %98 = arith.mulf %96, %97 : vector<128x128xf32>
      %c64_i32_40 = arith.constant 64 : i32
      %99 = tpu.dynamic_rotate %98 by %c64_i32_40 dim 1 : vector<128x128xf32>, i32 -> vector<128x128xf32>
      %100 = vector.broadcast %22 : vector<1x128xf32> to vector<128x128xf32>
      %101 = arith.mulf %99, %100 : vector<128x128xf32>
      %102 = arith.mulf %98, %13 : vector<128x128xf32>
      %103 = arith.mulf %101, %14 : vector<128x128xf32>
      %104 = arith.addf %102, %103 : vector<128x128xf32>
      %105 = arith.truncf %104 : vector<128x128xf32> to vector<128x128xbf16>
      %c0_41 = arith.constant 0 : index
      %c384 = arith.constant 384 : index
      %106 = vector.load %arg8[%c0_41, %c384] : memref<128x512xbf16, #tpu.memory_space<vmem>>, vector<128x128xbf16>
      tpu.vector_store %arg8[%c0_41, %c384], %105 {strides = array<i32>} : memref<128x512xbf16, #tpu.memory_space<vmem>>, vector<128x128xbf16>,
      %107 = vector.extract_strided_slice %12 {offsets = [0, 512], sizes = [128, 128], strides = [1, 1]} : vector<128x1024xf32> to vector<128x128xf32>
      %108 = arith.mulf %107, %107 : vector<128x128xf32>
      %cst_42 = arith.constant dense<0.000000e+00> : vector<128xf32>
      %109 = vector.multi_reduction <add>, %108, %cst_42 [1] : vector<128x128xf32> to vector<128xf32>
      %110 = vector.shape_cast %109 : vector<128xf32> to vector<128x1xf32>
      %cst_43 = arith.constant 1.280000e+02 : f32
      %111 = vector.broadcast %cst_43 : f32 to vector<128x1xf32>
      %112 = arith.divf %110, %111 : vector<128x1xf32>
      %cst_44 = arith.constant 9.99999997E-7 : f32
      %113 = vector.broadcast %cst_44 : f32 to vector<128x1xf32>
      %114 = arith.addf %112, %113 : vector<128x1xf32>
      %115 = math.rsqrt %114 : vector<128x1xf32>
      %116 = vector.broadcast %115 : vector<128x1xf32> to vector<128x128xf32>
      %117 = arith.mulf %107, %116 : vector<128x128xf32>
      %118 = vector.broadcast %16 : vector<1x128xf32> to vector<128x128xf32>
      %119 = arith.mulf %117, %118 : vector<128x128xf32>
      %c64_i32_45 = arith.constant 64 : i32
      %120 = tpu.dynamic_rotate %119 by %c64_i32_45 dim 1 : vector<128x128xf32>, i32 -> vector<128x128xf32>
      %121 = vector.broadcast %22 : vector<1x128xf32> to vector<128x128xf32>
      %122 = arith.mulf %120, %121 : vector<128x128xf32>
      %123 = arith.mulf %119, %13 : vector<128x128xf32>
      %124 = arith.mulf %122, %14 : vector<128x128xf32>
      %125 = arith.addf %123, %124 : vector<128x128xf32>
      %126 = arith.truncf %125 : vector<128x128xf32> to vector<128x128xbf16>
      %c0_46 = arith.constant 0 : index
      %c0_47 = arith.constant 0 : index
      %127 = vector.load %arg9[%c0_46, %c0_47] : memref<128x256xbf16, #tpu.memory_space<vmem>>, vector<128x128xbf16>
      tpu.vector_store %arg9[%c0_46, %c0_47], %126 {strides = array<i32>} : memref<128x256xbf16, #tpu.memory_space<vmem>>, vector<128x128xbf16>,
      %128 = vector.extract_strided_slice %12 {offsets = [0, 768], sizes = [128, 128], strides = [1, 1]} : vector<128x1024xf32> to vector<128x128xf32>
      %129 = arith.truncf %128 : vector<128x128xf32> to vector<128x128xbf16>
      %c0_48 = arith.constant 0 : index
      %c0_49 = arith.constant 0 : index
      %130 = vector.load %arg10[%c0_48, %c0_49] : memref<128x256xbf16, #tpu.memory_space<vmem>>, vector<128x128xbf16>
      tpu.vector_store %arg10[%c0_48, %c0_49], %129 {strides = array<i32>} : memref<128x256xbf16, #tpu.memory_space<vmem>>, vector<128x128xbf16>,
      %131 = vector.extract_strided_slice %12 {offsets = [0, 640], sizes = [128, 128], strides = [1, 1]} : vector<128x1024xf32> to vector<128x128xf32>
      %132 = arith.mulf %131, %131 : vector<128x128xf32>
      %cst_50 = arith.constant dense<0.000000e+00> : vector<128xf32>
      %133 = vector.multi_reduction <add>, %132, %cst_50 [1] : vector<128x128xf32> to vector<128xf32>
      %134 = vector.shape_cast %133 : vector<128xf32> to vector<128x1xf32>
      %cst_51 = arith.constant 1.280000e+02 : f32
      %135 = vector.broadcast %cst_51 : f32 to vector<128x1xf32>
      %136 = arith.divf %134, %135 : vector<128x1xf32>
      %cst_52 = arith.constant 9.99999997E-7 : f32
      %137 = vector.broadcast %cst_52 : f32 to vector<128x1xf32>
      %138 = arith.addf %136, %137 : vector<128x1xf32>
      %139 = math.rsqrt %138 : vector<128x1xf32>
      %140 = vector.broadcast %139 : vector<128x1xf32> to vector<128x128xf32>
      %141 = arith.mulf %131, %140 : vector<128x128xf32>
      %142 = vector.broadcast %16 : vector<1x128xf32> to vector<128x128xf32>
      %143 = arith.mulf %141, %142 : vector<128x128xf32>
      %c64_i32_53 = arith.constant 64 : i32
      %144 = tpu.dynamic_rotate %143 by %c64_i32_53 dim 1 : vector<128x128xf32>, i32 -> vector<128x128xf32>
      %145 = vector.broadcast %22 : vector<1x128xf32> to vector<128x128xf32>
      %146 = arith.mulf %144, %145 : vector<128x128xf32>
      %147 = arith.mulf %143, %13 : vector<128x128xf32>
      %148 = arith.mulf %146, %14 : vector<128x128xf32>
      %149 = arith.addf %147, %148 : vector<128x128xf32>
      %150 = arith.truncf %149 : vector<128x128xf32> to vector<128x128xbf16>
      %c0_54 = arith.constant 0 : index
      %c128_55 = arith.constant 128 : index
      %151 = vector.load %arg9[%c0_54, %c128_55] : memref<128x256xbf16, #tpu.memory_space<vmem>>, vector<128x128xbf16>
      tpu.vector_store %arg9[%c0_54, %c128_55], %150 {strides = array<i32>} : memref<128x256xbf16, #tpu.memory_space<vmem>>, vector<128x128xbf16>,
      %152 = vector.extract_strided_slice %12 {offsets = [0, 896], sizes = [128, 128], strides = [1, 1]} : vector<128x1024xf32> to vector<128x128xf32>
      %153 = arith.truncf %152 : vector<128x128xf32> to vector<128x128xbf16>
      %c0_56 = arith.constant 0 : index
      %c128_57 = arith.constant 128 : index
      %154 = vector.load %arg10[%c0_56, %c128_57] : memref<128x256xbf16, #tpu.memory_space<vmem>>, vector<128x128xbf16>
      tpu.vector_store %arg10[%c0_56, %c128_57], %153 {strides = array<i32>} : memref<128x256xbf16, #tpu.memory_space<vmem>>, vector<128x128xbf16>,
    } else {
    }
    return
  }
  func.func @transform_0(%arg0: i32, %arg1: i32) -> (i32, i32) {
    %c0_i32 = arith.constant 0 : i32
    return %arg0, %arg1 : i32, i32
  }
  func.func @transform_1(%arg0: i32, %arg1: i32) -> (i32, i32) {
    %c0_i32 = arith.constant 0 : i32
    %c0_i32_0 = arith.constant 0 : i32
    return %arg1, %c0_i32 : i32, i32
  }
  func.func @transform_2(%arg0: i32, %arg1: i32) -> (i32, i32) {
    %c0_i32 = arith.constant 0 : i32
    %c0_i32_0 = arith.constant 0 : i32
    %c0_i32_1 = arith.constant 0 : i32
    return %c0_i32, %c0_i32_0 : i32, i32
  }
  func.func @transform_3(%arg0: i32, %arg1: i32) -> (i32, i32) {
    %c0_i32 = arith.constant 0 : i32
    %c0_i32_0 = arith.constant 0 : i32
    %c0_i32_1 = arith.constant 0 : i32
    return %c0_i32, %c0_i32_0 : i32, i32
  }
  func.func @transform_4(%arg0: i32, %arg1: i32) -> (i32, i32) {
    %c0_i32 = arith.constant 0 : i32
    %c0_i32_0 = arith.constant 0 : i32
    return %arg0, %c0_i32 : i32, i32
  }
  func.func @transform_5(%arg0: i32, %arg1: i32) -> (i32, i32) {
    %c0_i32 = arith.constant 0 : i32
    %c0_i32_0 = arith.constant 0 : i32
    return %arg0, %c0_i32 : i32, i32
  }
  func.func @transform_6(%arg0: i32, %arg1: i32) -> (i32, i32) {
    %c0_i32 = arith.constant 0 : i32
    %c0_i32_0 = arith.constant 0 : i32
    return %arg0, %c0_i32 : i32, i32
  }
  func.func @transform_7(%arg0: i32, %arg1: i32) -> (i32, i32) {
    %c0_i32 = arith.constant 0 : i32
    %c0_i32_0 = arith.constant 0 : i32
    return %arg0, %c0_i32 : i32, i32
  }
  func.func @transform_8(%arg0: i32, %arg1: i32) -> (i32, i32) {
    %c0_i32 = arith.constant 0 : i32
    %c0_i32_0 = arith.constant 0 : i32
    return %arg0, %c0_i32 : i32, i32
  }
}

</mosaic_0001>

<bundles_post_ra>
// kernel: tpu_custom_call.1
= control target key start
LH: loop header
LB: loop body
LE: loop exit
PB: predicated region body
PF: predicated region fallthrough
CT: control target
= control target key end

     0   :  { %s8048_s0 = inlined_call_operand.hbm [shape: bf16[256,256], index: 0, kind: input, shape index: {}]   ;;  %s8049_s1 = inlined_call_operand.hbm [shape: bf16[256,1024], index: 1, kind: input, shape index: {}]   ;;  %s8050_s2 = inlined_call_operand.vmem [shape: f32[1,128], index: 2, kind: input, shape index: {}]   ;;  %s8051_s3 = inlined_call_operand.vmem [shape: f32[1,128], index: 3, kind: input, shape index: {}]   ;;  %s8052_s4 = inlined_call_operand.hbm [shape: f32[256,128], index: 4, kind: input, shape index: {}]   ;;  %s8053_s5 = inlined_call_operand.hbm [shape: f32[256,128], index: 5, kind: input, shape index: {}]   ;;  %s8054_s6 = inlined_call_operand.hbm [shape: bf16[256,512], index: 6, kind: output, shape index: {0}]   ;;  %s8055_s7 = inlined_call_operand.hbm [shape: bf16[256,256], index: 7, kind: output, shape index: {1}]   ;;  %s8056_s8 = inlined_call_operand.hbm [shape: bf16[256,256], index: 8, kind: output, shape index: {2}]  }
   0x1   :  { %8135 = sst [smem:[#allocation54_spill]] %s8048_s0 }
   0x2   :  { %8136 = sst [smem:[#allocation55_spill]] %s8049_s1 }
   0x3   :  { %8137 = sst [smem:[#allocation56_spill]] %s8050_s2 }
   0x4   :  { %8138 = sst [smem:[#allocation57_spill]] %s8051_s3 }
   0x5   :  { %8139 = sst [smem:[#allocation58_spill]] %s8052_s4 }
   0x6   :  { %8140 = sst [smem:[#allocation59_spill]] %s8054_s6 }
   0x7   :  { %8141 = sst [smem:[#allocation60_spill]] %s8055_s7 }
   0x8   :  { %8142 = sst [smem:[#allocation61_spill]] %s8056_s8 }
   0x9   :  { %14 = vsyncpa [#allocation4], 0 }
   0xa   :  { %16 = vsyncpa [#allocation4 + $0x1], 0 }
   0xb   :  { %17 = vsyncpa [#allocation7], 0 }
   0xc   :  { %19 = vsyncpa [#allocation7 + $0x1], 0 }
   0xd   :  { %20 = vsyncpa [#allocation10], 0 }
   0xe   :  { %22 = vsyncpa [#allocation10 + $0x1], 0 }
   0xf   :  { %23 = vsyncpa [#allocation5], 0 }
  0x10   :  { %25 = vsyncpa [#allocation5 + $0x1], 0 }
  0x11   :  { %26 = vsyncpa [#allocation13], 0 }
  0x12   :  { %28 = vsyncpa [#allocation13 + $0x1], 0  ;;  %s5558_s27 = smov 0   ;;  %s5560_s28 = smov 0  }
  0x13   :  { %s5562_s29 = smov 0   ;;  %s5564_s30 = smov 0  }
  0x14   :  { %s5566_s9 = smov 0   ;;  %s5568_s10 = smov 0  }
  0x15   :  { %s5570_s11 = smov 0   ;;  %s5572_s12 = smov 0  }
  0x16   :  { %s5574_s13 = smov 0   ;;  %s5576_s14 = smov 0  }
  0x17   :  { %s5578_s15 = smov 0   ;;  %s5580_s16 = smov 0  }
  0x18   :  { %s5582_s17 = smov 0   ;;  %s5584_s18 = smov 0  }
  0x19 LB: > { %8143 = sst [smem:[#allocation21_spill]] %s5458_s10  ;;  %s5629_s19 = sadd.s32 4294967295, %s5490_s18   ;;  %s5490_s18 = sphi %s5584_s18, %s34_s18   ;;  %s5486_s17 = sphi %s5582_s17, %s8320_s17   ;;  %s5482_s16 = sphi %s5580_s16, %s8310_s16   ;;  %s5478_s15 = sphi %s5578_s15, %s8319_s15   ;;  %s5474_s14 = sphi %s5576_s14, %s8309_s14   ;;  %s5470_s13 = sphi %s5574_s13, %s8308_s13   ;;  %s5466_s12 = sphi %s5572_s12, %s8318_s12   ;;  %s5462_s11 = sphi %s5570_s11, %s8317_s11   ;;  %s5458_s10 = sphi %s5568_s10, %s8306_s10   ;;  %s5454_s9 = sphi %s5566_s9, %s8316_s9   ;;  %s5450_s30 = sphi %s5564_s30, %s8315_s30   ;;  %s5446_s29 = sphi %s5562_s29, %s8314_s29   ;;  %s5442_s28 = sphi %s5560_s28, %s8313_s28   ;;  %s5438_s27 = sphi %s5558_s27, %s8312_s27  }
  0x1a   : > { %8144 = sst [smem:[#allocation22_spill]] %s5470_s13  ;;  %s43_s20 = sadd.s32 1, %s5482_s16 }
  0x1b   : > { %8145 = sst [smem:[#allocation23_spill]] %s5478_s15  ;;  %p44_p0 = scmp.ge.s32.totalorder %s43_s20, 2 }
  0x1c   : > { %8146 = sst [smem:[#allocation24_spill]] %s5482_s16  ;;  %s46_s21 = sadd.s32 1, %s5486_s17 }
  0x1d   : > { %p8066_p1 = scmp.eq.s32.totalorder %s5490_s18, 0  ;;  %p8065_p2 = scmp.eq.s32.totalorder %s5629_s19, 0 }
  0x1e   : > { %s8322_s20 = smov (%p44_p0, %s43_s20), 0  ;;  %s8324_s21 = smov (!%p44_p0, %s46_s21), %s5486_s17 }
  0x1f   : > { %8147 = sst [smem:[#allocation25_spill]] %s8322_s20  ;;  %s51_s22 = ssub.s32 %s5482_s16, %s8322_s20 }
  0x20   : > { %s81_s23 = sadd.s32 1, %s5458_s10  ;;  %p48_p3 = scmp.ge.s32.totalorder %s8324_s21, 2 }
  0x21   : > { %p79_p4 = scmp.eq.s32.totalorder %s51_s22, 0  ;;  %p88_p5 = scmp.ne.s32.totalorder %s5458_s10, %s5454_s9 }
  0x22   : > { %p94_p6 = scmp.ne.s32.totalorder %s5454_s9, %s5450_s30  ;;  %s8326_s21 = smov (%p48_p3, %s8324_s21), 0 }
  0x23   : > { %8148 = sst [smem:[#allocation26_spill]] %s8326_s21  ;;  %s5652_s25 = ssub.s32 %s5486_s17, %s8326_s21 }
  0x24   : > { %s5648_s24 = scalar_select %p79_p4, %s5458_s10, %s81_s23  }
  0x25   : > { %p5656_p7 = por %p88_p5, %p8066_p1  ;;  %s52_s20 = sor.u32 %s51_s22, %s5652_s25 }
  0x26   : > { %8149 = sst [smem:[#allocation27_spill]] %s5648_s24  ;;  %p5663_p8 = por %p94_p6, %p8065_p2 }
  0x27   : > { %p5667_p9 = scmp.eq.s32.totalorder %s52_s20, 0  ;;  %p8064_p11 = scmp.lt.s32.totalorder %s5490_s18, 4 }
  0x28   : > { %s8151_s30 = scalar_select %p5663_p8, 1, 0 }
  0x29   : > { %s319_s21 = sand.u32 1, %s5490_s18   ;;  %s321_s24 = sand.u32 1, %s5458_s10  }
  0x2a   : > { %s4347_s6 = sshll.u32 %s321_s24, 9  ;;  %s4585_s8 = sshll.u32 %s5482_s16, 13 }
  0x2b   : > { %s8153_s1 = sld [smem:[#allocation55_spill]]  ;;  %s323_s22 = scalar_lea.vmem [#allocation6], %s4347_s6 }
  0x2c   : > { %s331_s20 = sshll.u32 %s323_s22, 4  ;;  %p5687_p12 = pnand %p8064_p11, %p5656_p7  ;;  %s5681_s20 = int_to_ptr.vmem [resolvable:$true] %s331_s20 }
  0x2d   : > { %s5692_s7 = scalar_lea.sflag [#allocation7], %s319_s21 }
  0x2e   : > { %p5154_p3 = pneg %p5687_p12 }
  0x31   : > { %s5679_s3 = scalar_lea.hbm %s8153_s1, %s4585_s8  ;;  %s5157_s24 = scalar_lea.hbm %s8153_s1, 16384 }
  0x32   : > { %s5152_s8 = scalar_lea.hbm %s5679_s3, 8192  ;;  %p5158_p6 = scmp.lt.u32.totalorder %s5679_s3, %s8153_s1 }
  0x33   : > { %p5153_p0 = scmp.ne.s32.totalorder %s5679_s3, %s5152_s8  ;;  %p5159_p7 = scmp.lt.u32.totalorder %s5157_s24, %s5152_s8 }
  0x34   : > { %p5161_p11 = scmp.lt.u32.totalorder %s5152_s8, %s5679_s3 }
  0x35   : > { %p5155_p4 = pnand %p5154_p3, %p5153_p0  ;;  %p5160_p10 = por %p5159_p7, %p5158_p6 }
  0x37   : > { %p5156_p5 = pneg %p5155_p4  ;;  %p5162_p2 = por %p5161_p11, %p5160_p10 }
  0x39   : > { %p5163_p1 = pnand %p5162_p2, %p5156_p5 }
  0x3b   : > { %5166 = shalt.err (!%p5163_p1)
}
  0x3c   : > { %s5167_s21 = scalar_lea.vmem %s5681_s20, 8192  ;;  %s5492_s6 = smov [#allocation6]  }
  0x3d   : > { %p5168_p0 = scmp.ne.s32.totalorder %s5681_s20, %s5167_s21  ;;  %s5172_s15 = sshll.u32 %s5492_s6, 4  ;;  %s5173_s15 = int_to_ptr.vmem [resolvable:$false] %s5172_s15 }
  0x3e   : > { %s5174_s26 = scalar_lea.vmem %s5173_s15, 16384  ;;  %p5175_p8 = scmp.lt.s32.totalorder %s5681_s20, %s5173_s15 }
  0x3f   : > { %p5170_p4 = pnand %p5168_p0, %p5154_p3  ;;  %p5176_p6 = scmp.lt.s32.totalorder %s5174_s26, %s5167_s21 }
  0x41   : > { %p5171_p13 = pneg %p5170_p4  ;;  %p5177_p7 = por %p5176_p6, %p5175_p8 }
  0x43   : > { %p5178_p10 = pnand %p5177_p7, %p5171_p13 }
  0x45   : > { %5181 = shalt.err (!%p5178_p10)
}
  0x46   : > { %s5493_s8 = smov 512   ;;  %s5494_s24 = smov 32  }
  0x47   : > { %4742 = dma.hbm_to_vmem [thread:$0]  (!%p5687_p12), %s5679_s3, 8192, %s5681_s20, %s5692_s7, %s5493_s8, %s5493_s8, %s5494_s24  }
  0x48   : > { %p381_p1 = scmp.lt.s32.totalorder %s5490_s18, 5  ;;  %p8155_p2 = scmp.ge.s32.totalorder %s5490_s18, 1 }
  0x49   : > { %s55_s21 = sadd.s32 1, %s5470_s13  ;;  %p62_p11 = scmp.ne.s32.totalorder %s5470_s13, %s5466_s12 }
  0x4a   : > { %p5723_p8 = pnand %p8155_p2, %p381_p1  ;;  %p8158_p13 = scmp.eq.s32.totalorder %s5490_s18, 0 }
  0x4b   : > { %s5733_s6 = scalar_select %p5667_p9, %s5470_s13, %s55_s21  }
  0x4c   : > { %p64_p3 = por %p8158_p13, %p62_p11  ;;  %p68_p5 = scmp.ne.s32.totalorder %s5466_s12, %s5462_s11 }
  0x4d   : > { %8157 = sst [smem:[#allocation28_spill]] %s5733_s6  ;;  %s296_s15 = sand.u32 1, %s5470_s13  }
  0x4e   : > { %s4583_s26 = sshll.u32 %s5486_s17, 5  ;;  %p8159_p0 = scmp.eq.s32.totalorder %s5629_s19, 0 }
  0x4f   : > { %s4343_s3 = sshll.u32 %s296_s15, 6  ;;  %s306_s20 = sadd.s32 %s5482_s16, %s4583_s26 }
  0x50   : > { %p5743_p4 = por %p8159_p0, %p68_p5  ;;  %s4346_s8 = sshll.u32 %s306_s20, 6 }
  0x51   : > { %s8161_s0 = sld [smem:[#allocation54_spill]]  ;;  %s300_s11 = scalar_lea.vmem [#allocation3], %s4343_s3 }
  0x52   : > { %s8160_s2 = scalar_select %p5743_p4, 1, 0 }
  0x53   : > { %s309_s23 = sshll.u32 %s300_s11, 4  ;;  %p8162_p9 = scmp.lt.s32.totalorder %s5490_s18, 4  ;;  %s5753_s23 = int_to_ptr.vmem [resolvable:$true] %s309_s23 }
  0x54   : > { %s5761_s26 = scalar_lea.sflag [#allocation4], %s296_s15 }
  0x55   : > { %p5757_p12 = pnand %p8162_p9, %p64_p3 }
  0x57   : > { %s5751_s10 = scalar_lea.hbm %s8161_s0, %s4346_s8  ;;  %p5184_p7 = pneg %p5757_p12 }
  0x58   : > { %s5182_s1 = scalar_lea.hbm %s5751_s10, 1024  ;;  %s5187_s8 = scalar_lea.hbm %s8161_s0, 4096 }
  0x59   : > { %p5183_p6 = scmp.ne.s32.totalorder %s5751_s10, %s5182_s1  ;;  %p5188_p2 = scmp.lt.u32.totalorder %s5751_s10, %s8161_s0 }
  0x5a   : > { %p5189_p11 = scmp.lt.u32.totalorder %s5187_s8, %s5182_s1  ;;  %p5191_p3 = scmp.lt.u32.totalorder %s5182_s1, %s5751_s10 }
  0x5b   : > { %p5185_p10 = pnand %p5184_p7, %p5183_p6 }
  0x5c   : > { %p5190_p13 = por %p5189_p11, %p5188_p2 }
  0x5d   : > { %p5186_p1 = pneg %p5185_p10 }
  0x5e   : > { %p5192_p5 = por %p5191_p3, %p5190_p13 }
  0x60   : > { %p5193_p0 = pnand %p5192_p5, %p5186_p1 }
  0x62   : > { %5196 = shalt.err (!%p5193_p0)
}
  0x63   : > { %s5197_s15 = scalar_lea.vmem %s5753_s23, 1024  ;;  %s5495_s3 = smov [#allocation3]  }
  0x64   : > { %p5198_p9 = scmp.ne.s32.totalorder %s5753_s23, %s5197_s15  ;;  %s5202_s20 = sshll.u32 %s5495_s3, 4  ;;  %s5203_s20 = int_to_ptr.vmem [resolvable:$false] %s5202_s20 }
  0x65   : > { %s5204_s24 = scalar_lea.vmem %s5203_s20, 2048  ;;  %p5205_p4 = scmp.lt.s32.totalorder %s5753_s23, %s5203_s20 }
  0x66   : > { %p5200_p6 = pnand %p5198_p9, %p5184_p7  ;;  %p5206_p2 = scmp.lt.s32.totalorder %s5204_s24, %s5197_s15 }
  0x68   : > { %p5201_p10 = pneg %p5200_p6  ;;  %p5207_p11 = por %p5206_p2, %p5205_p4 }
  0x6a   : > { %p5208_p13 = pnand %p5207_p11, %p5201_p10 }
  0x6c   : > { %5211 = shalt.err (!%p5208_p13)
}
  0x6d   : > { %s8072_s1 = smov 128   ;;  %s5497_s8 = smov 64  }
  0x6e   : > { %s5498_s11 = smov 4   ;;  %s8070_s15 = sadd.s32 4294967294, %s5490_s18  }
  0x6f   : > { %4739 = dma.hbm_to_vmem [thread:$0]  (!%p5757_p12), %s5751_s10, 1024, %s5753_s23, %s5761_s26, %s8072_s1, %s5497_s8, %s5498_s11  }
  0x70   : > { %s149_s3 = sadd.s32 1, %s5446_s29  ;;  %p8164_p4 = scmp.eq.s32.totalorder %s5652_s25, 0 }
  0x71   : > { %p156_p7 = scmp.ne.s32.totalorder %s5446_s29, %s5442_s28  ;;  %p162_p1 = scmp.ne.s32.totalorder %s5442_s28, %s5438_s27 }
  0x72   : > { %s5795_s20 = scalar_select %p8164_p4, %s5446_s29, %s149_s3  }
  0x73   : > { %p212_p3 = scmp.eq.s32.totalorder %s5629_s19, 3  ;;  %p218_p5 = scmp.eq.s32.totalorder %s8070_s15, 3 }
  0x74   : > { %8165 = sst [smem:[#allocation29_spill]] %s5795_s20  ;;  %p8166_p0 = scmp.eq.s32.totalorder %s5490_s18, 0 }
  0x75   : > { %p8167_p6 = scmp.eq.s32.totalorder %s5629_s19, 0  ;;  %p5812_p2 = por %p212_p3, %p156_p7 }
  0x76   : > { %p158_p9 = por %p156_p7, %p8166_p0  ;;  %p5816_p12 = por %p218_p5, %p162_p1 }
  0x77   : > { %p5808_p10 = por %p162_p1, %p8167_p6  ;;  %s8071_s23 = sand.u32 1, %s5446_s29  }
  0x78   : > { %s8169_s10 = scalar_select %p5812_p2, 1, 0 }
  0x79   : > { %s8168_s24 = scalar_select %p5808_p10, 1, 0 }
  0x7a   : > { %s8170_s25 = scalar_select %p5816_p12, 1, 0 }
  0x7b   : > { %s8074_s21 = sshll.u32 %s5486_s17, 11  ;;  %s5824_s26 = sshll.u32 %s8071_s23, 7 }
  0x7c   : > { %8171 = sst [smem:[#allocation30_spill]] %s8170_s25  ;;  %s8172_s4 = sld [smem:[#allocation58_spill]] }
  0x7d   : > { %p8173_p11 = scmp.lt.s32.totalorder %s5490_s18, 4  ;;  %s345_s23 = scalar_lea.vmem [#allocation8], %s5824_s26 }
  0x7e   : > { %s352_s1 = sshll.u32 %s345_s23, 4  ;;  %s5840_s1 = int_to_ptr.vmem [resolvable:$true] %s352_s1 }
  0x7f   : > { %p5835_p13 = pnand %p8173_p11, %p158_p9 }
  0x81   : > { %p5214_p7 = pneg %p5835_p13 }
  0x82   : > { %s5831_s3 = scalar_lea.hbm %s8172_s4, %s8074_s21  ;;  %s5217_s21 = scalar_lea.hbm %s8172_s4, 4096 }
  0x83   : > { %s5212_s0 = scalar_lea.hbm %s5831_s3, 2048  ;;  %p5218_p5 = scmp.lt.u32.totalorder %s5831_s3, %s8172_s4 }
  0x84   : > { %p5213_p4 = scmp.ne.s32.totalorder %s5831_s3, %s5212_s0  ;;  %p5219_p0 = scmp.lt.u32.totalorder %s5217_s21, %s5212_s0 }
  0x85   : > { %p5221_p6 = scmp.lt.u32.totalorder %s5212_s0, %s5831_s3 }
  0x86   : > { %p5215_p1 = pnand %p5214_p7, %p5213_p4  ;;  %p5220_p9 = por %p5219_p0, %p5218_p5 }
  0x88   : > { %p5216_p3 = pneg %p5215_p1  ;;  %p5222_p11 = por %p5221_p6, %p5220_p9 }
  0x8a   : > { %p5223_p12 = pnand %p5222_p11, %p5216_p3 }
  0x8c   : > { %5226 = shalt.err (!%p5223_p12)
}
  0x8d   : > { %s5227_s23 = scalar_lea.vmem %s5840_s1, 2048  ;;  %s5499_s8 = smov [#allocation8]  }
  0x8e   : > { %p5228_p4 = scmp.ne.s32.totalorder %s5840_s1, %s5227_s23  ;;  %s5232_s11 = sshll.u32 %s5499_s8, 4  ;;  %s5233_s11 = int_to_ptr.vmem [resolvable:$false] %s5232_s11 }
  0x8f   : > { %s5234_s16 = scalar_lea.vmem %s5233_s11, 4096  ;;  %p5235_p10 = scmp.lt.s32.totalorder %s5840_s1, %s5233_s11 }
  0x90   : > { %p5230_p1 = pnand %p5228_p4, %p5214_p7  ;;  %p5236_p5 = scmp.lt.s32.totalorder %s5234_s16, %s5227_s23 }
  0x92   : > { %p5231_p2 = pneg %p5230_p1  ;;  %p5237_p0 = por %p5236_p5, %p5235_p10 }
  0x94   : > { %p5238_p9 = pnand %p5237_p0, %p5231_p2 }
  0x96   : > { %5241 = shalt.err (!%p5238_p9)
}
  0x97   : > { %s5500_s0 = smov 8   ;;  %s8175_s6 = smov 128  }
  0x98   : > { %4745 = dma.hbm_to_vmem [thread:$0]  (!%p5835_p13), %s5831_s3, 2048, %s5840_s1, %s5692_s7, %s8175_s6, %s8175_s6, %s5500_s0  }
  0x99   : > { %s8176_s21 = sshll.u32 %s5486_s17, 11  ;;  %s366_s16 = scalar_lea.vmem [#allocation9], %s5824_s26 }
  0x9a   : > { %s5876_s11 = scalar_lea.hbm %s8053_s5, %s8176_s21  ;;  %s373_s4 = sshll.u32 %s366_s16, 4  ;;  %s5879_s4 = int_to_ptr.vmem [resolvable:$true] %s373_s4 }
  0x9b   : > { %s8177_s13 = sand.u32 1, %s5446_s29   ;;  %s5242_s25 = scalar_lea.hbm %s5876_s11, 2048 }
  0x9c   : > { %s5883_s20 = scalar_lea.sflag [#allocation10], %s8177_s13  ;;  %p5243_p10 = scmp.ne.s32.totalorder %s5876_s11, %s5242_s25 }
  0x9d   : > { %s5247_s3 = scalar_lea.hbm %s8053_s5, 4096  ;;  %p5248_p3 = scmp.lt.u32.totalorder %s5876_s11, %s8053_s5 }
  0x9e   : > { %p5245_p2 = pnand %p5243_p10, %p5214_p7  ;;  %p5249_p6 = scmp.lt.u32.totalorder %s5247_s3, %s5242_s25 }
  0x9f   : > { %p5251_p4 = scmp.lt.u32.totalorder %s5242_s25, %s5876_s11 }
  0xa0   : > { %p5246_p12 = pneg %p5245_p2  ;;  %p5250_p11 = por %p5249_p6, %p5248_p3 }
  0xa2   : > { %p5252_p1 = por %p5251_p4, %p5250_p11 }
  0xa4   : > { %p5253_p5 = pnand %p5252_p1, %p5246_p12 }
  0xa6   : > { %5256 = shalt.err (!%p5253_p5)
}
  0xa7   : > { %s5257_s13 = scalar_lea.vmem %s5879_s4, 2048  ;;  %s5501_s26 = smov [#allocation9]  }
  0xa8   : > { %p5258_p0 = scmp.ne.s32.totalorder %s5879_s4, %s5257_s13  ;;  %s5262_s23 = sshll.u32 %s5501_s26, 4  ;;  %s5263_s23 = int_to_ptr.vmem [resolvable:$false] %s5262_s23 }
  0xa9   : > { %s5264_s16 = scalar_lea.vmem %s5263_s23, 4096  ;;  %p5265_p2 = scmp.lt.s32.totalorder %s5879_s4, %s5263_s23 }
  0xaa   : > { %p5260_p9 = pnand %p5258_p0, %p5214_p7  ;;  %p5266_p3 = scmp.lt.s32.totalorder %s5264_s16, %s5257_s13 }
  0xac   : > { %p5261_p10 = pneg %p5260_p9  ;;  %p5267_p6 = por %p5266_p3, %p5265_p2 }
  0xae   : > { %p5268_p11 = pnand %p5267_p6, %p5261_p10 }
  0xb0   : > { %5271 = shalt.err (!%p5268_p11)
}
  0xb1   : > { %4748 = dma.hbm_to_vmem [thread:$0]  (!%p5835_p13), %s5876_s11, 2048, %s5879_s4, %s5883_s20, %s8175_s6, %s8175_s6, %s5500_s0  }
  0xb2   : > { %385 = sbr.rel (%p5723_p8) target bundleno = 1796 (0x704), region = 44  ;;  %s387_s25 = sand.u32 (!%p5723_p8), 1, %s5466_s12  }
  0xb3   : > { %s4358_s7 = sshll.u32 (!%p5723_p8), %s387_s25, 6  ;;  %s388_s1 = scalar_lea.sflag (!%p5723_p8), [#allocation4], %s387_s25 }
  0xb4   : > { %s5915_s3 = scalar_lea.vmem (!%p5723_p8), [#allocation3], %s4358_s7  ;;  %p8178_p7 = scmp.ne.s32.totalorder (!%p5723_p8), %s8160_s2, 0 }
  0xb9   : > { %5413 = dma.done.wait (%p8178_p7), %s388_s1, 1024  }
  0xba   : > { %5415 = vsyncadd (%p8178_p7), %s388_s1, 4294966272  ;;  %s396_s4 = sand.u32 1, %s5629_s19   ;;  %s398_s15 = sand.u32 1, %s5454_s9  }
  0xbb   : > { %s4359_s22 = sshll.u32 %s398_s15, 9  ;;  %s397_s20 = scalar_lea.sflag [#allocation7], %s396_s4 }
  0xbc   : > { %s5925_s0 = scalar_lea.vmem [#allocation6], %s4359_s22  ;;  %p8179_p8 = scmp.ne.s32.totalorder %s8151_s30, 0 }
  0xbe   : > { %5417 = dma.done.wait (%p8179_p8), %s397_s20, 8192  }
  0xbf   : > { %5419 = vsyncadd (%p8179_p8), %s397_s20, 4294959104  ;;  %s5932_s2 = sand.u32 1, %s5442_s28   ;;  %p8180_p13 = scmp.ne.s32.totalorder %s8168_s24, 0 }
  0xc0   : > { %s4360_s6 = sshll.u32 %s5932_s2, 7 }
  0xc1   : > { %s5935_s11 = scalar_lea.vmem [#allocation8], %s4360_s6 }
  0xc2   : > { %5421 = dma.done.wait (%p8180_p13), %s397_s20, 2048  }
  0xc3   : > { %5423 = vsyncadd (%p8180_p13), %s397_s20, 4294965248  ;;  %s415_s21 = scalar_lea.sflag [#allocation10], %s5932_s2  ;;  %s5942_s8 = scalar_lea.vmem [#allocation9], %s4360_s6 }
  0xc4   : > { %5425 = dma.done.wait (%p8180_p13), %s415_s21, 2048  }
  0xc5   : > { %5427 = vsyncadd (%p8180_p13), %s415_s21, 4294965248  ;;  %s4362_s30 = sshll.u32 %s5932_s2, 8  ;;  %s5951_s26 = scalar_lea.vmem [#allocation12], %s4360_s6 }
  0xc6   : > { %s5949_s13 = scalar_lea.vmem [#allocation11], %s4362_s30  ;;  %s5953_s23 = scalar_lea.vmem [#allocation14], %s4360_s6 }
  0xc7   : > { %p4365_p12 = scmp.ne.s32.totalorder %s5474_s14, 0 }
  0xc8   : > { %v5502_v0 = vmov (!%p4365_p12), 0.0  }
  0xc9   : > { %487 = sbr.rel (%p4365_p12) target bundleno = 265 (0x109), region = 64  ;;  %488 = vst [vmem:[#allocation2] sm:$0xff] (!%p4365_p12), %v5502_v0  ;;  %489 = vst [vmem:[#allocation2 + $0x8] sm:$0xff] (!%p4365_p12), %v5502_v0 }
  0xca   : > { %490 = vst [vmem:[#allocation2 + $0x10] sm:$0xff] (!%p4365_p12), %v5502_v0  ;;  %491 = vst [vmem:[#allocation2 + $0x18] sm:$0xff] (!%p4365_p12), %v5502_v0 }
  0xcb   : > { %492 = vst [vmem:[#allocation2 + $0x20] sm:$0xff] (!%p4365_p12), %v5502_v0  ;;  %493 = vst [vmem:[#allocation2 + $0x28] sm:$0xff] (!%p4365_p12), %v5502_v0 }
  0xcc   : > { %494 = vst [vmem:[#allocation2 + $0x30] sm:$0xff] (!%p4365_p12), %v5502_v0  ;;  %495 = vst [vmem:[#allocation2 + $0x38] sm:$0xff] (!%p4365_p12), %v5502_v0 }
  0xcd   : > { %496 = vst [vmem:[#allocation2 + $0x40] sm:$0xff] (!%p4365_p12), %v5502_v0  ;;  %497 = vst [vmem:[#allocation2 + $0x48] sm:$0xff] (!%p4365_p12), %v5502_v0 }
  0xce   : > { %498 = vst [vmem:[#allocation2 + $0x50] sm:$0xff] (!%p4365_p12), %v5502_v0  ;;  %499 = vst [vmem:[#allocation2 + $0x58] sm:$0xff] (!%p4365_p12), %v5502_v0 }
  0xcf   : > { %500 = vst [vmem:[#allocation2 + $0x60] sm:$0xff] (!%p4365_p12), %v5502_v0  ;;  %501 = vst [vmem:[#allocation2 + $0x68] sm:$0xff] (!%p4365_p12), %v5502_v0 }
  0xd0   : > { %502 = vst [vmem:[#allocation2 + $0x70] sm:$0xff] %v5502_v0  ;;  %503 = vst [vmem:[#allocation2 + $0x78] sm:$0xff] %v5502_v0 }
  0xd1   : > { %504 = vst [vmem:[#allocation2 + $0x80] sm:$0xff] %v5502_v0  ;;  %505 = vst [vmem:[#allocation2 + $0x88] sm:$0xff] %v5502_v0 }
  0xd2   : > { %506 = vst [vmem:[#allocation2 + $0x90] sm:$0xff] %v5502_v0  ;;  %507 = vst [vmem:[#allocation2 + $0x98] sm:$0xff] %v5502_v0 }
  0xd3   : > { %508 = vst [vmem:[#allocation2 + $0xa0] sm:$0xff] %v5502_v0  ;;  %509 = vst [vmem:[#allocation2 + $0xa8] sm:$0xff] %v5502_v0 }
  0xd4   : > { %510 = vst [vmem:[#allocation2 + $0xb0] sm:$0xff] %v5502_v0  ;;  %511 = vst [vmem:[#allocation2 + $0xb8] sm:$0xff] %v5502_v0 }
  0xd5   : > { %512 = vst [vmem:[#allocation2 + $0xc0] sm:$0xff] %v5502_v0  ;;  %513 = vst [vmem:[#allocation2 + $0xc8] sm:$0xff] %v5502_v0 }
  0xd6   : > { %514 = vst [vmem:[#allocation2 + $0xd0] sm:$0xff] %v5502_v0  ;;  %515 = vst [vmem:[#allocation2 + $0xd8] sm:$0xff] %v5502_v0 }
  0xd7   : > { %516 = vst [vmem:[#allocation2 + $0xe0] sm:$0xff] %v5502_v0  ;;  %517 = vst [vmem:[#allocation2 + $0xe8] sm:$0xff] %v5502_v0 }
  0xd8   : > { %518 = vst [vmem:[#allocation2 + $0xf0] sm:$0xff] %v5502_v0  ;;  %519 = vst [vmem:[#allocation2 + $0xf8] sm:$0xff] %v5502_v0 }
  0xd9   : > { %520 = vst [vmem:[#allocation2 + $0x100] sm:$0xff] %v5502_v0  ;;  %521 = vst [vmem:[#allocation2 + $0x108] sm:$0xff] %v5502_v0 }
  0xda   : > { %522 = vst [vmem:[#allocation2 + $0x110] sm:$0xff] %v5502_v0  ;;  %523 = vst [vmem:[#allocation2 + $0x118] sm:$0xff] %v5502_v0 }
  0xdb   : > { %524 = vst [vmem:[#allocation2 + $0x120] sm:$0xff] %v5502_v0  ;;  %525 = vst [vmem:[#allocation2 + $0x128] sm:$0xff] %v5502_v0 }
  0xdc   : > { %526 = vst [vmem:[#allocation2 + $0x130] sm:$0xff] %v5502_v0  ;;  %527 = vst [vmem:[#allocation2 + $0x138] sm:$0xff] %v5502_v0 }
  0xdd   : > { %528 = vst [vmem:[#allocation2 + $0x140] sm:$0xff] %v5502_v0  ;;  %529 = vst [vmem:[#allocation2 + $0x148] sm:$0xff] %v5502_v0 }
  0xde   : > { %530 = vst [vmem:[#allocation2 + $0x150] sm:$0xff] %v5502_v0  ;;  %531 = vst [vmem:[#allocation2 + $0x158] sm:$0xff] %v5502_v0 }
  0xdf   : > { %532 = vst [vmem:[#allocation2 + $0x160] sm:$0xff] %v5502_v0  ;;  %533 = vst [vmem:[#allocation2 + $0x168] sm:$0xff] %v5502_v0 }
  0xe0   : > { %534 = vst [vmem:[#allocation2 + $0x170] sm:$0xff] %v5502_v0  ;;  %535 = vst [vmem:[#allocation2 + $0x178] sm:$0xff] %v5502_v0 }
  0xe1   : > { %536 = vst [vmem:[#allocation2 + $0x180] sm:$0xff] %v5502_v0  ;;  %537 = vst [vmem:[#allocation2 + $0x188] sm:$0xff] %v5502_v0 }
  0xe2   : > { %538 = vst [vmem:[#allocation2 + $0x190] sm:$0xff] %v5502_v0  ;;  %539 = vst [vmem:[#allocation2 + $0x198] sm:$0xff] %v5502_v0 }
  0xe3   : > { %540 = vst [vmem:[#allocation2 + $0x1a0] sm:$0xff] %v5502_v0  ;;  %541 = vst [vmem:[#allocation2 + $0x1a8] sm:$0xff] %v5502_v0 }
  0xe4   : > { %542 = vst [vmem:[#allocation2 + $0x1b0] sm:$0xff] %v5502_v0  ;;  %543 = vst [vmem:[#allocation2 + $0x1b8] sm:$0xff] %v5502_v0 }
  0xe5   : > { %544 = vst [vmem:[#allocation2 + $0x1c0] sm:$0xff] %v5502_v0  ;;  %545 = vst [vmem:[#allocation2 + $0x1c8] sm:$0xff] %v5502_v0 }
  0xe6   : > { %546 = vst [vmem:[#allocation2 + $0x1d0] sm:$0xff] %v5502_v0  ;;  %547 = vst [vmem:[#allocation2 + $0x1d8] sm:$0xff] %v5502_v0 }
  0xe7   : > { %548 = vst [vmem:[#allocation2 + $0x1e0] sm:$0xff] %v5502_v0  ;;  %549 = vst [vmem:[#allocation2 + $0x1e8] sm:$0xff] %v5502_v0 }
  0xe8   : > { %550 = vst [vmem:[#allocation2 + $0x1f0] sm:$0xff] %v5502_v0  ;;  %551 = vst [vmem:[#allocation2 + $0x1f8] sm:$0xff] %v5502_v0 }
  0xe9   : > { %552 = vst [vmem:[#allocation2 + $0x200] sm:$0xff] %v5502_v0  ;;  %553 = vst [vmem:[#allocation2 + $0x208] sm:$0xff] %v5502_v0 }
  0xea   : > { %554 = vst [vmem:[#allocation2 + $0x210] sm:$0xff] %v5502_v0  ;;  %555 = vst [vmem:[#allocation2 + $0x218] sm:$0xff] %v5502_v0 }
  0xeb   : > { %556 = vst [vmem:[#allocation2 + $0x220] sm:$0xff] %v5502_v0  ;;  %557 = vst [vmem:[#allocation2 + $0x228] sm:$0xff] %v5502_v0 }
  0xec   : > { %558 = vst [vmem:[#allocation2 + $0x230] sm:$0xff] %v5502_v0  ;;  %559 = vst [vmem:[#allocation2 + $0x238] sm:$0xff] %v5502_v0 }
  0xed   : > { %560 = vst [vmem:[#allocation2 + $0x240] sm:$0xff] %v5502_v0  ;;  %561 = vst [vmem:[#allocation2 + $0x248] sm:$0xff] %v5502_v0 }
  0xee   : > { %562 = vst [vmem:[#allocation2 + $0x250] sm:$0xff] %v5502_v0  ;;  %563 = vst [vmem:[#allocation2 + $0x258] sm:$0xff] %v5502_v0 }
  0xef   : > { %564 = vst [vmem:[#allocation2 + $0x260] sm:$0xff] %v5502_v0  ;;  %565 = vst [vmem:[#allocation2 + $0x268] sm:$0xff] %v5502_v0 }
  0xf0   : > { %566 = vst [vmem:[#allocation2 + $0x270] sm:$0xff] %v5502_v0  ;;  %567 = vst [vmem:[#allocation2 + $0x278] sm:$0xff] %v5502_v0 }
  0xf1   : > { %568 = vst [vmem:[#allocation2 + $0x280] sm:$0xff] %v5502_v0  ;;  %569 = vst [vmem:[#allocation2 + $0x288] sm:$0xff] %v5502_v0 }
  0xf2   : > { %570 = vst [vmem:[#allocation2 + $0x290] sm:$0xff] %v5502_v0  ;;  %571 = vst [vmem:[#allocation2 + $0x298] sm:$0xff] %v5502_v0 }
  0xf3   : > { %572 = vst [vmem:[#allocation2 + $0x2a0] sm:$0xff] %v5502_v0  ;;  %573 = vst [vmem:[#allocation2 + $0x2a8] sm:$0xff] %v5502_v0 }
  0xf4   : > { %574 = vst [vmem:[#allocation2 + $0x2b0] sm:$0xff] %v5502_v0  ;;  %575 = vst [vmem:[#allocation2 + $0x2b8] sm:$0xff] %v5502_v0 }
  0xf5   : > { %576 = vst [vmem:[#allocation2 + $0x2c0] sm:$0xff] %v5502_v0  ;;  %577 = vst [vmem:[#allocation2 + $0x2c8] sm:$0xff] %v5502_v0 }
  0xf6   : > { %578 = vst [vmem:[#allocation2 + $0x2d0] sm:$0xff] %v5502_v0  ;;  %579 = vst [vmem:[#allocation2 + $0x2d8] sm:$0xff] %v5502_v0 }
  0xf7   : > { %580 = vst [vmem:[#allocation2 + $0x2e0] sm:$0xff] %v5502_v0  ;;  %581 = vst [vmem:[#allocation2 + $0x2e8] sm:$0xff] %v5502_v0 }
  0xf8   : > { %582 = vst [vmem:[#allocation2 + $0x2f0] sm:$0xff] %v5502_v0  ;;  %583 = vst [vmem:[#allocation2 + $0x2f8] sm:$0xff] %v5502_v0 }
  0xf9   : > { %584 = vst [vmem:[#allocation2 + $0x300] sm:$0xff] %v5502_v0  ;;  %585 = vst [vmem:[#allocation2 + $0x308] sm:$0xff] %v5502_v0 }
  0xfa   : > { %586 = vst [vmem:[#allocation2 + $0x310] sm:$0xff] %v5502_v0  ;;  %587 = vst [vmem:[#allocation2 + $0x318] sm:$0xff] %v5502_v0 }
  0xfb   : > { %588 = vst [vmem:[#allocation2 + $0x320] sm:$0xff] %v5502_v0  ;;  %589 = vst [vmem:[#allocation2 + $0x328] sm:$0xff] %v5502_v0 }
  0xfc   : > { %590 = vst [vmem:[#allocation2 + $0x330] sm:$0xff] %v5502_v0  ;;  %591 = vst [vmem:[#allocation2 + $0x338] sm:$0xff] %v5502_v0 }
  0xfd   : > { %592 = vst [vmem:[#allocation2 + $0x340] sm:$0xff] %v5502_v0  ;;  %593 = vst [vmem:[#allocation2 + $0x348] sm:$0xff] %v5502_v0 }
  0xfe   : > { %594 = vst [vmem:[#allocation2 + $0x350] sm:$0xff] %v5502_v0  ;;  %595 = vst [vmem:[#allocation2 + $0x358] sm:$0xff] %v5502_v0 }
  0xff   : > { %596 = vst [vmem:[#allocation2 + $0x360] sm:$0xff] %v5502_v0  ;;  %597 = vst [vmem:[#allocation2 + $0x368] sm:$0xff] %v5502_v0 }
 0x100   : > { %598 = vst [vmem:[#allocation2 + $0x370] sm:$0xff] %v5502_v0  ;;  %599 = vst [vmem:[#allocation2 + $0x378] sm:$0xff] %v5502_v0 }
 0x101   : > { %600 = vst [vmem:[#allocation2 + $0x380] sm:$0xff] %v5502_v0  ;;  %601 = vst [vmem:[#allocation2 + $0x388] sm:$0xff] %v5502_v0 }
 0x102   : > { %602 = vst [vmem:[#allocation2 + $0x390] sm:$0xff] %v5502_v0  ;;  %603 = vst [vmem:[#allocation2 + $0x398] sm:$0xff] %v5502_v0 }
 0x103   : > { %604 = vst [vmem:[#allocation2 + $0x3a0] sm:$0xff] %v5502_v0  ;;  %605 = vst [vmem:[#allocation2 + $0x3a8] sm:$0xff] %v5502_v0 }
 0x104   : > { %606 = vst [vmem:[#allocation2 + $0x3b0] sm:$0xff] %v5502_v0  ;;  %607 = vst [vmem:[#allocation2 + $0x3b8] sm:$0xff] %v5502_v0 }
 0x105   : > { %608 = vst [vmem:[#allocation2 + $0x3c0] sm:$0xff] %v5502_v0  ;;  %609 = vst [vmem:[#allocation2 + $0x3c8] sm:$0xff] %v5502_v0 }
 0x106   : > { %610 = vst [vmem:[#allocation2 + $0x3d0] sm:$0xff] %v5502_v0  ;;  %611 = vst [vmem:[#allocation2 + $0x3d8] sm:$0xff] %v5502_v0 }
 0x107   : > { %612 = vst [vmem:[#allocation2 + $0x3e0] sm:$0xff] %v5502_v0  ;;  %613 = vst [vmem:[#allocation2 + $0x3e8] sm:$0xff] %v5502_v0 }
 0x108   : > { %614 = vst [vmem:[#allocation2 + $0x3f0] sm:$0xff] %v5502_v0  ;;  %615 = vst [vmem:[#allocation2 + $0x3f8] sm:$0xff] %v5502_v0 }
 0x109 PF: > { %v760_v1 = vld [vmem:[%s5925_s0] sm:$0xff]  ;;  %v761_v3 = vld [vmem:[%s5925_s0 + $0x8] sm:$0xff]  ;;  %v5503_v9 = vmov 0   ;;  %v762_v0 = vld [vmem:[%s5925_s0 + $0x10] sm:$0xff]  ;;  %p4438_p4 = scmp.ne.s32.totalorder %s5474_s14, 1 }
 0x10a   : > { %v764_v2 = vld [vmem:[%s5925_s0 + $0x20] sm:$0xff]  ;;  %v765_v5 = vld [vmem:[%s5925_s0 + $0x28] sm:$0xff]  ;;  %1224 = vmatprep.mubr.bf16.mxu0 %v5503_v9  ;;  %1337 = vmatprep.mubr.bf16.mxu1 %v5503_v9 }
 0x10b   : > { %v4375_v4 = vcombine.high %v760_v1, %v764_v2  ;;  %v4374_v6 = vcombine.low %v760_v1, %v764_v2  ;;  %v768_v7 = vld [vmem:[%s5925_s0 + $0x40] sm:$0xff]  ;;  %v4377_v10 = vcombine.high %v761_v3, %v765_v5  ;;  %v4376_v11 = vcombine.low %v761_v3, %v765_v5  ;;  %v769_v13 = vld [vmem:[%s5925_s0 + $0x48] sm:$0xff]  ;;  %v766_v1 = vld [vmem:[%s5925_s0 + $0x30] sm:$0xff] }
 0x10c   : > { %v772_v8 = vld [vmem:[%s5925_s0 + $0x60] sm:$0xff]  ;;  %v773_v14 = vld [vmem:[%s5925_s0 + $0x68] sm:$0xff]  ;;  %v763_v2 = vld [vmem:[%s5925_s0 + $0x18] sm:$0xff] }
 0x10d   : > { %v4383_v12 = vcombine.high %v768_v7, %v772_v8  ;;  %v776_v15 = vld [vmem:[%s5925_s0 + $0x80] sm:$0xff]  ;;  %1192 = vmatprep.subr.bf16.mxu0 %v4375_v4  ;;  %v4385_v16 = vcombine.high %v769_v13, %v773_v14  ;;  %v777_v18 = vld [vmem:[%s5925_s0 + $0x88] sm:$0xff]  ;;  %1305 = vmatprep.subr.bf16.mxu1 %v4377_v10  ;;  %v4382_v20 = vcombine.low %v768_v7, %v772_v8  ;;  %v767_v3 = vld [vmem:[%s5925_s0 + $0x38] sm:$0xff] }
 0x10e   : > { %v780_v17 = vld [vmem:[%s5925_s0 + $0xa0] sm:$0xff]  ;;  %v781_v19 = vld [vmem:[%s5925_s0 + $0xa8] sm:$0xff]  ;;  %1193 = vmatpush1.bf16.msra.mxu0 %v4374_v6  ;;  %1306 = vmatpush1.bf16.msra.mxu1 %v4376_v11  ;;  %v4384_v21 = vcombine.low %v769_v13, %v773_v14  ;;  %v4379_v6 = vcombine.high %v762_v0, %v766_v1  ;;  %v4381_v7 = vcombine.high %v763_v2, %v767_v3  ;;  %v770_v10 = vld [vmem:[%s5925_s0 + $0x50] sm:$0xff] }
 0x10f   : > { %1194 = vmatprep.subr.bf16.mxu0 %v4383_v12  ;;  %v4391_v22 = vcombine.high %v776_v15, %v780_v17  ;;  %1307 = vmatprep.subr.bf16.mxu1 %v4385_v16  ;;  %v4393_v23 = vcombine.high %v777_v18, %v781_v19  ;;  %v784_v24 = vld [vmem:[%s5925_s0 + $0xc0] sm:$0xff]  ;;  %v785_v26 = vld [vmem:[%s5925_s0 + $0xc8] sm:$0xff]  ;;  %v4390_v28 = vcombine.low %v776_v15, %v780_v17  ;;  %v774_v11 = vld [vmem:[%s5925_s0 + $0x70] sm:$0xff] }
 0x110   : > { %v788_v25 = vld [vmem:[%s5925_s0 + $0xe0] sm:$0xff]  ;;  %v789_v27 = vld [vmem:[%s5925_s0 + $0xe8] sm:$0xff]  ;;  %v4392_v29 = vcombine.low %v777_v18, %v781_v19  ;;  %v4378_v12 = vcombine.low %v762_v0, %v766_v1  ;;  %v771_v13 = vld [vmem:[%s5925_s0 + $0x58] sm:$0xff]  ;;  %v4380_v15 = vcombine.low %v763_v2, %v767_v3  ;;  %v4387_v16 = vcombine.high %v770_v10, %v774_v11 }
 0x111   : > { %v4399_v30 = vcombine.high %v784_v24, %v788_v25  ;;  %v4401_v31 = vcombine.high %v785_v26, %v789_v27  ;;  %v792_v32 = vld [vmem:[%s5925_s0 + $0x100] sm:$0xff]  ;;  %v793_v34 = vld [vmem:[%s5925_s0 + $0x108] sm:$0xff]  ;;  %v4398_v36 = vcombine.low %v784_v24, %v788_v25  ;;  %v4400_v37 = vcombine.low %v785_v26, %v789_v27  ;;  %v775_v14 = vld [vmem:[%s5925_s0 + $0x78] sm:$0xff] }
 0x112   : > { %1195 = vmatpush1.bf16.msra.mxu0 %v4382_v20  ;;  %1308 = vmatpush1.bf16.msra.mxu1 %v4384_v21  ;;  %v796_v33 = vld [vmem:[%s5925_s0 + $0x120] sm:$0xff]  ;;  %v797_v35 = vld [vmem:[%s5925_s0 + $0x128] sm:$0xff]  ;;  %v778_v17 = vld [vmem:[%s5925_s0 + $0x90] sm:$0xff]  ;;  %v4389_v19 = vcombine.high %v771_v13, %v775_v14 }
 0x113   : > { %1196 = vmatprep.subr.bf16.mxu0 %v4391_v22  ;;  %1309 = vmatprep.subr.bf16.mxu1 %v4393_v23  ;;  %v4407_v38 = vcombine.high %v792_v32, %v796_v33  ;;  %v4409_v39 = vcombine.high %v793_v34, %v797_v35  ;;  %v800_v40 = vld [vmem:[%s5925_s0 + $0x140] sm:$0xff]  ;;  %v801_v42 = vld [vmem:[%s5925_s0 + $0x148] sm:$0xff]  ;;  %v4406_v44 = vcombine.low %v792_v32, %v796_v33  ;;  %v782_v18 = vld [vmem:[%s5925_s0 + $0xb0] sm:$0xff] }
 0x114   : > { %v804_v41 = vld [vmem:[%s5925_s0 + $0x160] sm:$0xff]  ;;  %v805_v43 = vld [vmem:[%s5925_s0 + $0x168] sm:$0xff]  ;;  %v4408_v45 = vcombine.low %v793_v34, %v797_v35  ;;  %v779_v20 = vld [vmem:[%s5925_s0 + $0x98] sm:$0xff]  ;;  %v4386_v22 = vcombine.low %v770_v10, %v774_v11  ;;  %v4388_v23 = vcombine.low %v771_v13, %v775_v14  ;;  %v4395_v24 = vcombine.high %v778_v17, %v782_v18 }
 0x115   : > { %v4415_v46 = vcombine.high %v800_v40, %v804_v41  ;;  %v4417_v47 = vcombine.high %v801_v42, %v805_v43  ;;  %v808_v48 = vld [vmem:[%s5925_s0 + $0x180] sm:$0xff]  ;;  %v809_v50 = vld [vmem:[%s5925_s0 + $0x188] sm:$0xff]  ;;  %v4414_v52 = vcombine.low %v800_v40, %v804_v41  ;;  %v4416_v53 = vcombine.low %v801_v42, %v805_v43  ;;  %v783_v21 = vld [vmem:[%s5925_s0 + $0xb8] sm:$0xff] }
 0x116   : > { %1197 = vmatpush1.bf16.msra.mxu0 %v4390_v28  ;;  %1310 = vmatpush1.bf16.msra.mxu1 %v4392_v29  ;;  %v812_v49 = vld [vmem:[%s5925_s0 + $0x1a0] sm:$0xff]  ;;  %v813_v51 = vld [vmem:[%s5925_s0 + $0x1a8] sm:$0xff]  ;;  %v4397_v25 = vcombine.high %v779_v20, %v783_v21  ;;  %v786_v27 = vld [vmem:[%s5925_s0 + $0xd0] sm:$0xff]  ;;  %v4396_v32 = vcombine.low %v779_v20, %v783_v21 }
 0x117   : > { %1198 = vmatprep.subr.bf16.mxu0 %v4399_v30  ;;  %1311 = vmatprep.subr.bf16.mxu1 %v4401_v31  ;;  %v4423_v54 = vcombine.high %v808_v48, %v812_v49  ;;  %v816_v55 = vld [vmem:[%s5925_s0 + $0x1c0] sm:$0xff]  ;;  %v4425_v56 = vcombine.high %v809_v50, %v813_v51  ;;  %v817_v58 = vld [vmem:[%s5925_s0 + $0x1c8] sm:$0xff]  ;;  %v4422_v60 = vcombine.low %v808_v48, %v812_v49  ;;  %v790_v28 = vld [vmem:[%s5925_s0 + $0xf0] sm:$0xff] }
 0x118   : > { %v820_v57 = vld [vmem:[%s5925_s0 + $0x1e0] sm:$0xff]  ;;  %v821_v59 = vld [vmem:[%s5925_s0 + $0x1e8] sm:$0xff]  ;;  %v4424_v61 = vcombine.low %v809_v50, %v813_v51  ;;  %v787_v29 = vld [vmem:[%s5925_s0 + $0xd8] sm:$0xff]  ;;  %v4394_v31 = vcombine.low %v778_v17, %v782_v18  ;;  %v4403_v33 = vcombine.high %v786_v27, %v790_v28 }
 0x119   : > { %v4431_v62 = vcombine.high %v816_v55, %v820_v57  ;;  %v4433_v63 = vcombine.high %v817_v58, %v821_v59  ;;  %v4430_v4 = vcombine.low %v816_v55, %v820_v57  ;;  %v4432_v5 = vcombine.low %v817_v58, %v821_v59  ;;  %v6123_v8 = vld [vmem:[%s5915_s3] sm:$0xff]   ;;  %v6138_v26 = vld [vmem:[%s5915_s3 + $0x8] sm:$0xff]   ;;  %v791_v30 = vld [vmem:[%s5925_s0 + $0xf8] sm:$0xff] }
 0x11a   : > { %1199 = vmatpush1.bf16.msra.mxu0 %v4398_v36  ;;  %1312 = vmatpush1.bf16.msra.mxu1 %v4400_v37  ;;  %v4405_v34 = vcombine.high %v787_v29, %v791_v30  ;;  %v794_v35 = vld [vmem:[%s5925_s0 + $0x110] sm:$0xff]  ;;  %v795_v37 = vld [vmem:[%s5925_s0 + $0x118] sm:$0xff]  ;;  %v4404_v40 = vcombine.low %v787_v29, %v791_v30  ;;  %v4892_v10 = vld [vmem:[%s5915_s3 + $0x28] sm:$0xff]  }
 0x11b   : > { %1200 = vmatprep.subr.bf16.mxu0 %v4407_v38  ;;  %1313 = vmatprep.subr.bf16.mxu1 %v4409_v39  ;;  %v798_v36 = vld [vmem:[%s5925_s0 + $0x130] sm:$0xff]  ;;  %v799_v38 = vld [vmem:[%s5925_s0 + $0x138] sm:$0xff]  ;;  %v4402_v39 = vcombine.low %v786_v27, %v790_v28  ;;  %v617_v14 = vld [vmem:[#allocation2 + $0x8] sm:$0xff] }
 0x11c   : > { %v4411_v41 = vcombine.high %v794_v35, %v798_v36  ;;  %v6153_v42 = vld [vmem:[%s5915_s3 + $0x10] sm:$0xff]   ;;  %v4413_v43 = vcombine.high %v795_v37, %v799_v38  ;;  %v4410_v48 = vcombine.low %v794_v35, %v798_v36  ;;  %v4412_v49 = vcombine.low %v795_v37, %v799_v38  ;;  %v815_v55 = vld [vmem:[%s5925_s0 + $0x1b8] sm:$0xff]  ;;  %v624_v17 = vld [vmem:[#allocation2 + $0x40] sm:$0xff] }
 0x11d   : > { %v4890_v59 = vld [vmem:[%s5915_s3 + $0x18] sm:$0xff]   ;;  %v4893_v11 = vld [vmem:[%s5915_s3 + $0x30] sm:$0xff]   ;;  %v632_v35 = vld [vmem:[#allocation2 + $0x80] sm:$0xff] }
 0x11e   : > { %1201 = vmatpush1.bf16.msra.mxu0 %v4406_v44  ;;  %1314 = vmatpush1.bf16.msra.mxu1 %v4408_v45  ;;  %v802_v44 = vld [vmem:[%s5925_s0 + $0x150] sm:$0xff]  ;;  %v823_v0 = vld [vmem:[%s5925_s0 + $0x1f8] sm:$0xff]  ;;  %v633_v37 = vld [vmem:[#allocation2 + $0x88] sm:$0xff] }
 0x11f   : > { %1202 = vmatprep.subr.bf16.mxu0 %v4415_v46  ;;  %1315 = vmatprep.subr.bf16.mxu1 %v4417_v47  ;;  %v806_v45 = vld [vmem:[%s5925_s0 + $0x170] sm:$0xff]  ;;  %v803_v46 = vld [vmem:[%s5925_s0 + $0x158] sm:$0xff] }
 0x120   : > { %v807_v47 = vld [vmem:[%s5925_s0 + $0x178] sm:$0xff]  ;;  %v4419_v50 = vcombine.high %v802_v44, %v806_v45  ;;  %v618_v13 = vld [vmem:[#allocation2 + $0x10] sm:$0xff] }
 0x121   : > { %v4421_v51 = vcombine.high %v803_v46, %v807_v47  ;;  %v4420_v57 = vcombine.low %v803_v46, %v807_v47  ;;  %v626_v21 = vld [vmem:[#allocation2 + $0x50] sm:$0xff]  ;;  %v627_v27 = vld [vmem:[#allocation2 + $0x58] sm:$0xff] }
 0x122   : > { %1203 = vmatpush1.bf16.msra.mxu0 %v4414_v52  ;;  %1316 = vmatpush1.bf16.msra.mxu1 %v4416_v53  ;;  %v810_v52 = vld [vmem:[%s5925_s0 + $0x190] sm:$0xff] }
 0x123   : > { %1204 = vmatprep.subr.bf16.mxu0 %v4423_v54  ;;  %1317 = vmatprep.subr.bf16.mxu1 %v4425_v56  ;;  %v814_v53 = vld [vmem:[%s5925_s0 + $0x1b0] sm:$0xff]  ;;  %v811_v54 = vld [vmem:[%s5925_s0 + $0x198] sm:$0xff]  ;;  %v4418_v56 = vcombine.low %v802_v44, %v806_v45  ;;  %v641_v45 = vld [vmem:[#allocation2 + $0xc8] sm:$0xff] }
 0x124   : > { %v4427_v58 = vcombine.high %v810_v52, %v814_v53  ;;  %v4426_v1 = vcombine.low %v810_v52, %v814_v53  ;;  %v4428_v2 = vcombine.low %v811_v54, %v815_v55  ;;  %v634_v36 = vld [vmem:[#allocation2 + $0x90] sm:$0xff] }
 0x125   : > { %v642_v44 = vld [vmem:[#allocation2 + $0xd0] sm:$0xff] }
 0x126   : > { %1205 = vmatpush1.bf16.msra.mxu0 %v4422_v60  ;;  %1318 = vmatpush1.bf16.msra.mxu1 %v4424_v61  ;;  %v4429_v60 = vcombine.high %v811_v54, %v815_v55  ;;  %v818_v61 = vld [vmem:[%s5925_s0 + $0x1d0] sm:$0xff] }
 0x127   : > { %1206 = vmatprep.subr.bf16.mxu0 %v4431_v62  ;;  %1319 = vmatprep.subr.bf16.mxu1 %v4433_v63  ;;  %v822_v62 = vld [vmem:[%s5925_s0 + $0x1f0] sm:$0xff]  ;;  %v819_v63 = vld [vmem:[%s5925_s0 + $0x1d8] sm:$0xff] }
 0x128   : > { %v4435_v3 = vcombine.high %v818_v61, %v822_v62 }
 0x12a   : > { %1207 = vmatpush1.bf16.msra.mxu0 %v4430_v4  ;;  %1320 = vmatpush1.bf16.msra.mxu1 %v4432_v5  ;;  %v4437_v4 = vcombine.high %v819_v63, %v823_v0  ;;  %v4434_v5 = vcombine.low %v818_v61, %v822_v62  ;;  %v649_v61 = vld [vmem:[#allocation2 + $0x108] sm:$0xff] }
 0x12b   : > { %1418 = vmatprep.subr.bf16.mxu0 %v4379_v6  ;;  %1531 = vmatprep.subr.bf16.mxu1 %v4381_v7  ;;  %v4436_v6 = vcombine.low %v819_v63, %v823_v0  ;;  %v4891_v7 = vld [vmem:[%s5915_s3 + $0x20] sm:$0xff]   ;;  %v651_v63 = vld [vmem:[#allocation2 + $0x118] sm:$0xff] }
 0x12c   : > { %v656_v0 = vld [vmem:[#allocation2 + $0x140] sm:$0xff] }
 0x12d   : > { %1225 = vmatmul.mubr.bf16.vlgmr.msra.gmra.mrb[0].mxu0 %v6123_v8  ;;  %1338 = vmatmul.mubr.bf16.vlgmr.msra.gmra.mrb[0].mxu1 %v6123_v8 }
 0x12e   : > { %1419 = vmatpush1.bf16.msra.mxu0 %v4378_v12  ;;  %1532 = vmatpush1.bf16.msra.mxu1 %v4380_v15  ;;  %v4894_v12 = vld [vmem:[%s5915_s3 + $0x38] sm:$0xff]  }
 0x12f   : > { %1234 = vmatprep.mubr.bf16.mxu0 %v5503_v9  ;;  %1347 = vmatprep.mubr.bf16.mxu1 %v5503_v9 }
 0x130   : > { %1420 = vmatprep.subr.bf16.mxu0 %v4387_v16  ;;  %1533 = vmatprep.subr.bf16.mxu1 %v4389_v19  ;;  %v619_v16 = vld [vmem:[#allocation2 + $0x18] sm:$0xff] }
 0x132   : > { %1421 = vmatpush1.bf16.msra.mxu0 %v4386_v22  ;;  %1534 = vmatpush1.bf16.msra.mxu1 %v4388_v23  ;;  %v625_v22 = vld [vmem:[#allocation2 + $0x48] sm:$0xff] }
 0x133   : > { %1422 = vmatprep.subr.bf16.mxu0 %v4395_v24  ;;  %1535 = vmatprep.subr.bf16.mxu1 %v4397_v25 }
 0x135   : > { %1235 = vmatmul.mubr.bf16.gmra.mrb[4].mxu0 %v6138_v26  ;;  %1348 = vmatmul.mubr.bf16.gmra.mrb[4].mxu1 %v6138_v26 }
 0x136   : > { %1244 = vmatprep.mubr.bf16.mxu0 %v5503_v9  ;;  %1357 = vmatprep.mubr.bf16.mxu1 %v5503_v9 }
 0x137   : > { %1423 = vmatpush1.bf16.msra.mxu0 %v4394_v31  ;;  %1536 = vmatpush1.bf16.msra.mxu1 %v4396_v32 }
 0x138   : > { %1424 = vmatprep.subr.bf16.mxu0 %v4403_v33  ;;  %1537 = vmatprep.subr.bf16.mxu1 %v4405_v34 }
 0x13b   : > { %1425 = vmatpush1.bf16.msra.mxu0 %v4402_v39  ;;  %1538 = vmatpush1.bf16.msra.mxu1 %v4404_v40  ;;  %v635_v39 = vld [vmem:[#allocation2 + $0x98] sm:$0xff]  ;;  %v640_v40 = vld [vmem:[#allocation2 + $0xc0] sm:$0xff] }
 0x13c   : > { %1426 = vmatprep.subr.bf16.mxu0 %v4411_v41  ;;  %1539 = vmatprep.subr.bf16.mxu1 %v4413_v43 }
 0x13d   : > { %1245 = vmatmul.mubr.bf16.gmra.mrb[8].mxu0 %v6153_v42  ;;  %1358 = vmatmul.mubr.bf16.gmra.mrb[8].mxu1 %v6153_v42 }
 0x13e   : > { %1254 = vmatprep.mubr.bf16.mxu0 %v5503_v9  ;;  %1367 = vmatprep.mubr.bf16.mxu1 %v5503_v9 }
 0x13f   : > { %1427 = vmatpush1.bf16.msra.mxu0 %v4410_v48  ;;  %1540 = vmatpush1.bf16.msra.mxu1 %v4412_v49 }
 0x140   : > { %1428 = vmatprep.subr.bf16.mxu0 %v4419_v50  ;;  %1541 = vmatprep.subr.bf16.mxu1 %v4421_v51  ;;  %v643_v50 = vld [vmem:[#allocation2 + $0xd8] sm:$0xff] }
 0x143   : > { %1429 = vmatpush1.bf16.msra.mxu0 %v4418_v56  ;;  %1542 = vmatpush1.bf16.msra.mxu1 %v4420_v57 }
 0x144   : > { %1430 = vmatprep.subr.bf16.mxu0 %v4427_v58  ;;  %1543 = vmatprep.subr.bf16.mxu1 %v4429_v60  ;;  %v650_v60 = vld [vmem:[#allocation2 + $0x110] sm:$0xff] }
 0x145   : > { %1255 = vmatmul.mubr.bf16.gmra.mrb[12].mxu0 %v4890_v59  ;;  %1368 = vmatmul.mubr.bf16.gmra.mrb[12].mxu1 %v4890_v59 }
 0x146   : > { %1264 = vmatprep.mubr.bf16.mxu0 %v5503_v9  ;;  %1377 = vmatprep.mubr.bf16.mxu1 %v5503_v9 }
 0x147   : > { %1431 = vmatpush1.bf16.msra.mxu0 %v4426_v1  ;;  %1544 = vmatpush1.bf16.msra.mxu1 %v4428_v2 }
 0x148   : > { %1432 = vmatprep.subr.bf16.mxu0 %v4435_v3  ;;  %1545 = vmatprep.subr.bf16.mxu1 %v4437_v4  ;;  %v658_v4 = vld [vmem:[#allocation2 + $0x150] sm:$0xff] }
 0x14b   : > { %1433 = vmatpush1.bf16.msra.mxu0 %v4434_v5  ;;  %1546 = vmatpush1.bf16.msra.mxu1 %v4436_v6  ;;  %v657_v5 = vld [vmem:[#allocation2 + $0x148] sm:$0xff] }
 0x14d   : > { %1265 = vmatmul.mubr.bf16.gmra.mrb[16].mxu0 %v4891_v7  ;;  %1378 = vmatmul.mubr.bf16.gmra.mrb[16].mxu1 %v4891_v7 }
 0x14e   : > { %1274 = vmatprep.mubr.bf16.mxu0 %v5503_v9  ;;  %1387 = vmatprep.mubr.bf16.mxu1 %v5503_v9 }
 0x155   : > { %1275 = vmatmul.mubr.bf16.gmra.mrb[20].mxu0 %v4892_v10  ;;  %1388 = vmatmul.mubr.bf16.gmra.mrb[20].mxu1 %v4892_v10 }
 0x156   : > { %1284 = vmatprep.mubr.bf16.mxu0 %v5503_v9  ;;  %1397 = vmatprep.mubr.bf16.mxu1 %v5503_v9 }
 0x15d   : > { %1285 = vmatmul.mubr.bf16.gmra.mrb[24].mxu0 %v4893_v11  ;;  %1398 = vmatmul.mubr.bf16.gmra.mrb[24].mxu1 %v4893_v11 }
 0x15e   : > { %1294 = vmatprep.mubr.bf16.mxu0 %v5503_v9  ;;  %1407 = vmatprep.mubr.bf16.mxu1 %v5503_v9 }
 0x165   : > { %1295 = vmatmul.mubr.bf16.gmra.mrb[28].mxu0 %v4894_v12  ;;  %1408 = vmatmul.mubr.bf16.gmra.mrb[28].mxu1 %v4894_v12 }
 0x166   : > { %1450 = vmatprep.mubr.bf16.mxu0 %v5503_v9  ;;  %1563 = vmatprep.mubr.bf16.mxu1 %v5503_v9 }
 0x16d   : > { %1451 = vmatmul.mubr.bf16.vlgmr.msra.gmra.mrb[32].mxu0 %v6123_v8  ;;  %1564 = vmatmul.mubr.bf16.vlgmr.msra.gmra.mrb[32].mxu1 %v6123_v8  ;;  %v616_v8 = vld [vmem:[#allocation2] sm:$0xff] }
 0x16e   : > { %1460 = vmatprep.mubr.bf16.mxu0 %v5503_v9  ;;  %1573 = vmatprep.mubr.bf16.mxu1 %v5503_v9 }
 0x175   : > { %1461 = vmatmul.mubr.bf16.gmra.mrb[36].mxu0 %v6138_v26  ;;  %1574 = vmatmul.mubr.bf16.gmra.mrb[36].mxu1 %v6138_v26 }
 0x176   : > { %1470 = vmatprep.mubr.bf16.mxu0 %v5503_v9  ;;  %1583 = vmatprep.mubr.bf16.mxu1 %v5503_v9 }
 0x17d   : > { %1471 = vmatmul.mubr.bf16.gmra.mrb[40].mxu0 %v6153_v42  ;;  %1584 = vmatmul.mubr.bf16.gmra.mrb[40].mxu1 %v6153_v42 }
 0x17e   : > { %1480 = vmatprep.mubr.bf16.mxu0 %v5503_v9  ;;  %1593 = vmatprep.mubr.bf16.mxu1 %v5503_v9 }
 0x185   : > { %1481 = vmatmul.mubr.bf16.gmra.mrb[44].mxu0 %v4890_v59  ;;  %1594 = vmatmul.mubr.bf16.gmra.mrb[44].mxu1 %v4890_v59  ;;  %v648_v59 = vld [vmem:[#allocation2 + $0x100] sm:$0xff] }
 0x186   : > { %1490 = vmatprep.mubr.bf16.mxu0 %v5503_v9  ;;  %1603 = vmatprep.mubr.bf16.mxu1 %v5503_v9 }
 0x18d   : > { %1491 = vmatmul.mubr.bf16.gmra.mrb[48].mxu0 %v4891_v7  ;;  %1604 = vmatmul.mubr.bf16.gmra.mrb[48].mxu1 %v4891_v7 }
 0x18e   : > { %1500 = vmatprep.mubr.bf16.mxu0 %v5503_v9  ;;  %1613 = vmatprep.mubr.bf16.mxu1 %v5503_v9 }
 0x195   : > { %1501 = vmatmul.mubr.bf16.gmra.mrb[52].mxu0 %v4892_v10  ;;  %1614 = vmatmul.mubr.bf16.gmra.mrb[52].mxu1 %v4892_v10 }
 0x196   : > { %1510 = vmatprep.mubr.bf16.mxu0 %v5503_v9  ;;  %1623 = vmatprep.mubr.bf16.mxu1 %v5503_v9 }
 0x19d   : > { %1511 = vmatmul.mubr.bf16.gmra.mrb[56].mxu0 %v4893_v11  ;;  %1624 = vmatmul.mubr.bf16.gmra.mrb[56].mxu1 %v4893_v11 }
 0x19e   : > { %1520 = vmatprep.mubr.bf16.mxu0 %v5503_v9  ;;  %1633 = vmatprep.mubr.bf16.mxu1 %v5503_v9 }
 0x1a5   : > { %1521 = vmatmul.mubr.bf16.gmra.mrb[60].mxu0 %v4894_v12  ;;  %1634 = vmatmul.mubr.bf16.gmra.mrb[60].mxu1 %v4894_v12  ;;  %v659_v12 = vld [vmem:[#allocation2 + $0x158] sm:$0xff] }
 0x200   : > { %v1226_v15 = vpop.f32.mrb[0].mxu0  ;;  %v1339_v19 = vpop.f32.mrb[0].mxu1 }
 0x201   : > { %v1644_v18 = vadd.f32 %v1226_v15, %v616_v8  ;;  %v1228_v20 = vpop.f32.mrb[1].mxu0  ;;  %v1646_v23 = vadd.f32 %v1339_v19, %v618_v13  ;;  %v1341_v25 = vpop.f32.mrb[1].mxu1 }
 0x202   : > { %v1645_v24 = vadd.f32 %v1228_v20, %v617_v14  ;;  %v1230_v26 = vpop.f32.mrb[2].mxu0  ;;  %v1647_v9 = vadd.f32 %v1341_v25, %v619_v16  ;;  %v1343_v29 = vpop.f32.mrb[2].mxu1  ;;  %v664_v20 = vld [vmem:[#allocation2 + $0x180] sm:$0xff] }
 0x203   : > { %1772 = vst [vmem:[#allocation2] sm:$0xff] %v1644_v18  ;;  %v1652_v28 = vadd.f32 %v1230_v26, %v624_v17  ;;  %v1232_v30 = vpop.f32.mrb[3].mxu0  ;;  %1774 = vst [vmem:[#allocation2 + $0x10] sm:$0xff] %v1646_v23  ;;  %v1654_v31 = vadd.f32 %v1343_v29, %v626_v21  ;;  %v1345_v33 = vpop.f32.mrb[3].mxu1  ;;  %v666_v21 = vld [vmem:[#allocation2 + $0x190] sm:$0xff]  ;;  %v672_v25 = vld [vmem:[#allocation2 + $0x1c0] sm:$0xff] }
 0x204   : > { %1773 = vst [vmem:[#allocation2 + $0x8] sm:$0xff] %v1645_v24  ;;  %v1653_v32 = vadd.f32 %v1232_v30, %v625_v22  ;;  %1775 = vst [vmem:[#allocation2 + $0x18] sm:$0xff] %v1647_v9  ;;  %v1655_v34 = vadd.f32 %v1345_v33, %v627_v27  ;;  %v665_v22 = vld [vmem:[#allocation2 + $0x188] sm:$0xff]  ;;  %v667_v24 = vld [vmem:[#allocation2 + $0x198] sm:$0xff] }
 0x205   : > { %1780 = vst [vmem:[#allocation2 + $0x40] sm:$0xff] %v1652_v28  ;;  %1782 = vst [vmem:[#allocation2 + $0x50] sm:$0xff] %v1654_v31  ;;  %v674_v28 = vld [vmem:[#allocation2 + $0x1d0] sm:$0xff]  ;;  %v673_v29 = vld [vmem:[#allocation2 + $0x1c8] sm:$0xff] }
 0x206   : > { %1781 = vst [vmem:[#allocation2 + $0x48] sm:$0xff] %v1653_v32  ;;  %1783 = vst [vmem:[#allocation2 + $0x58] sm:$0xff] %v1655_v34  ;;  %v675_v34 = vld [vmem:[#allocation2 + $0x1d8] sm:$0xff] }
 0x208   : > { %v1236_v38 = vpop.f32.mrb[4].mxu0  ;;  %v1349_v42 = vpop.f32.mrb[4].mxu1 }
 0x209   : > { %v1660_v41 = vadd.f32 %v1236_v38, %v632_v35  ;;  %v1238_v43 = vpop.f32.mrb[5].mxu0  ;;  %v1662_v46 = vadd.f32 %v1349_v42, %v634_v36  ;;  %v1351_v48 = vpop.f32.mrb[5].mxu1 }
 0x20a   : > { %v1661_v47 = vadd.f32 %v1238_v43, %v633_v37  ;;  %v1240_v49 = vpop.f32.mrb[6].mxu0  ;;  %v1663_v51 = vadd.f32 %v1351_v48, %v635_v39  ;;  %v1353_v53 = vpop.f32.mrb[6].mxu1  ;;  %v680_v43 = vld [vmem:[#allocation2 + $0x200] sm:$0xff] }
 0x20b   : > { %1788 = vst [vmem:[#allocation2 + $0x80] sm:$0xff] %v1660_v41  ;;  %v1668_v52 = vadd.f32 %v1240_v49, %v640_v40  ;;  %v1242_v54 = vpop.f32.mrb[7].mxu0  ;;  %1790 = vst [vmem:[#allocation2 + $0x90] sm:$0xff] %v1662_v46  ;;  %v1670_v55 = vadd.f32 %v1353_v53, %v642_v44  ;;  %v1355_v57 = vpop.f32.mrb[7].mxu1  ;;  %v682_v44 = vld [vmem:[#allocation2 + $0x210] sm:$0xff]  ;;  %v688_v48 = vld [vmem:[#allocation2 + $0x240] sm:$0xff] }
 0x20c   : > { %1789 = vst [vmem:[#allocation2 + $0x88] sm:$0xff] %v1661_v47  ;;  %v1669_v56 = vadd.f32 %v1242_v54, %v641_v45  ;;  %1791 = vst [vmem:[#allocation2 + $0x98] sm:$0xff] %v1663_v51  ;;  %v1671_v58 = vadd.f32 %v1355_v57, %v643_v50  ;;  %v681_v45 = vld [vmem:[#allocation2 + $0x208] sm:$0xff]  ;;  %v683_v47 = vld [vmem:[#allocation2 + $0x218] sm:$0xff] }
 0x20d   : > { %1796 = vst [vmem:[#allocation2 + $0xc0] sm:$0xff] %v1668_v52  ;;  %1798 = vst [vmem:[#allocation2 + $0xd0] sm:$0xff] %v1670_v55  ;;  %v690_v52 = vld [vmem:[#allocation2 + $0x250] sm:$0xff]  ;;  %v689_v53 = vld [vmem:[#allocation2 + $0x248] sm:$0xff] }
 0x20e   : > { %1797 = vst [vmem:[#allocation2 + $0xc8] sm:$0xff] %v1669_v56  ;;  %1799 = vst [vmem:[#allocation2 + $0xd8] sm:$0xff] %v1671_v58  ;;  %v691_v58 = vld [vmem:[#allocation2 + $0x258] sm:$0xff] }
 0x210   : > { %v1246_v62 = vpop.f32.mrb[8].mxu0  ;;  %v1359_v2 = vpop.f32.mrb[8].mxu1 }
 0x211   : > { %v1676_v1 = vadd.f32 %v1246_v62, %v648_v59  ;;  %v1248_v3 = vpop.f32.mrb[9].mxu0  ;;  %v1678_v6 = vadd.f32 %v1359_v2, %v650_v60  ;;  %v1361_v10 = vpop.f32.mrb[9].mxu1 }
 0x212   : > { %v1677_v7 = vadd.f32 %v1248_v3, %v649_v61  ;;  %v1250_v11 = vpop.f32.mrb[10].mxu0  ;;  %v1679_v8 = vadd.f32 %v1361_v10, %v651_v63  ;;  %v1363_v14 = vpop.f32.mrb[10].mxu1  ;;  %v696_v3 = vld [vmem:[#allocation2 + $0x280] sm:$0xff] }
 0x213   : > { %1804 = vst [vmem:[#allocation2 + $0x100] sm:$0xff] %v1676_v1  ;;  %v1684_v13 = vadd.f32 %v1250_v11, %v656_v0  ;;  %v1252_v15 = vpop.f32.mrb[11].mxu0  ;;  %1806 = vst [vmem:[#allocation2 + $0x110] sm:$0xff] %v1678_v6  ;;  %v1686_v16 = vadd.f32 %v1363_v14, %v658_v4  ;;  %v1365_v18 = vpop.f32.mrb[11].mxu1  ;;  %v698_v4 = vld [vmem:[#allocation2 + $0x290] sm:$0xff]  ;;  %v704_v10 = vld [vmem:[#allocation2 + $0x2c0] sm:$0xff] }
 0x214   : > { %1805 = vst [vmem:[#allocation2 + $0x108] sm:$0xff] %v1677_v7  ;;  %v1685_v17 = vadd.f32 %v1252_v15, %v657_v5  ;;  %1807 = vst [vmem:[#allocation2 + $0x118] sm:$0xff] %v1679_v8  ;;  %v1687_v19 = vadd.f32 %v1365_v18, %v659_v12  ;;  %v697_v5 = vld [vmem:[#allocation2 + $0x288] sm:$0xff]  ;;  %v699_v7 = vld [vmem:[#allocation2 + $0x298] sm:$0xff] }
 0x215   : > { %1812 = vst [vmem:[#allocation2 + $0x140] sm:$0xff] %v1684_v13  ;;  %1814 = vst [vmem:[#allocation2 + $0x150] sm:$0xff] %v1686_v16  ;;  %v706_v13 = vld [vmem:[#allocation2 + $0x2d0] sm:$0xff]  ;;  %v705_v14 = vld [vmem:[#allocation2 + $0x2c8] sm:$0xff] }
 0x216   : > { %1813 = vst [vmem:[#allocation2 + $0x148] sm:$0xff] %v1685_v17  ;;  %1815 = vst [vmem:[#allocation2 + $0x158] sm:$0xff] %v1687_v19  ;;  %v707_v19 = vld [vmem:[#allocation2 + $0x2d8] sm:$0xff] }
 0x218   : > { %v1256_v23 = vpop.f32.mrb[12].mxu0  ;;  %v1369_v27 = vpop.f32.mrb[12].mxu1 }
 0x219   : > { %v1692_v26 = vadd.f32 %v1256_v23, %v664_v20  ;;  %v1258_v9 = vpop.f32.mrb[13].mxu0  ;;  %v1694_v30 = vadd.f32 %v1369_v27, %v666_v21  ;;  %v1371_v32 = vpop.f32.mrb[13].mxu1 }
 0x21a   : > { %v1693_v31 = vadd.f32 %v1258_v9, %v665_v22  ;;  %v1260_v33 = vpop.f32.mrb[14].mxu0  ;;  %v1695_v35 = vadd.f32 %v1371_v32, %v667_v24  ;;  %v1373_v37 = vpop.f32.mrb[14].mxu1  ;;  %v712_v9 = vld [vmem:[#allocation2 + $0x300] sm:$0xff] }
 0x21b   : > { %1820 = vst [vmem:[#allocation2 + $0x180] sm:$0xff] %v1692_v26  ;;  %v1700_v36 = vadd.f32 %v1260_v33, %v672_v25  ;;  %v1262_v38 = vpop.f32.mrb[15].mxu0  ;;  %1822 = vst [vmem:[#allocation2 + $0x190] sm:$0xff] %v1694_v30  ;;  %v1702_v39 = vadd.f32 %v1373_v37, %v674_v28  ;;  %v1375_v41 = vpop.f32.mrb[15].mxu1  ;;  %v714_v28 = vld [vmem:[#allocation2 + $0x310] sm:$0xff]  ;;  %v720_v32 = vld [vmem:[#allocation2 + $0x340] sm:$0xff] }
 0x21c   : > { %1821 = vst [vmem:[#allocation2 + $0x188] sm:$0xff] %v1693_v31  ;;  %v1701_v40 = vadd.f32 %v1262_v38, %v673_v29  ;;  %1823 = vst [vmem:[#allocation2 + $0x198] sm:$0xff] %v1695_v35  ;;  %v1703_v42 = vadd.f32 %v1375_v41, %v675_v34  ;;  %v713_v29 = vld [vmem:[#allocation2 + $0x308] sm:$0xff]  ;;  %v715_v31 = vld [vmem:[#allocation2 + $0x318] sm:$0xff] }
 0x21d   : > { %1828 = vst [vmem:[#allocation2 + $0x1c0] sm:$0xff] %v1700_v36  ;;  %1830 = vst [vmem:[#allocation2 + $0x1d0] sm:$0xff] %v1702_v39  ;;  %v722_v36 = vld [vmem:[#allocation2 + $0x350] sm:$0xff]  ;;  %v721_v37 = vld [vmem:[#allocation2 + $0x348] sm:$0xff] }
 0x21e   : > { %1829 = vst [vmem:[#allocation2 + $0x1c8] sm:$0xff] %v1701_v40  ;;  %1831 = vst [vmem:[#allocation2 + $0x1d8] sm:$0xff] %v1703_v42  ;;  %v723_v42 = vld [vmem:[#allocation2 + $0x358] sm:$0xff] }
 0x220   : > { %v1266_v46 = vpop.f32.mrb[16].mxu0  ;;  %v1379_v50 = vpop.f32.mrb[16].mxu1 }
 0x221   : > { %v1708_v49 = vadd.f32 %v1266_v46, %v680_v43  ;;  %v1268_v51 = vpop.f32.mrb[17].mxu0  ;;  %v1710_v54 = vadd.f32 %v1379_v50, %v682_v44  ;;  %v1381_v56 = vpop.f32.mrb[17].mxu1 }
 0x222   : > { %v1709_v55 = vadd.f32 %v1268_v51, %v681_v45  ;;  %v1270_v57 = vpop.f32.mrb[18].mxu0  ;;  %v1711_v59 = vadd.f32 %v1381_v56, %v683_v47  ;;  %v1383_v61 = vpop.f32.mrb[18].mxu1  ;;  %v728_v51 = vld [vmem:[#allocation2 + $0x380] sm:$0xff] }
 0x223   : > { %1836 = vst [vmem:[#allocation2 + $0x200] sm:$0xff] %v1708_v49  ;;  %v1716_v60 = vadd.f32 %v1270_v57, %v688_v48  ;;  %v1272_v62 = vpop.f32.mrb[19].mxu0  ;;  %1838 = vst [vmem:[#allocation2 + $0x210] sm:$0xff] %v1710_v54  ;;  %v1718_v63 = vadd.f32 %v1383_v61, %v690_v52  ;;  %v1385_v1 = vpop.f32.mrb[19].mxu1  ;;  %v730_v52 = vld [vmem:[#allocation2 + $0x390] sm:$0xff]  ;;  %v736_v56 = vld [vmem:[#allocation2 + $0x3c0] sm:$0xff] }
 0x224   : > { %1837 = vst [vmem:[#allocation2 + $0x208] sm:$0xff] %v1709_v55  ;;  %v1717_v0 = vadd.f32 %v1272_v62, %v689_v53  ;;  %1839 = vst [vmem:[#allocation2 + $0x218] sm:$0xff] %v1711_v59  ;;  %v1719_v2 = vadd.f32 %v1385_v1, %v691_v58  ;;  %v729_v53 = vld [vmem:[#allocation2 + $0x388] sm:$0xff]  ;;  %v731_v55 = vld [vmem:[#allocation2 + $0x398] sm:$0xff] }
 0x225   : > { %1844 = vst [vmem:[#allocation2 + $0x240] sm:$0xff] %v1716_v60  ;;  %1846 = vst [vmem:[#allocation2 + $0x250] sm:$0xff] %v1718_v63  ;;  %v738_v60 = vld [vmem:[#allocation2 + $0x3d0] sm:$0xff]  ;;  %v737_v61 = vld [vmem:[#allocation2 + $0x3c8] sm:$0xff] }
 0x226   : > { %1845 = vst [vmem:[#allocation2 + $0x248] sm:$0xff] %v1717_v0  ;;  %1847 = vst [vmem:[#allocation2 + $0x258] sm:$0xff] %v1719_v2  ;;  %v739_v2 = vld [vmem:[#allocation2 + $0x3d8] sm:$0xff] }
 0x228   : > { %v1276_v6 = vpop.f32.mrb[20].mxu0  ;;  %v1389_v12 = vpop.f32.mrb[20].mxu1 }
 0x229   : > { %v1724_v11 = vadd.f32 %v1276_v6, %v696_v3  ;;  %v1278_v8 = vpop.f32.mrb[21].mxu0  ;;  %v1726_v15 = vadd.f32 %v1389_v12, %v698_v4  ;;  %v1391_v17 = vpop.f32.mrb[21].mxu1 }
 0x22a   : > { %v1725_v16 = vadd.f32 %v1278_v8, %v697_v5  ;;  %v1280_v18 = vpop.f32.mrb[22].mxu0  ;;  %v1727_v20 = vadd.f32 %v1391_v17, %v699_v7  ;;  %v1393_v22 = vpop.f32.mrb[22].mxu1  ;;  %v620_v8 = vld [vmem:[#allocation2 + $0x20] sm:$0xff] }
 0x22b   : > { %1852 = vst [vmem:[#allocation2 + $0x280] sm:$0xff] %v1724_v11  ;;  %v1732_v21 = vadd.f32 %v1280_v18, %v704_v10  ;;  %v1282_v23 = vpop.f32.mrb[23].mxu0  ;;  %1854 = vst [vmem:[#allocation2 + $0x290] sm:$0xff] %v1726_v15  ;;  %v1734_v24 = vadd.f32 %v1393_v22, %v706_v13  ;;  %v1395_v26 = vpop.f32.mrb[23].mxu1  ;;  %v622_v13 = vld [vmem:[#allocation2 + $0x30] sm:$0xff]  ;;  %v628_v17 = vld [vmem:[#allocation2 + $0x60] sm:$0xff] }
 0x22c   : > { %1853 = vst [vmem:[#allocation2 + $0x288] sm:$0xff] %v1725_v16  ;;  %v1733_v25 = vadd.f32 %v1282_v23, %v705_v14  ;;  %1855 = vst [vmem:[#allocation2 + $0x298] sm:$0xff] %v1727_v20  ;;  %v1735_v27 = vadd.f32 %v1395_v26, %v707_v19  ;;  %v621_v14 = vld [vmem:[#allocation2 + $0x28] sm:$0xff]  ;;  %v623_v16 = vld [vmem:[#allocation2 + $0x38] sm:$0xff] }
 0x22d   : > { %1860 = vst [vmem:[#allocation2 + $0x2c0] sm:$0xff] %v1732_v21  ;;  %1862 = vst [vmem:[#allocation2 + $0x2d0] sm:$0xff] %v1734_v24  ;;  %v630_v21 = vld [vmem:[#allocation2 + $0x70] sm:$0xff]  ;;  %v629_v22 = vld [vmem:[#allocation2 + $0x68] sm:$0xff] }
 0x22e   : > { %1861 = vst [vmem:[#allocation2 + $0x2c8] sm:$0xff] %v1733_v25  ;;  %1863 = vst [vmem:[#allocation2 + $0x2d8] sm:$0xff] %v1735_v27  ;;  %v631_v27 = vld [vmem:[#allocation2 + $0x78] sm:$0xff] }
 0x230   : > { %v1286_v30 = vpop.f32.mrb[24].mxu0  ;;  %v1399_v34 = vpop.f32.mrb[24].mxu1 }
 0x231   : > { %v1740_v33 = vadd.f32 %v1286_v30, %v712_v9  ;;  %v1288_v35 = vpop.f32.mrb[25].mxu0  ;;  %v1742_v38 = vadd.f32 %v1399_v34, %v714_v28  ;;  %v1401_v40 = vpop.f32.mrb[25].mxu1 }
 0x232   : > { %v1741_v39 = vadd.f32 %v1288_v35, %v713_v29  ;;  %v1290_v41 = vpop.f32.mrb[26].mxu0  ;;  %v1743_v43 = vadd.f32 %v1401_v40, %v715_v31  ;;  %v1403_v45 = vpop.f32.mrb[26].mxu1  ;;  %v636_v35 = vld [vmem:[#allocation2 + $0xa0] sm:$0xff] }
 0x233   : > { %1868 = vst [vmem:[#allocation2 + $0x300] sm:$0xff] %v1740_v33  ;;  %v1748_v44 = vadd.f32 %v1290_v41, %v720_v32  ;;  %v1292_v46 = vpop.f32.mrb[27].mxu0  ;;  %1870 = vst [vmem:[#allocation2 + $0x310] sm:$0xff] %v1742_v38  ;;  %v1750_v47 = vadd.f32 %v1403_v45, %v722_v36  ;;  %v1405_v49 = vpop.f32.mrb[27].mxu1  ;;  %v638_v36 = vld [vmem:[#allocation2 + $0xb0] sm:$0xff]  ;;  %v644_v40 = vld [vmem:[#allocation2 + $0xe0] sm:$0xff] }
 0x234   : > { %1869 = vst [vmem:[#allocation2 + $0x308] sm:$0xff] %v1741_v39  ;;  %v1749_v48 = vadd.f32 %v1292_v46, %v721_v37  ;;  %1871 = vst [vmem:[#allocation2 + $0x318] sm:$0xff] %v1743_v43  ;;  %v1751_v50 = vadd.f32 %v1405_v49, %v723_v42  ;;  %v637_v37 = vld [vmem:[#allocation2 + $0xa8] sm:$0xff]  ;;  %v639_v39 = vld [vmem:[#allocation2 + $0xb8] sm:$0xff] }
 0x235   : > { %1876 = vst [vmem:[#allocation2 + $0x340] sm:$0xff] %v1748_v44  ;;  %1878 = vst [vmem:[#allocation2 + $0x350] sm:$0xff] %v1750_v47  ;;  %v646_v44 = vld [vmem:[#allocation2 + $0xf0] sm:$0xff]  ;;  %v645_v45 = vld [vmem:[#allocation2 + $0xe8] sm:$0xff] }
 0x236   : > { %1877 = vst [vmem:[#allocation2 + $0x348] sm:$0xff] %v1749_v48  ;;  %1879 = vst [vmem:[#allocation2 + $0x358] sm:$0xff] %v1751_v50  ;;  %v647_v50 = vld [vmem:[#allocation2 + $0xf8] sm:$0xff] }
 0x238   : > { %v1296_v54 = vpop.f32.mrb[28].mxu0  ;;  %v1409_v58 = vpop.f32.mrb[28].mxu1 }
 0x239   : > { %v1756_v57 = vadd.f32 %v1296_v54, %v728_v51  ;;  %v1298_v59 = vpop.f32.mrb[29].mxu0  ;;  %v1758_v62 = vadd.f32 %v1409_v58, %v730_v52  ;;  %v1411_v0 = vpop.f32.mrb[29].mxu1 }
 0x23a   : > { %v1757_v63 = vadd.f32 %v1298_v59, %v729_v53  ;;  %v1300_v1 = vpop.f32.mrb[30].mxu0  ;;  %v1759_v3 = vadd.f32 %v1411_v0, %v731_v55  ;;  %v1413_v5 = vpop.f32.mrb[30].mxu1  ;;  %v652_v59 = vld [vmem:[#allocation2 + $0x120] sm:$0xff] }
 0x23b   : > { %1884 = vst [vmem:[#allocation2 + $0x380] sm:$0xff] %v1756_v57  ;;  %v1764_v4 = vadd.f32 %v1300_v1, %v736_v56  ;;  %v1302_v6 = vpop.f32.mrb[31].mxu0  ;;  %1886 = vst [vmem:[#allocation2 + $0x390] sm:$0xff] %v1758_v62  ;;  %v1766_v7 = vadd.f32 %v1413_v5, %v738_v60  ;;  %v1415_v11 = vpop.f32.mrb[31].mxu1  ;;  %v654_v60 = vld [vmem:[#allocation2 + $0x130] sm:$0xff]  ;;  %v660_v0 = vld [vmem:[#allocation2 + $0x160] sm:$0xff] }
 0x23c   : > { %1885 = vst [vmem:[#allocation2 + $0x388] sm:$0xff] %v1757_v63  ;;  %v1765_v10 = vadd.f32 %v1302_v6, %v737_v61  ;;  %1887 = vst [vmem:[#allocation2 + $0x398] sm:$0xff] %v1759_v3  ;;  %v1767_v12 = vadd.f32 %v1415_v11, %v739_v2  ;;  %v653_v61 = vld [vmem:[#allocation2 + $0x128] sm:$0xff]  ;;  %v655_v63 = vld [vmem:[#allocation2 + $0x138] sm:$0xff] }
 0x23d   : > { %1892 = vst [vmem:[#allocation2 + $0x3c0] sm:$0xff] %v1764_v4  ;;  %1894 = vst [vmem:[#allocation2 + $0x3d0] sm:$0xff] %v1766_v7  ;;  %v662_v4 = vld [vmem:[#allocation2 + $0x170] sm:$0xff]  ;;  %v661_v5 = vld [vmem:[#allocation2 + $0x168] sm:$0xff] }
 0x23e   : > { %1893 = vst [vmem:[#allocation2 + $0x3c8] sm:$0xff] %v1765_v10  ;;  %1895 = vst [vmem:[#allocation2 + $0x3d8] sm:$0xff] %v1767_v12  ;;  %v663_v12 = vld [vmem:[#allocation2 + $0x178] sm:$0xff] }
 0x240   : > { %v1452_v15 = vpop.f32.mrb[32].mxu0  ;;  %v1565_v19 = vpop.f32.mrb[32].mxu1 }
 0x241   : > { %v1648_v18 = vadd.f32 %v1452_v15, %v620_v8  ;;  %v1454_v20 = vpop.f32.mrb[33].mxu0  ;;  %v1650_v23 = vadd.f32 %v1565_v19, %v622_v13  ;;  %v1567_v25 = vpop.f32.mrb[33].mxu1 }
 0x242   : > { %v1649_v24 = vadd.f32 %v1454_v20, %v621_v14  ;;  %v1456_v26 = vpop.f32.mrb[34].mxu0  ;;  %v1651_v9 = vadd.f32 %v1567_v25, %v623_v16  ;;  %v1569_v29 = vpop.f32.mrb[34].mxu1  ;;  %v668_v20 = vld [vmem:[#allocation2 + $0x1a0] sm:$0xff] }
 0x243   : > { %1776 = vst [vmem:[#allocation2 + $0x20] sm:$0xff] %v1648_v18  ;;  %v1656_v28 = vadd.f32 %v1456_v26, %v628_v17  ;;  %v1458_v30 = vpop.f32.mrb[35].mxu0  ;;  %1778 = vst [vmem:[#allocation2 + $0x30] sm:$0xff] %v1650_v23  ;;  %v1658_v31 = vadd.f32 %v1569_v29, %v630_v21  ;;  %v1571_v33 = vpop.f32.mrb[35].mxu1  ;;  %v670_v21 = vld [vmem:[#allocation2 + $0x1b0] sm:$0xff]  ;;  %v676_v25 = vld [vmem:[#allocation2 + $0x1e0] sm:$0xff] }
 0x244   : > { %1777 = vst [vmem:[#allocation2 + $0x28] sm:$0xff] %v1649_v24  ;;  %v1657_v32 = vadd.f32 %v1458_v30, %v629_v22  ;;  %1779 = vst [vmem:[#allocation2 + $0x38] sm:$0xff] %v1651_v9  ;;  %v1659_v34 = vadd.f32 %v1571_v33, %v631_v27  ;;  %v669_v22 = vld [vmem:[#allocation2 + $0x1a8] sm:$0xff]  ;;  %v671_v24 = vld [vmem:[#allocation2 + $0x1b8] sm:$0xff] }
 0x245   : > { %1784 = vst [vmem:[#allocation2 + $0x60] sm:$0xff] %v1656_v28  ;;  %1786 = vst [vmem:[#allocation2 + $0x70] sm:$0xff] %v1658_v31  ;;  %v678_v28 = vld [vmem:[#allocation2 + $0x1f0] sm:$0xff]  ;;  %v677_v29 = vld [vmem:[#allocation2 + $0x1e8] sm:$0xff] }
 0x246   : > { %1785 = vst [vmem:[#allocation2 + $0x68] sm:$0xff] %v1657_v32  ;;  %1787 = vst [vmem:[#allocation2 + $0x78] sm:$0xff] %v1659_v34  ;;  %v679_v34 = vld [vmem:[#allocation2 + $0x1f8] sm:$0xff] }
 0x248   : > { %v1462_v38 = vpop.f32.mrb[36].mxu0  ;;  %v1575_v42 = vpop.f32.mrb[36].mxu1 }
 0x249   : > { %v1664_v41 = vadd.f32 %v1462_v38, %v636_v35  ;;  %v1464_v43 = vpop.f32.mrb[37].mxu0  ;;  %v1666_v46 = vadd.f32 %v1575_v42, %v638_v36  ;;  %v1577_v48 = vpop.f32.mrb[37].mxu1 }
 0x24a   : > { %v1665_v47 = vadd.f32 %v1464_v43, %v637_v37  ;;  %v1466_v49 = vpop.f32.mrb[38].mxu0  ;;  %v1667_v51 = vadd.f32 %v1577_v48, %v639_v39  ;;  %v1579_v53 = vpop.f32.mrb[38].mxu1  ;;  %v684_v43 = vld [vmem:[#allocation2 + $0x220] sm:$0xff] }
 0x24b   : > { %1792 = vst [vmem:[#allocation2 + $0xa0] sm:$0xff] %v1664_v41  ;;  %v1672_v52 = vadd.f32 %v1466_v49, %v644_v40  ;;  %v1468_v54 = vpop.f32.mrb[39].mxu0  ;;  %1794 = vst [vmem:[#allocation2 + $0xb0] sm:$0xff] %v1666_v46  ;;  %v1674_v55 = vadd.f32 %v1579_v53, %v646_v44  ;;  %v1581_v57 = vpop.f32.mrb[39].mxu1  ;;  %v686_v44 = vld [vmem:[#allocation2 + $0x230] sm:$0xff]  ;;  %v692_v48 = vld [vmem:[#allocation2 + $0x260] sm:$0xff] }
 0x24c   : > { %1793 = vst [vmem:[#allocation2 + $0xa8] sm:$0xff] %v1665_v47  ;;  %v1673_v56 = vadd.f32 %v1468_v54, %v645_v45  ;;  %1795 = vst [vmem:[#allocation2 + $0xb8] sm:$0xff] %v1667_v51  ;;  %v1675_v58 = vadd.f32 %v1581_v57, %v647_v50  ;;  %v685_v45 = vld [vmem:[#allocation2 + $0x228] sm:$0xff]  ;;  %v687_v47 = vld [vmem:[#allocation2 + $0x238] sm:$0xff] }
 0x24d   : > { %1800 = vst [vmem:[#allocation2 + $0xe0] sm:$0xff] %v1672_v52  ;;  %1802 = vst [vmem:[#allocation2 + $0xf0] sm:$0xff] %v1674_v55  ;;  %v694_v52 = vld [vmem:[#allocation2 + $0x270] sm:$0xff]  ;;  %v693_v53 = vld [vmem:[#allocation2 + $0x268] sm:$0xff] }
 0x24e   : > { %1801 = vst [vmem:[#allocation2 + $0xe8] sm:$0xff] %v1673_v56  ;;  %1803 = vst [vmem:[#allocation2 + $0xf8] sm:$0xff] %v1675_v58  ;;  %v695_v58 = vld [vmem:[#allocation2 + $0x278] sm:$0xff] }
 0x250   : > { %v1472_v62 = vpop.f32.mrb[40].mxu0  ;;  %v1585_v2 = vpop.f32.mrb[40].mxu1 }
 0x251   : > { %v1680_v1 = vadd.f32 %v1472_v62, %v652_v59  ;;  %v1474_v3 = vpop.f32.mrb[41].mxu0  ;;  %v1682_v6 = vadd.f32 %v1585_v2, %v654_v60  ;;  %v1587_v10 = vpop.f32.mrb[41].mxu1 }
 0x252   : > { %v1681_v7 = vadd.f32 %v1474_v3, %v653_v61  ;;  %v1476_v11 = vpop.f32.mrb[42].mxu0  ;;  %v1683_v8 = vadd.f32 %v1587_v10, %v655_v63  ;;  %v1589_v14 = vpop.f32.mrb[42].mxu1  ;;  %v700_v3 = vld [vmem:[#allocation2 + $0x2a0] sm:$0xff] }
 0x253   : > { %1808 = vst [vmem:[#allocation2 + $0x120] sm:$0xff] %v1680_v1  ;;  %v1688_v13 = vadd.f32 %v1476_v11, %v660_v0  ;;  %v1478_v15 = vpop.f32.mrb[43].mxu0  ;;  %1810 = vst [vmem:[#allocation2 + $0x130] sm:$0xff] %v1682_v6  ;;  %v1690_v16 = vadd.f32 %v1589_v14, %v662_v4  ;;  %v1591_v18 = vpop.f32.mrb[43].mxu1  ;;  %v702_v4 = vld [vmem:[#allocation2 + $0x2b0] sm:$0xff]  ;;  %v708_v10 = vld [vmem:[#allocation2 + $0x2e0] sm:$0xff] }
 0x254   : > { %1809 = vst [vmem:[#allocation2 + $0x128] sm:$0xff] %v1681_v7  ;;  %v1689_v17 = vadd.f32 %v1478_v15, %v661_v5  ;;  %1811 = vst [vmem:[#allocation2 + $0x138] sm:$0xff] %v1683_v8  ;;  %v1691_v19 = vadd.f32 %v1591_v18, %v663_v12  ;;  %v701_v5 = vld [vmem:[#allocation2 + $0x2a8] sm:$0xff]  ;;  %v703_v7 = vld [vmem:[#allocation2 + $0x2b8] sm:$0xff] }
 0x255   : > { %1816 = vst [vmem:[#allocation2 + $0x160] sm:$0xff] %v1688_v13  ;;  %1818 = vst [vmem:[#allocation2 + $0x170] sm:$0xff] %v1690_v16  ;;  %v710_v13 = vld [vmem:[#allocation2 + $0x2f0] sm:$0xff]  ;;  %v709_v14 = vld [vmem:[#allocation2 + $0x2e8] sm:$0xff] }
 0x256   : > { %1817 = vst [vmem:[#allocation2 + $0x168] sm:$0xff] %v1689_v17  ;;  %1819 = vst [vmem:[#allocation2 + $0x178] sm:$0xff] %v1691_v19  ;;  %v711_v19 = vld [vmem:[#allocation2 + $0x2f8] sm:$0xff] }
 0x258   : > { %v1482_v23 = vpop.f32.mrb[44].mxu0  ;;  %v1595_v27 = vpop.f32.mrb[44].mxu1 }
 0x259   : > { %v1696_v26 = vadd.f32 %v1482_v23, %v668_v20  ;;  %v1484_v9 = vpop.f32.mrb[45].mxu0  ;;  %v1698_v30 = vadd.f32 %v1595_v27, %v670_v21  ;;  %v1597_v32 = vpop.f32.mrb[45].mxu1 }
 0x25a   : > { %v1697_v31 = vadd.f32 %v1484_v9, %v669_v22  ;;  %v1486_v33 = vpop.f32.mrb[46].mxu0  ;;  %v1699_v35 = vadd.f32 %v1597_v32, %v671_v24  ;;  %v1599_v37 = vpop.f32.mrb[46].mxu1  ;;  %v716_v9 = vld [vmem:[#allocation2 + $0x320] sm:$0xff] }
 0x25b   : > { %1824 = vst [vmem:[#allocation2 + $0x1a0] sm:$0xff] %v1696_v26  ;;  %v1704_v36 = vadd.f32 %v1486_v33, %v676_v25  ;;  %v1488_v38 = vpop.f32.mrb[47].mxu0  ;;  %1826 = vst [vmem:[#allocation2 + $0x1b0] sm:$0xff] %v1698_v30  ;;  %v1706_v39 = vadd.f32 %v1599_v37, %v678_v28  ;;  %v1601_v41 = vpop.f32.mrb[47].mxu1  ;;  %v718_v28 = vld [vmem:[#allocation2 + $0x330] sm:$0xff]  ;;  %v724_v32 = vld [vmem:[#allocation2 + $0x360] sm:$0xff] }
 0x25c   : > { %1825 = vst [vmem:[#allocation2 + $0x1a8] sm:$0xff] %v1697_v31  ;;  %v1705_v40 = vadd.f32 %v1488_v38, %v677_v29  ;;  %1827 = vst [vmem:[#allocation2 + $0x1b8] sm:$0xff] %v1699_v35  ;;  %v1707_v42 = vadd.f32 %v1601_v41, %v679_v34  ;;  %v717_v29 = vld [vmem:[#allocation2 + $0x328] sm:$0xff]  ;;  %v719_v31 = vld [vmem:[#allocation2 + $0x338] sm:$0xff] }
 0x25d   : > { %1832 = vst [vmem:[#allocation2 + $0x1e0] sm:$0xff] %v1704_v36  ;;  %1834 = vst [vmem:[#allocation2 + $0x1f0] sm:$0xff] %v1706_v39  ;;  %v726_v36 = vld [vmem:[#allocation2 + $0x370] sm:$0xff]  ;;  %v725_v37 = vld [vmem:[#allocation2 + $0x368] sm:$0xff] }
 0x25e   : > { %1833 = vst [vmem:[#allocation2 + $0x1e8] sm:$0xff] %v1705_v40  ;;  %1835 = vst [vmem:[#allocation2 + $0x1f8] sm:$0xff] %v1707_v42  ;;  %v727_v42 = vld [vmem:[#allocation2 + $0x378] sm:$0xff] }
 0x260   : > { %v1492_v46 = vpop.f32.mrb[48].mxu0  ;;  %v1605_v50 = vpop.f32.mrb[48].mxu1 }
 0x261   : > { %v1712_v49 = vadd.f32 %v1492_v46, %v684_v43  ;;  %v1494_v51 = vpop.f32.mrb[49].mxu0  ;;  %v1714_v54 = vadd.f32 %v1605_v50, %v686_v44  ;;  %v1607_v56 = vpop.f32.mrb[49].mxu1 }
 0x262   : > { %v1713_v55 = vadd.f32 %v1494_v51, %v685_v45  ;;  %v1496_v57 = vpop.f32.mrb[50].mxu0  ;;  %v1715_v59 = vadd.f32 %v1607_v56, %v687_v47  ;;  %v1609_v61 = vpop.f32.mrb[50].mxu1  ;;  %v732_v51 = vld [vmem:[#allocation2 + $0x3a0] sm:$0xff] }
 0x263   : > { %1840 = vst [vmem:[#allocation2 + $0x220] sm:$0xff] %v1712_v49  ;;  %v1720_v60 = vadd.f32 %v1496_v57, %v692_v48  ;;  %v1498_v62 = vpop.f32.mrb[51].mxu0  ;;  %1842 = vst [vmem:[#allocation2 + $0x230] sm:$0xff] %v1714_v54  ;;  %v1722_v63 = vadd.f32 %v1609_v61, %v694_v52  ;;  %v1611_v1 = vpop.f32.mrb[51].mxu1  ;;  %v734_v52 = vld [vmem:[#allocation2 + $0x3b0] sm:$0xff]  ;;  %v740_v56 = vld [vmem:[#allocation2 + $0x3e0] sm:$0xff] }
 0x264   : > { %1841 = vst [vmem:[#allocation2 + $0x228] sm:$0xff] %v1713_v55  ;;  %v1721_v0 = vadd.f32 %v1498_v62, %v693_v53  ;;  %1843 = vst [vmem:[#allocation2 + $0x238] sm:$0xff] %v1715_v59  ;;  %v1723_v2 = vadd.f32 %v1611_v1, %v695_v58  ;;  %v733_v53 = vld [vmem:[#allocation2 + $0x3a8] sm:$0xff]  ;;  %v735_v55 = vld [vmem:[#allocation2 + $0x3b8] sm:$0xff] }
 0x265   : > { %1848 = vst [vmem:[#allocation2 + $0x260] sm:$0xff] %v1720_v60  ;;  %1850 = vst [vmem:[#allocation2 + $0x270] sm:$0xff] %v1722_v63  ;;  %v742_v60 = vld [vmem:[#allocation2 + $0x3f0] sm:$0xff]  ;;  %v741_v61 = vld [vmem:[#allocation2 + $0x3e8] sm:$0xff] }
 0x266   : > { %1849 = vst [vmem:[#allocation2 + $0x268] sm:$0xff] %v1721_v0  ;;  %1851 = vst [vmem:[#allocation2 + $0x278] sm:$0xff] %v1723_v2  ;;  %v743_v2 = vld [vmem:[#allocation2 + $0x3f8] sm:$0xff] }
 0x268   : > { %v1502_v6 = vpop.f32.mrb[52].mxu0  ;;  %v1615_v12 = vpop.f32.mrb[52].mxu1 }
 0x269   : > { %v1728_v11 = vadd.f32 %v1502_v6, %v700_v3  ;;  %v1504_v8 = vpop.f32.mrb[53].mxu0  ;;  %v1730_v15 = vadd.f32 %v1615_v12, %v702_v4  ;;  %v1617_v17 = vpop.f32.mrb[53].mxu1 }
 0x26a   : > { %v1729_v16 = vadd.f32 %v1504_v8, %v701_v5  ;;  %v1506_v18 = vpop.f32.mrb[54].mxu0  ;;  %v1731_v20 = vadd.f32 %v1617_v17, %v703_v7  ;;  %v1619_v22 = vpop.f32.mrb[54].mxu1 }
 0x26b   : > { %1856 = vst [vmem:[#allocation2 + $0x2a0] sm:$0xff] %v1728_v11  ;;  %v1736_v21 = vadd.f32 %v1506_v18, %v708_v10  ;;  %v1508_v23 = vpop.f32.mrb[55].mxu0  ;;  %1858 = vst [vmem:[#allocation2 + $0x2b0] sm:$0xff] %v1730_v15  ;;  %v1738_v24 = vadd.f32 %v1619_v22, %v710_v13  ;;  %v1621_v26 = vpop.f32.mrb[55].mxu1 }
 0x26c   : > { %1857 = vst [vmem:[#allocation2 + $0x2a8] sm:$0xff] %v1729_v16  ;;  %v1737_v25 = vadd.f32 %v1508_v23, %v709_v14  ;;  %1859 = vst [vmem:[#allocation2 + $0x2b8] sm:$0xff] %v1731_v20  ;;  %v1739_v27 = vadd.f32 %v1621_v26, %v711_v19 }
 0x26d   : > { %1864 = vst [vmem:[#allocation2 + $0x2e0] sm:$0xff] %v1736_v21  ;;  %1866 = vst [vmem:[#allocation2 + $0x2f0] sm:$0xff] %v1738_v24 }
 0x26e   : > { %1865 = vst [vmem:[#allocation2 + $0x2e8] sm:$0xff] %v1737_v25  ;;  %1867 = vst [vmem:[#allocation2 + $0x2f8] sm:$0xff] %v1739_v27 }
 0x270   : > { %v1512_v30 = vpop.f32.mrb[56].mxu0  ;;  %v1625_v34 = vpop.f32.mrb[56].mxu1 }
 0x271   : > { %v1744_v33 = vadd.f32 %v1512_v30, %v716_v9  ;;  %v1514_v35 = vpop.f32.mrb[57].mxu0  ;;  %v1746_v38 = vadd.f32 %v1625_v34, %v718_v28  ;;  %v1627_v40 = vpop.f32.mrb[57].mxu1 }
 0x272   : > { %v1745_v39 = vadd.f32 %v1514_v35, %v717_v29  ;;  %v1516_v41 = vpop.f32.mrb[58].mxu0  ;;  %v1747_v43 = vadd.f32 %v1627_v40, %v719_v31  ;;  %v1629_v45 = vpop.f32.mrb[58].mxu1 }
 0x273   : > { %1872 = vst [vmem:[#allocation2 + $0x320] sm:$0xff] %v1744_v33  ;;  %v1752_v44 = vadd.f32 %v1516_v41, %v724_v32  ;;  %v1518_v46 = vpop.f32.mrb[59].mxu0  ;;  %1874 = vst [vmem:[#allocation2 + $0x330] sm:$0xff] %v1746_v38  ;;  %v1754_v47 = vadd.f32 %v1629_v45, %v726_v36  ;;  %v1631_v49 = vpop.f32.mrb[59].mxu1 }
 0x274   : > { %1873 = vst [vmem:[#allocation2 + $0x328] sm:$0xff] %v1745_v39  ;;  %v1753_v48 = vadd.f32 %v1518_v46, %v725_v37  ;;  %1875 = vst [vmem:[#allocation2 + $0x338] sm:$0xff] %v1747_v43  ;;  %v1755_v50 = vadd.f32 %v1631_v49, %v727_v42 }
 0x275   : > { %1880 = vst [vmem:[#allocation2 + $0x360] sm:$0xff] %v1752_v44  ;;  %1882 = vst [vmem:[#allocation2 + $0x370] sm:$0xff] %v1754_v47 }
 0x276   : > { %1881 = vst [vmem:[#allocation2 + $0x368] sm:$0xff] %v1753_v48  ;;  %1883 = vst [vmem:[#allocation2 + $0x378] sm:$0xff] %v1755_v50 }
 0x278   : > { %v1522_v54 = vpop.f32.mrb[60].mxu0  ;;  %v1635_v58 = vpop.f32.mrb[60].mxu1  ;;  %1903 = sbr.rel (%p4438_p4) target bundleno = 1718 (0x6b6), region = 68 }
 0x279   : > { %v1760_v57 = vadd.f32 %v1522_v54, %v732_v51  ;;  %v1524_v59 = vpop.f32.mrb[61].mxu0  ;;  %v1762_v62 = vadd.f32 %v1635_v58, %v734_v52  ;;  %v1637_v0 = vpop.f32.mrb[61].mxu1 }
 0x27a   : > { %v1761_v63 = vadd.f32 %v1524_v59, %v733_v53  ;;  %v1526_v1 = vpop.f32.mrb[62].mxu0  ;;  %v1763_v3 = vadd.f32 %v1637_v0, %v735_v55  ;;  %v1639_v5 = vpop.f32.mrb[62].mxu1 }
 0x27b   : > { %1888 = vst [vmem:[#allocation2 + $0x3a0] sm:$0xff] %v1760_v57  ;;  %v1768_v4 = vadd.f32 %v1526_v1, %v740_v56  ;;  %v1528_v6 = vpop.f32.mrb[63].mxu0  ;;  %1890 = vst [vmem:[#allocation2 + $0x3b0] sm:$0xff] %v1762_v62  ;;  %v1770_v7 = vadd.f32 %v1639_v5, %v742_v60  ;;  %v1641_v11 = vpop.f32.mrb[63].mxu1 }
 0x27c   : > { %1889 = vst [vmem:[#allocation2 + $0x3a8] sm:$0xff] %v1761_v63  ;;  %v1769_v10 = vadd.f32 %v1528_v6, %v741_v61  ;;  %1891 = vst [vmem:[#allocation2 + $0x3b8] sm:$0xff] %v1763_v3  ;;  %v1771_v12 = vadd.f32 %v1641_v11, %v743_v2 }
 0x27d   : > { %1896 = vst [vmem:[#allocation2 + $0x3e0] sm:$0xff] %v1768_v4  ;;  %1898 = vst [vmem:[#allocation2 + $0x3f0] sm:$0xff] %v1770_v7 }
 0x27e   : > { %1897 = vst [vmem:[#allocation2 + $0x3e8] sm:$0xff] %v1769_v10  ;;  %1899 = vst [vmem:[#allocation2 + $0x3f8] sm:$0xff] %v1771_v12 }
 0x27f   : > { %v6207_v8 = vld [vmem:[#allocation2] sm:$0xff]  ;;  %v6271_v43 = vld [vmem:[#allocation2 + $0x8] sm:$0xff]  ;;  %s8181_s16 = sld [smem:[#allocation56_spill]]  ;;  %s5504_s7 = smov 64  }
 0x280   : > { %v6209_v13 = vld [vmem:[#allocation2 + $0x40] sm:$0xff]  ;;  %v2070_v15 = vmul.f32 %v6207_v8, %v6207_v8  ;;  %v6273_v44 = vld [vmem:[#allocation2 + $0x48] sm:$0xff]  ;;  %v2381_v45 = vmul.f32 %v6271_v43, %v6271_v43  ;;  %s8268_s20 = sld [smem:[#allocation57_spill]] }
 0x281   : > { %v6211_v14 = vld [vmem:[#allocation2 + $0x80] sm:$0xff]  ;;  %v2071_v18 = vmul.f32 %v6209_v13, %v6209_v13  ;;  %v2382_v46 = vmul.f32 %v6273_v44, %v6273_v44  ;;  %v6279_v47 = vld [vmem:[#allocation2 + $0x88] sm:$0xff] }
 0x282   : > { %v2072_v16 = vmul.f32 %v6211_v14, %v6211_v14  ;;  %v6217_v17 = vld [vmem:[#allocation2 + $0xc0] sm:$0xff]  ;;  %2086 = vadd.xlane.f32.xlu0 %v2070_v15  ;;  %v6281_v48 = vld [vmem:[#allocation2 + $0x148] sm:$0xff]  ;;  %v2383_v49 = vmul.f32 %v6279_v47, %v6279_v47 }
 0x283   : > { %v2073_v19 = vmul.f32 %v6217_v17, %v6217_v17  ;;  %v6223_v20 = vld [vmem:[#allocation2 + $0x100] sm:$0xff]  ;;  %v2386_v50 = vmul.f32 %v6281_v48, %v6281_v48  ;;  %v6287_v51 = vld [vmem:[#allocation2 + $0xc8] sm:$0xff] }
 0x284   : > { %2090 = vadd.xlane.f32.xlu1 %v2072_v16  ;;  %v6225_v21 = vld [vmem:[#allocation2 + $0x140] sm:$0xff]  ;;  %v2074_v22 = vmul.f32 %v6223_v20, %v6223_v20  ;;  %v6289_v52 = vld [vmem:[#allocation2 + $0x1c8] sm:$0xff]  ;;  %v2384_v53 = vmul.f32 %v6287_v51, %v6287_v51 }
 0x285   : > { %v2075_v23 = vmul.f32 %v6225_v21, %v6225_v21  ;;  %v6231_v24 = vld [vmem:[#allocation2 + $0x180] sm:$0xff]  ;;  %v2388_v54 = vmul.f32 %v6289_v52, %v6289_v52  ;;  %v6295_v55 = vld [vmem:[#allocation2 + $0x108] sm:$0xff]  ;;  %s8182_s25 = smov %s8181_s16 }
 0x286   : > { %2088 = vadd.xlane.f32.xlu0 %v2071_v18  ;;  %v6233_v25 = vld [vmem:[#allocation2 + $0x1c0] sm:$0xff]  ;;  %v2076_v26 = vmul.f32 %v6231_v24, %v6231_v24  ;;  %v6297_v56 = vld [vmem:[#allocation2 + $0x248] sm:$0xff]  ;;  %v2385_v57 = vmul.f32 %v6295_v55, %v6295_v55 }
 0x287   : > { %v2077_v27 = vmul.f32 %v6233_v25, %v6233_v25  ;;  %v6239_v9 = vld [vmem:[#allocation2 + $0x200] sm:$0xff]  ;;  %v2390_v58 = vmul.f32 %v6297_v56, %v6297_v56  ;;  %v6303_v59 = vld [vmem:[#allocation2 + $0x188] sm:$0xff] }
 0x288   : > { %2092 = vadd.xlane.f32.xlu1 %v2073_v19  ;;  %v6241_v28 = vld [vmem:[#allocation2 + $0x240] sm:$0xff]  ;;  %v2078_v29 = vmul.f32 %v6239_v9, %v6239_v9  ;;  %v6305_v60 = vld [vmem:[#allocation2 + $0x2c8] sm:$0xff]  ;;  %v2387_v61 = vmul.f32 %v6303_v59, %v6303_v59 }
 0x289   : > { %v2079_v30 = vmul.f32 %v6241_v28, %v6241_v28  ;;  %v6247_v31 = vld [vmem:[#allocation2 + $0x280] sm:$0xff]  ;;  %v2392_v62 = vmul.f32 %v6305_v60, %v6305_v60  ;;  %v6311_v63 = vld [vmem:[#allocation2 + $0x208] sm:$0xff] }
 0x28a   : > { %2094 = vadd.xlane.f32.xlu0 %v2074_v22  ;;  %v6249_v32 = vld [vmem:[#allocation2 + $0x2c0] sm:$0xff]  ;;  %v2080_v33 = vmul.f32 %v6247_v31, %v6247_v31  ;;  %v6313_v0 = vld [vmem:[#allocation2 + $0x348] sm:$0xff]  ;;  %v2389_v1 = vmul.f32 %v6311_v63, %v6311_v63 }
 0x28b   : > { %v2081_v34 = vmul.f32 %v6249_v32, %v6249_v32  ;;  %v6255_v35 = vld [vmem:[#allocation2 + $0x300] sm:$0xff]  ;;  %v2394_v2 = vmul.f32 %v6313_v0, %v6313_v0  ;;  %v6319_v3 = vld [vmem:[#allocation2 + $0x288] sm:$0xff] }
 0x28c   : > { %2096 = vadd.xlane.f32.xlu1 %v2075_v23  ;;  %v6257_v36 = vld [vmem:[#allocation2 + $0x340] sm:$0xff]  ;;  %v2082_v37 = vmul.f32 %v6255_v35, %v6255_v35  ;;  %v6321_v4 = vld [vmem:[#allocation2 + $0x3c8] sm:$0xff]  ;;  %v2391_v5 = vmul.f32 %v6319_v3, %v6319_v3 }
 0x28d   : > { %v2083_v38 = vmul.f32 %v6257_v36, %v6257_v36  ;;  %v6263_v39 = vld [vmem:[#allocation2 + $0x380] sm:$0xff]  ;;  %v2396_v6 = vmul.f32 %v6321_v4, %v6321_v4  ;;  %v6327_v7 = vld [vmem:[#allocation2 + $0x308] sm:$0xff] }
 0x28e   : > { %2098 = vadd.xlane.f32.xlu0 %v2076_v26  ;;  %v6265_v40 = vld [vmem:[#allocation2 + $0x3c0] sm:$0xff]  ;;  %v2084_v41 = vmul.f32 %v6263_v39, %v6263_v39  ;;  %v2393_v10 = vmul.f32 %v6327_v7, %v6327_v7  ;;  %v6331_v11 = vld [vmem:[#allocation2 + $0x388] sm:$0xff] }
 0x28f   : > { %v2085_v42 = vmul.f32 %v6265_v40, %v6265_v40  ;;  %v2395_v12 = vmul.f32 %v6331_v11, %v6331_v11 }
 0x290   : > { %2100 = vadd.xlane.f32.xlu1 %v2077_v27 }
 0x292   : > { %2102 = vadd.xlane.f32.xlu0 %v2078_v29 }
 0x294   : > { %2104 = vadd.xlane.f32.xlu1 %v2079_v30 }
 0x296   : > { %2106 = vadd.xlane.f32.xlu0 %v2080_v33 }
 0x298   : > { %2108 = vadd.xlane.f32.xlu1 %v2081_v34 }
 0x29a   : > { %2110 = vadd.xlane.f32.xlu0 %v2082_v37 }
 0x29c   : > { %2112 = vadd.xlane.f32.xlu1 %v2083_v38 }
 0x29e   : > { %2114 = vadd.xlane.f32.xlu0 %v2084_v41 }
 0x2a0   : > { %2116 = vadd.xlane.f32.xlu1 %v2085_v42 }
 0x2a2   : > { %2397 = vadd.xlane.f32.xlu0 %v2381_v45 }
 0x2a4   : > { %2399 = vadd.xlane.f32.xlu1 %v2382_v46 }
 0x2a6   : > { %2401 = vadd.xlane.f32.xlu0 %v2383_v49 }
 0x2a8   : > { %2407 = vadd.xlane.f32.xlu1 %v2386_v50 }
 0x2aa   : > { %2403 = vadd.xlane.f32.xlu0 %v2384_v53 }
 0x2ac   : > { %2411 = vadd.xlane.f32.xlu1 %v2388_v54 }
 0x2ae   : > { %2405 = vadd.xlane.f32.xlu0 %v2385_v57 }
 0x2b0   : > { %2415 = vadd.xlane.f32.xlu1 %v2390_v58 }
 0x2b2   : > { %2409 = vadd.xlane.f32.xlu0 %v2387_v61 }
 0x2b4   : > { %2419 = vadd.xlane.f32.xlu1 %v2392_v62  ;;  %v6338_v62 = vld [vmem:[%s8181_s16] ss:$0 sm:$0xff] }
 0x2b6   : > { %2413 = vadd.xlane.f32.xlu0 %v2389_v1 }
 0x2b8   : > { %2423 = vadd.xlane.f32.xlu1 %v2394_v2 }
 0x2ba   : > { %2417 = vadd.xlane.f32.xlu0 %v2391_v5 }
 0x2bc   : > { %2427 = vadd.xlane.f32.xlu1 %v2396_v6 }
 0x2be   : > { %2421 = vadd.xlane.f32.xlu0 %v2393_v10 }
 0x2c2   : > { %2425 = vadd.xlane.f32.xlu0 %v2395_v12 }
 0x30f   : > { %v2087_v15 = vpop.xlane.xlu0 %2086 }
 0x310   : > { %v2119_v18 = vmul.f32 0.0078125, %v2087_v15 }
 0x311   : > { %v2091_v16 = vpop.xlane.xlu1 %2090 }
 0x312   : > { %v2121_v19 = vmul.f32 0.0078125, %v2091_v16  ;;  %v2135_v22 = vadd.f32 1e-06, %v2119_v18 }
 0x313   : > { %v2089_v26 = vpop.xlane.xlu0 %2088 }
 0x314   : > { %v2137_v23 = vadd.f32 1e-06, %v2121_v19  ;;  %4895 = vrsqrt.f32 %v2135_v22  ;;  %v2120_v29 = vmul.f32 0.0078125, %v2089_v26 }
 0x315   : > { %v2093_v27 = vpop.xlane.xlu1 %2092 }
 0x316   : > { %v2122_v30 = vmul.f32 0.0078125, %v2093_v27  ;;  %v2136_v33 = vadd.f32 1e-06, %v2120_v29  ;;  %4897 = vrsqrt.f32 %v2137_v23 }
 0x317   : > { %v2095_v37 = vpop.xlane.xlu0 %2094 }
 0x318   : > { %v2138_v34 = vadd.f32 1e-06, %v2122_v30  ;;  %4899 = vrsqrt.f32 %v2136_v33  ;;  %v2123_v41 = vmul.f32 0.0078125, %v2095_v37 }
 0x319   : > { %v2097_v38 = vpop.xlane.xlu1 %2096 }
 0x31a   : > { %v2124_v42 = vmul.f32 0.0078125, %v2097_v38  ;;  %v2139_v45 = vadd.f32 1e-06, %v2123_v41  ;;  %4901 = vrsqrt.f32 %v2138_v34 }
 0x31b   : > { %v2099_v49 = vpop.xlane.xlu0 %2098 }
 0x31c   : > { %v2140_v46 = vadd.f32 1e-06, %v2124_v42  ;;  %4903 = vrsqrt.f32 %v2139_v45  ;;  %v2125_v53 = vmul.f32 0.0078125, %v2099_v49 }
 0x31d   : > { %v2101_v50 = vpop.xlane.xlu1 %2100 }
 0x31e   : > { %v2126_v54 = vmul.f32 0.0078125, %v2101_v50  ;;  %v4896_v57 = vpop.eup %4895  ;;  %v2141_v58 = vadd.f32 1e-06, %v2125_v53  ;;  %4905 = vrsqrt.f32 %v2140_v46 }
 0x31f   : > { %v2103_v1 = vpop.xlane.xlu0 %2102  ;;  %v2167_v2 = vmul.f32 %v4896_v57, %v6207_v8 }
 0x320   : > { %v2142_v61 = vadd.f32 1e-06, %v2126_v54  ;;  %v4898_v6 = vpop.eup %4897  ;;  %4907 = vrsqrt.f32 %v2141_v58  ;;  %v2127_v10 = vmul.f32 0.0078125, %v2103_v1 }
 0x321   : > { %v2105_v5 = vpop.xlane.xlu1 %2104  ;;  %v6342_v15 = vmul.f32 %v6338_v62, %v2167_v2  ;;  %v2169_v26 = vmul.f32 %v4898_v6, %v6211_v14 }
 0x322   : > { %v2128_v12 = vmul.f32 0.0078125, %v2105_v5  ;;  %v4900_v16 = vpop.eup %4899  ;;  %v2143_v18 = vadd.f32 1e-06, %v2127_v10  ;;  %4909 = vrsqrt.f32 %v2142_v61 }
 0x323   : > { %2205 = vrot.lane.b32.xlu0 %v6342_v15, %s5504_s7  ;;  %v2107_v22 = vpop.xlane.xlu0 %2106  ;;  %v2168_v23 = vmul.f32 %v4900_v16, %v6209_v13  ;;  %v6354_v13 = vmul.f32 %v6338_v62, %v2169_v26 }
 0x324   : > { %v2144_v19 = vadd.f32 1e-06, %v2128_v12  ;;  %v4902_v27 = vpop.eup %4901  ;;  %4911 = vrsqrt.f32 %v2143_v18  ;;  %v2129_v29 = vmul.f32 0.0078125, %v2107_v22 }
 0x325   : > { %v2109_v8 = vpop.xlane.xlu1 %2108  ;;  %v6349_v33 = vmul.f32 %v6338_v62, %v2168_v23  ;;  %v2170_v45 = vmul.f32 %v4902_v27, %v6217_v17 }
 0x326   : > { %v2130_v30 = vmul.f32 0.0078125, %v2109_v8  ;;  %v4904_v34 = vpop.eup %4903  ;;  %v2145_v37 = vadd.f32 1e-06, %v2129_v29  ;;  %4913 = vrsqrt.f32 %v2144_v19 }
 0x327   : > { %2207 = vrot.lane.b32.xlu1 %v6349_v33, %s5504_s7  ;;  %v2111_v41 = vpop.xlane.xlu0 %2110  ;;  %v2171_v14 = vmul.f32 %v4904_v34, %v6223_v20  ;;  %v6366_v17 = vmul.f32 %v6338_v62, %v2170_v45 }
 0x328   : > { %v2146_v38 = vadd.f32 1e-06, %v2130_v30  ;;  %v4906_v46 = vpop.eup %4905  ;;  %4915 = vrsqrt.f32 %v2145_v37  ;;  %v2131_v49 = vmul.f32 0.0078125, %v2111_v41 }
 0x329   : > { %v2113_v42 = vpop.xlane.xlu1 %2112  ;;  %v6359_v53 = vmul.f32 %v6338_v62, %v2171_v14  ;;  %v2172_v2 = vmul.f32 %v4906_v46, %v6225_v21 }
 0x32a   : > { %v2132_v50 = vmul.f32 0.0078125, %v2113_v42  ;;  %v4908_v54 = vpop.eup %4907  ;;  %v2147_v57 = vadd.f32 1e-06, %v2131_v49  ;;  %4917 = vrsqrt.f32 %v2146_v38 }
 0x32b   : > { %2209 = vrot.lane.b32.xlu1 %v6354_v13, %s5504_s7  ;;  %2213 = vrot.lane.b32.xlu0 %v6359_v53, %s5504_s7  ;;  %v2115_v20 = vpop.xlane.xlu0 %2114  ;;  %v2173_v61 = vmul.f32 %v4908_v54, %v6231_v24  ;;  %v6378_v21 = vmul.f32 %v6338_v62, %v2172_v2 }
 0x32c   : > { %v2148_v58 = vadd.f32 1e-06, %v2132_v50  ;;  %v4910_v5 = vpop.eup %4909  ;;  %4919 = vrsqrt.f32 %v2147_v57  ;;  %v2133_v6 = vmul.f32 0.0078125, %v2115_v20 }
 0x32d   : > { %v2117_v1 = vpop.xlane.xlu1 %2116  ;;  %v6371_v12 = vmul.f32 %v6338_v62, %v2173_v61  ;;  %v2174_v8 = vmul.f32 %v4910_v5, %v6233_v25 }
 0x32e   : > { %v2134_v10 = vmul.f32 0.0078125, %v2117_v1  ;;  %v4912_v16 = vpop.eup %4911  ;;  %v2149_v18 = vadd.f32 1e-06, %v2133_v6  ;;  %4921 = vrsqrt.f32 %v2148_v58 }
 0x32f   : > { %2211 = vrot.lane.b32.xlu1 %v6366_v17, %s5504_s7  ;;  %2217 = vrot.lane.b32.xlu0 %v6371_v12, %s5504_s7  ;;  %v2398_v24 = vpop.xlane.xlu0 %2397  ;;  %v2175_v22 = vmul.f32 %v4912_v16, %v6239_v9  ;;  %v6390_v25 = vmul.f32 %v6338_v62, %v2174_v8 }
 0x330   : > { %v2150_v19 = vadd.f32 1e-06, %v2134_v10  ;;  %v4914_v26 = vpop.eup %4913  ;;  %4923 = vrsqrt.f32 %v2149_v18  ;;  %v2429_v27 = vmul.f32 0.0078125, %v2398_v24 }
 0x331   : > { %v2400_v23 = vpop.xlane.xlu1 %2399  ;;  %v6383_v30 = vmul.f32 %v6338_v62, %v2175_v22  ;;  %v2176_v14 = vmul.f32 %v4914_v26, %v6241_v28 }
 0x332   : > { %v2430_v29 = vmul.f32 0.0078125, %v2400_v23  ;;  %v4916_v34 = vpop.eup %4915  ;;  %v2445_v37 = vadd.f32 1e-06, %v2429_v27  ;;  %4925 = vrsqrt.f32 %v2150_v19 }
 0x333   : > { %2215 = vrot.lane.b32.xlu1 %v6378_v21, %s5504_s7  ;;  %2221 = vrot.lane.b32.xlu0 %v6383_v30, %s5504_s7  ;;  %v2402_v9 = vpop.xlane.xlu0 %2401  ;;  %v2177_v41 = vmul.f32 %v4916_v34, %v6247_v31  ;;  %v6402_v31 = vmul.f32 %v6338_v62, %v2176_v14 }
 0x334   : > { %v2446_v38 = vadd.f32 1e-06, %v2430_v29  ;;  %v4918_v45 = vpop.eup %4917  ;;  %4927 = vrsqrt.f32 %v2445_v37  ;;  %v2431_v46 = vmul.f32 0.0078125, %v2402_v9 }
 0x335   : > { %v2408_v42 = vpop.xlane.xlu1 %2407  ;;  %v6395_v49 = vmul.f32 %v6338_v62, %v2177_v41  ;;  %v2178_v58 = vmul.f32 %v4918_v45, %v6249_v32 }
 0x336   : > { %v4920_v50 = vpop.eup %4919  ;;  %v2447_v54 = vadd.f32 1e-06, %v2431_v46  ;;  %4929 = vrsqrt.f32 %v2446_v38  ;;  %v2434_v10 = vmul.f32 0.0078125, %v2408_v42 }
 0x337   : > { %2219 = vrot.lane.b32.xlu1 %v6390_v25, %s5504_s7  ;;  %2225 = vrot.lane.b32.xlu0 %v6395_v49, %s5504_s7  ;;  %v2404_v57 = vpop.xlane.xlu0 %2403  ;;  %v2179_v28 = vmul.f32 %v4920_v50, %v6255_v35  ;;  %v6414_v35 = vmul.f32 %v6338_v62, %v2178_v58 }
 0x338   : > { %v4922_v61 = vpop.eup %4921  ;;  %v2432_v1 = vmul.f32 0.0078125, %v2404_v57  ;;  %4931 = vrsqrt.f32 %v2447_v54  ;;  %v2450_v27 = vadd.f32 1e-06, %v2434_v10 }
 0x339   : > { %v2412_v20 = vpop.xlane.xlu1 %2411  ;;  %v6407_v2 = vmul.f32 %v6338_v62, %v2179_v28  ;;  %v2180_v18 = vmul.f32 %v4922_v61, %v6257_v36 }
 0x33a   : > { %v4924_v5 = vpop.eup %4923  ;;  %v2448_v6 = vadd.f32 1e-06, %v2432_v1  ;;  %v2436_v29 = vmul.f32 0.0078125, %v2412_v20 }
 0x33b   : > { %2223 = vrot.lane.b32.xlu1 %v6402_v31, %s5504_s7  ;;  %2229 = vrot.lane.b32.xlu0 %v6407_v2, %s5504_s7  ;;  %v2406_v16 = vpop.xlane.xlu0 %2405  ;;  %v2181_v32 = vmul.f32 %v4924_v5, %v6263_v39  ;;  %v6426_v36 = vmul.f32 %v6338_v62, %v2180_v18 }
 0x33c   : > { %v4926_v24 = vpop.eup %4925  ;;  %v2433_v22 = vmul.f32 0.0078125, %v2406_v16  ;;  %4933 = vrsqrt.f32 %v2448_v6  ;;  %v2452_v45 = vadd.f32 1e-06, %v2436_v29 }
 0x33d   : > { %v2416_v19 = vpop.xlane.xlu1 %2415  ;;  %v6419_v23 = vmul.f32 %v6338_v62, %v2181_v32  ;;  %v2182_v37 = vmul.f32 %v4926_v24, %v6265_v40 }
 0x33e   : > { %v4928_v8 = vpop.eup %4927  ;;  %v2449_v26 = vadd.f32 1e-06, %v2433_v22  ;;  %v2438_v46 = vmul.f32 0.0078125, %v2416_v19 }
 0x33f   : > { %2227 = vrot.lane.b32.xlu1 %v6414_v35, %s5504_s7  ;;  %2233 = vrot.lane.b32.xlu0 %v6419_v23, %s5504_s7  ;;  %v2410_v39 = vpop.xlane.xlu0 %2409  ;;  %v2477_v34 = vmul.f32 %v4928_v8, %v6271_v43  ;;  %v6438_v40 = vmul.f32 %v6338_v62, %v2182_v37 }
 0x340   : > { %v4930_v9 = vpop.eup %4929  ;;  %4935 = vrsqrt.f32 %v2449_v26  ;;  %v2435_v41 = vmul.f32 0.0078125, %v2410_v39  ;;  %v2454_v20 = vadd.f32 1e-06, %v2438_v46 }
 0x341   : > { %v2420_v38 = vpop.xlane.xlu1 %2419  ;;  %v6431_v14 = vmul.f32 %v6338_v62, %v2477_v34  ;;  %4937 = vrsqrt.f32 %v2450_v27  ;;  %v2478_v50 = vmul.f32 %v4930_v9, %v6273_v44 }
 0x342   : > { %v2451_v42 = vadd.f32 1e-06, %v2435_v41  ;;  %v4932_v54 = vpop.eup %4931  ;;  %v2440_v61 = vmul.f32 0.0078125, %v2420_v38 }
 0x343   : > { %2231 = vrot.lane.b32.xlu1 %v6426_v36, %s5504_s7  ;;  %2509 = vrot.lane.b32.xlu0 %v6431_v14, %s5504_s7  ;;  %v2414_v43 = vpop.xlane.xlu0 %2413  ;;  %v6444_v5 = vmul.f32 %v6338_v62, %v2478_v50  ;;  %v2479_v6 = vmul.f32 %v4932_v54, %v6279_v47 }
 0x344   : > { %4939 = vrsqrt.f32 %v2451_v42  ;;  %v2437_v57 = vmul.f32 0.0078125, %v2414_v43  ;;  %v2456_v18 = vadd.f32 1e-06, %v2440_v61 }
 0x345   : > { %v2424_v28 = vpop.xlane.xlu1 %2423  ;;  %4941 = vrsqrt.f32 %v2452_v45  ;;  %v6450_v22 = vmul.f32 %v6338_v62, %v2479_v6 }
 0x346   : > { %v2453_v58 = vadd.f32 1e-06, %v2437_v57  ;;  %v4934_v10 = vpop.eup %4933  ;;  %v2442_v19 = vmul.f32 0.0078125, %v2424_v28 }
 0x347   : > { %2235 = vrot.lane.b32.xlu1 %v6438_v40, %s5504_s7  ;;  %v2418_v1 = vpop.xlane.xlu0 %2417  ;;  %v2480_v26 = vmul.f32 %v4934_v10, %v6287_v51 }
 0x348   : > { %4943 = vrsqrt.f32 %v2453_v58  ;;  %v2439_v44 = vmul.f32 0.0078125, %v2418_v1  ;;  %v2458_v38 = vadd.f32 1e-06, %v2442_v19 }
 0x349   : > { %4945 = vrsqrt.f32 %v2454_v20  ;;  %v2428_v47 = vpop.xlane.xlu1 %2427  ;;  %v6462_v51 = vmul.f32 %v6338_v62, %v2480_v26 }
 0x34a   : > { %v4936_v16 = vpop.eup %4935  ;;  %v2455_v32 = vadd.f32 1e-06, %v2439_v44  ;;  %v2444_v9 = vmul.f32 0.0078125, %v2428_v47 }
 0x34b   : > { %2511 = vrot.lane.b32.xlu1 %v6444_v5, %s5504_s7  ;;  %v2422_v24 = vpop.xlane.xlu0 %2421  ;;  %v2481_v8 = vmul.f32 %v4936_v16, %v6295_v55  ;;  %v4938_v27 = vpop.eup %4937 }
 0x34c   : > { %4947 = vrsqrt.f32 %v2455_v32  ;;  %v2441_v29 = vmul.f32 0.0078125, %v2422_v24  ;;  %v2482_v42 = vmul.f32 %v4938_v27, %v6281_v48  ;;  %v2460_v57 = vadd.f32 1e-06, %v2444_v9  ;;  %v6546_v9 = vld [vmem:[#allocation2 + $0x50] sm:$0xff] }
 0x34d   : > { %v6455_v39 = vmul.f32 %v6338_v62, %v2481_v8  ;;  %4949 = vrsqrt.f32 %v2456_v18  ;;  %8189 = vst [vmem:[#allocation37_spill] sm:$0xff] %v6546_v9 }
 0x34e   : > { %v4940_v34 = vpop.eup %4939  ;;  %v2457_v37 = vadd.f32 1e-06, %v2441_v29 }
 0x34f   : > { %2513 = vrot.lane.b32.xlu1 %v6450_v22, %s5504_s7  ;;  %2517 = vrot.lane.b32.xlu0 %v6455_v39, %s5504_s7  ;;  %v2426_v55 = vpop.xlane.xlu0 %2425  ;;  %v2483_v41 = vmul.f32 %v4940_v34, %v6303_v59  ;;  %v4942_v45 = vpop.eup %4941  ;;  %v6474_v59 = vmul.f32 %v6338_v62, %v2482_v42  ;;  %v6536_v34 = vld [vmem:[#allocation2 + $0x90] sm:$0xff]  ;;  %v2686_v42 = vmul.f32 %v6546_v9, %v6546_v9  ;;  %v6725_v9 = vld [vmem:[%s5935_s11 + $0x58] sm:$0xff] }
 0x350   : > { %4951 = vrsqrt.f32 %v2457_v37  ;;  %v2443_v46 = vmul.f32 0.0078125, %v2426_v55  ;;  %v2484_v28 = vmul.f32 %v4942_v45, %v6289_v52  ;;  %8186 = vst [vmem:[#allocation34_spill] sm:$0xff] %v6536_v34  ;;  %v6540_v37 = vld [vmem:[#allocation2 + $0xd0] sm:$0xff]  ;;  %v2066_v55 = vlaneseq }
 0x351   : > { %v6467_v43 = vmul.f32 %v6338_v62, %v2483_v41  ;;  %4953 = vrsqrt.f32 %v2458_v38  ;;  %8187 = vst [vmem:[#allocation35_spill] sm:$0xff] %v6540_v37  ;;  %v6544_v38 = vld [vmem:[#allocation2 + $0x110] sm:$0xff] }
 0x352   : > { %v4944_v50 = vpop.eup %4943  ;;  %v2459_v54 = vadd.f32 1e-06, %v2443_v46  ;;  %v6486_v1 = vmul.f32 %v6338_v62, %v2484_v28  ;;  %8188 = vst [vmem:[#allocation36_spill] sm:$0xff] %v6544_v38  ;;  %v2689_v41 = vmul.f32 %v6544_v38, %v6544_v38  ;;  %v6552_v45 = vld [vmem:[#allocation2 + $0x190] sm:$0xff]  ;;  %v2067_v46 = vand.u32 127, %v2066_v55  ;;  %v6596_v55 = vld [vmem:[%s5942_s8 + $0x8] sm:$0xff] }
 0x353   : > { %2515 = vrot.lane.b32.xlu1 %v6462_v51, %s5504_s7  ;;  %2521 = vrot.lane.b32.xlu0 %v6467_v43, %s5504_s7  ;;  %v2485_v48 = vmul.f32 %v4944_v50, %v6311_v63  ;;  %v4946_v58 = vpop.eup %4945  ;;  %8190 = vst [vmem:[#allocation38_spill] sm:$0xff] %v6552_v45  ;;  %v6554_v50 = vld [vmem:[#allocation2 + $0x150] sm:$0xff] }
 0x354   : > { %4955 = vrsqrt.f32 %v2459_v54  ;;  %v2486_v52 = vmul.f32 %v4946_v58, %v6297_v56  ;;  %8191 = vst [vmem:[#allocation39_spill] sm:$0xff] %v6554_v50  ;;  %v2691_v54 = vmul.f32 %v6552_v45, %v6552_v45  ;;  %vm2068_vm0 = vcmp.lt.s32.totalorder %v2067_v46, 64  ;;  %v6562_v28 = vld [vmem:[#allocation2 + $0x1d0] sm:$0xff]  ;;  %v6703_v45 = vld [vmem:[%s5935_s11 + $0x48] sm:$0xff] }
 0x355   : > { %v6479_v20 = vmul.f32 %v6338_v62, %v2485_v48  ;;  %4957 = vrsqrt.f32 %v2460_v57  ;;  %v6558_v57 = vld [vmem:[#allocation2 + $0x210] sm:$0xff]  ;;  %v2690_v48 = vmul.f32 %v6554_v50, %v6554_v50  ;;  %8193 = vst [vmem:[#allocation41_spill] sm:$0xff] %v6562_v28 }
 0x356   : > { %v4948_v61 = vpop.eup %4947  ;;  %v6498_v16 = vmul.f32 %v6338_v62, %v2486_v52  ;;  %8192 = vst [vmem:[#allocation40_spill] sm:$0xff] %v6558_v57  ;;  %v2693_v58 = vmul.f32 %v6558_v57, %v6558_v57  ;;  %v6568_v52 = vld [vmem:[#allocation2 + $0x290] sm:$0xff] }
 0x357   : > { %2519 = vrot.lane.b32.xlu1 %v6474_v59, %s5504_s7  ;;  %2525 = vrot.lane.b32.xlu0 %v6479_v20, %s5504_s7  ;;  %v2487_v63 = vmul.f32 %v4948_v61, %v6319_v3  ;;  %v4950_v6 = vpop.eup %4949  ;;  %v5505_v61 = vmov 1.0   ;;  %8194 = vst [vmem:[#allocation42_spill] sm:$0xff] %v6568_v52  ;;  %v6728_v38 = vld [vmem:[%s5935_s11 + $0x70] sm:$0xff] }
 0x358   : > { %v2488_v3 = vmul.f32 %v4950_v6, %v6305_v60  ;;  %v2692_v6 = vmul.f32 %v6562_v28, %v6562_v28 }
 0x359   : > { %v6491_v10 = vmul.f32 %v6338_v62, %v2487_v63  ;;  %v6566_v63 = vsel %vm2068_vm0, -1.0, %v5505_v61  ;;  %v6608_v61 = vld [vmem:[%s5935_s11 + $0x10] sm:$0xff] }
 0x35a   : > { %v4952_v44 = vpop.eup %4951  ;;  %v6510_v24 = vmul.f32 %v6338_v62, %v2488_v3  ;;  %v6578_v3 = vld [vmem:[%s5942_s8] sm:$0xff] }
 0x35b   : > { %2523 = vrot.lane.b32.xlu1 %v6486_v1, %s5504_s7  ;;  %2529 = vrot.lane.b32.xlu0 %v6491_v10, %s5504_s7  ;;  %v2489_v32 = vmul.f32 %v4952_v44, %v6327_v7  ;;  %v4954_v18 = vpop.eup %4953  ;;  %v6572_v44 = vld [vmem:[#allocation2 + $0x250] sm:$0xff] }
 0x35c   : > { %v2490_v7 = vmul.f32 %v4954_v18, %v6313_v0  ;;  %8195 = vst [vmem:[#allocation43_spill] sm:$0xff] %v6572_v44 }
 0x35d   : > { %v6503_v56 = vmul.f32 %v6338_v62, %v2489_v32  ;;  %v6575_v32 = vld [vmem:[%s5935_s11] sm:$0xff] }
 0x35e   : > { %v4956_v19 = vpop.eup %4955  ;;  %v6522_v47 = vmul.f32 %v6338_v62, %v2490_v7  ;;  %v6583_v7 = vld [vmem:[#allocation2 + $0x310] sm:$0xff] }
 0x35f   : > { %2527 = vrot.lane.b32.xlu1 %v6498_v16, %s5504_s7  ;;  %2533 = vrot.lane.b32.xlu0 %v6503_v56, %s5504_s7  ;;  %v2491_v8 = vmul.f32 %v4956_v19, %v6331_v11  ;;  %v4958_v26 = vpop.eup %4957  ;;  %v6532_v11 = vld [vmem:[#allocation2 + $0x10] sm:$0xff]  ;;  %8196 = vst [vmem:[#allocation44_spill] sm:$0xff] %v6583_v7 }
 0x360   : > { %8183 = vst [vmem:[#allocation31_spill] sm:$0xff] %v6522_v47  ;;  %v2492_v27 = vmul.f32 %v4958_v26, %v6321_v4  ;;  %8185 = vst [vmem:[#allocation33_spill] sm:$0xff] %v6532_v11  ;;  %v2685_v29 = vmul.f32 %v6532_v11, %v6532_v11  ;;  %v2687_v4 = vmul.f32 %v6536_v34, %v6536_v34  ;;  %v6706_v34 = vld [vmem:[%s5935_s11 + $0x60] sm:$0xff]  ;;  %v6747_v11 = vld [vmem:[%s5935_s11 + $0x68] sm:$0xff] }
 0x361   : > { %v6515_v60 = vmul.f32 %v6338_v62, %v2491_v8  ;;  %v2695_v8 = vmul.f32 %v6568_v52, %v6568_v52  ;;  %v2694_v26 = vmul.f32 %v6572_v44, %v6572_v44  ;;  %v2255_v44 = vmul.f32 %v6354_v13, %v6608_v61  ;;  %v6644_v13 = vld [vmem:[%s5942_s8 + $0x18] sm:$0xff] }
 0x362   : > { %v6528_v0 = vmul.f32 %v6338_v62, %v2492_v27  ;;  %v2688_v62 = vmul.f32 %v6540_v37, %v6540_v37  ;;  %v2253_v27 = vmul.f32 %v6342_v15, %v6575_v32  ;;  %v2697_v15 = vmul.f32 %v6583_v7, %v6583_v7  ;;  %v6681_v37 = vld [vmem:[%s5935_s11 + $0x38] sm:$0xff] }
 0x363   : > { %2531 = vrot.lane.b32.xlu1 %v6510_v24, %s5504_s7  ;;  %2537 = vrot.lane.b32.xlu0 %v6515_v60, %s5504_s7 }
 0x364   : > { %8184 = vst [vmem:[#allocation32_spill] sm:$0xff] %v6528_v0 }
 0x367   : > { %2535 = vrot.lane.b32.xlu1 %v6522_v47, %s5504_s7 }
 0x36b   : > { %2539 = vrot.lane.b32.xlu1 %v6528_v0, %s5504_s7 }
 0x382   : > { %2701 = vadd.xlane.f32.xlu0 %v2685_v29 }
 0x386   : > { %2705 = vadd.xlane.f32.xlu0 %v2687_v4  ;;  %v6590_v4 = vld [vmem:[#allocation2 + $0x2d0] sm:$0xff] }
 0x387   : > { %8197 = vst [vmem:[#allocation45_spill] sm:$0xff] %v6590_v4 }
 0x38a   : > { %2707 = vadd.xlane.f32.xlu0 %v2688_v62  ;;  %v6593_v62 = vld [vmem:[%s5935_s11 + $0x8] sm:$0xff] }
 0x38e   : > { %2709 = vadd.xlane.f32.xlu0 %v2689_v41 }
 0x38f   : > { %2703 = vadd.xlane.f32.xlu1 %v2686_v42 }
 0x392   : > { %2713 = vadd.xlane.f32.xlu0 %v2691_v54  ;;  %v6601_v54 = vld [vmem:[#allocation2 + $0x390] sm:$0xff] }
 0x393   : > { %2711 = vadd.xlane.f32.xlu1 %v2690_v48  ;;  %8198 = vst [vmem:[#allocation46_spill] sm:$0xff] %v6601_v54  ;;  %v2696_v48 = vmul.f32 %v6590_v4, %v6590_v4 }
 0x395   : > { %v2206_v18 = vpop.permute.xlu0 %2205 }
 0x396   : > { %v2237_v19 = vmul.f32 %v2206_v18, %v6566_v63  ;;  %2717 = vadd.xlane.f32.xlu0 %v2693_v58  ;;  %v2254_v58 = vmul.f32 %v6349_v33, %v6593_v62 }
 0x397   : > { %2715 = vadd.xlane.f32.xlu1 %v2692_v6 }
 0x398   : > { %v2269_v29 = vmul.f32 %v2237_v19, %v6578_v3  ;;  %v6611_v19 = vld [vmem:[#allocation2 + $0x350] sm:$0xff] }
 0x399   : > { %v2208_v41 = vpop.permute.xlu1 %2207  ;;  %8199 = vst [vmem:[#allocation47_spill] sm:$0xff] %v6611_v19  ;;  %v2698_v7 = vmul.f32 %v6611_v19, %v6611_v19  ;;  %v6647_v19 = vld [vmem:[%s5942_s8 + $0x30] sm:$0xff] }
 0x39a   : > { %v2285_v42 = vadd.f32 %v2269_v29, %v2253_v27  ;;  %v2238_v46 = vmul.f32 %v2208_v41, %v6566_v63  ;;  %2721 = vadd.xlane.f32.xlu0 %v2695_v8  ;;  %v6614_v8 = vld [vmem:[%s5935_s11 + $0x20] sm:$0xff]  ;;  %v6617_v27 = vld [vmem:[%s5942_s8 + $0x10] sm:$0xff] }
 0x39b   : > { %2719 = vadd.xlane.f32.xlu1 %v2694_v26  ;;  %v6620_v29 = vld [vmem:[%s5942_s8 + $0x20] sm:$0xff] }
 0x39c   : > { %v4588_v6 = vpack.c.bf16 %v2285_v42, %v2285_v42  ;;  %v2270_v18 = vmul.f32 %v2238_v46, %v6596_v55  ;;  %v2699_v46 = vmul.f32 %v6601_v54, %v6601_v54  ;;  %v6641_v54 = vld [vmem:[#allocation2 + $0x3d0] sm:$0xff] }
 0x39d   : > { %v2210_v26 = vpop.permute.xlu1 %2209  ;;  %v2214_v41 = vpop.permute.xlu0 %2213  ;;  %8200 = vst [vmem:[#allocation48_spill] sm:$0xff] %v6641_v54 }
 0x39e   : > { %2365 = vst [vmem:[%s5949_s13] sm:$0xf] %v4588_v6  ;;  %v2286_v33 = vadd.f32 %v2270_v18, %v2254_v58  ;;  %v2239_v4 = vmul.f32 %v2210_v26, %v6566_v63  ;;  %v2241_v42 = vmul.f32 %v2214_v41, %v6566_v63  ;;  %2725 = vadd.xlane.f32.xlu0 %v2697_v15  ;;  %v6634_v6 = vld [vmem:[%s5935_s11 + $0x18] sm:$0xff]  ;;  %v6637_v18 = vld [vmem:[%s5935_s11 + $0x30] sm:$0xff] }
 0x39f   : > { %2723 = vadd.xlane.f32.xlu1 %v2696_v48  ;;  %v2257_v58 = vmul.f32 %v6359_v53, %v6614_v8  ;;  %v2259_v50 = vmul.f32 %v6371_v12, %v6637_v18  ;;  %v6670_v12 = vld [vmem:[%s5942_s8 + $0x40] sm:$0xff] }
 0x3a0   : > { %v4589_v26 = vpack.c.bf16 %v2286_v33, %v2286_v33  ;;  %v2271_v15 = vmul.f32 %v2239_v4, %v6617_v27  ;;  %v2273_v41 = vmul.f32 %v2241_v42, %v6620_v29  ;;  %v2256_v42 = vmul.f32 %v6366_v17, %v6634_v6  ;;  %v6667_v17 = vld [vmem:[%s5942_s8 + $0x28] sm:$0xff] }
 0x3a1   : > { %v2212_v48 = vpop.permute.xlu1 %2211  ;;  %v2218_v28 = vpop.permute.xlu0 %2217 }
 0x3a2   : > { %2366 = vst [vmem:[%s5949_s13 + $0x10] sm:$0xf] %v4589_v26  ;;  %v2287_v53 = vadd.f32 %v2271_v15, %v2255_v44  ;;  %v2289_v52 = vadd.f32 %v2273_v41, %v2257_v58  ;;  %v2240_v33 = vmul.f32 %v2212_v48, %v6566_v63  ;;  %v2243_v4 = vmul.f32 %v2218_v28, %v6566_v63  ;;  %v6659_v44 = vld [vmem:[%s5935_s11 + $0x28] sm:$0xff]  ;;  %v6662_v58 = vld [vmem:[%s5935_s11 + $0x40] sm:$0xff] }
 0x3a3   : > { %2729 = vadd.xlane.f32.xlu0 %v2699_v46  ;;  %2727 = vadd.xlane.f32.xlu1 %v2698_v7  ;;  %v2700_v26 = vmul.f32 %v6641_v54, %v6641_v54 }
 0x3a4   : > { %v4590_v15 = vpack.c.bf16 %v2287_v53, %v2287_v53  ;;  %v4592_v41 = vpack.c.bf16 %v2289_v52, %v2289_v52  ;;  %v2272_v28 = vmul.f32 %v2240_v33, %v6644_v13  ;;  %v2275_v46 = vmul.f32 %v2243_v4, %v6647_v19 }
 0x3a5   : > { %v2216_v48 = vpop.permute.xlu1 %2215  ;;  %v2222_v7 = vpop.permute.xlu0 %2221  ;;  %v2258_v33 = vmul.f32 %v6378_v21, %v6659_v44  ;;  %v2261_v4 = vmul.f32 %v6383_v30, %v6662_v58  ;;  %v6692_v21 = vld [vmem:[%s5942_s8 + $0x50] sm:$0xff] }
 0x3a6   : > { %2367 = vst [vmem:[%s5949_s13 + $0x20] sm:$0xf] %v4590_v15  ;;  %2369 = vst [vmem:[%s5949_s13 + $0x40] sm:$0xf] %v4592_v41  ;;  %v2288_v54 = vadd.f32 %v2272_v28, %v2256_v42  ;;  %v2291_v57 = vadd.f32 %v2275_v46, %v2259_v50  ;;  %v2242_v52 = vmul.f32 %v2216_v48, %v6566_v63  ;;  %v6684_v15 = vld [vmem:[%s5935_s11 + $0x50] sm:$0xff]  ;;  %v6689_v46 = vld [vmem:[%s5942_s8 + $0x38] sm:$0xff] }
 0x3a7   : > { %v2245_v53 = vmul.f32 %v2222_v7, %v6566_v63  ;;  %2731 = vadd.xlane.f32.xlu1 %v2700_v26 }
 0x3a8   : > { %v4591_v41 = vpack.c.bf16 %v2288_v54, %v2288_v54  ;;  %v4594_v50 = vpack.c.bf16 %v2291_v57, %v2291_v57  ;;  %v2274_v42 = vmul.f32 %v2242_v52, %v6667_v17  ;;  %v2260_v52 = vmul.f32 %v6390_v25, %v6681_v37 }
 0x3a9   : > { %v2277_v28 = vmul.f32 %v2245_v53, %v6670_v12  ;;  %v2220_v48 = vpop.permute.xlu1 %2219  ;;  %v2226_v30 = vpop.permute.xlu0 %2225  ;;  %v2263_v53 = vmul.f32 %v6395_v49, %v6684_v15 }
 0x3aa   : > { %2368 = vst [vmem:[%s5949_s13 + $0x30] sm:$0xf] %v4591_v41  ;;  %2371 = vst [vmem:[%s5949_s13 + $0x60] sm:$0xf] %v4594_v50  ;;  %v2290_v26 = vadd.f32 %v2274_v42, %v2258_v33  ;;  %v2244_v57 = vmul.f32 %v2220_v48, %v6566_v63  ;;  %v2247_v7 = vmul.f32 %v2226_v30, %v6566_v63  ;;  %v6711_v42 = vld [vmem:[%s5942_s8 + $0x48] sm:$0xff]  ;;  %v6714_v48 = vld [vmem:[%s5942_s8 + $0x60] sm:$0xff] }
 0x3ab   : > { %v2293_v54 = vadd.f32 %v2277_v28, %v2261_v4 }
 0x3ac   : > { %v4593_v41 = vpack.c.bf16 %v2290_v26, %v2290_v26  ;;  %v2276_v4 = vmul.f32 %v2244_v57, %v6689_v46  ;;  %v2279_v50 = vmul.f32 %v2247_v7, %v6692_v21  ;;  %v2262_v57 = vmul.f32 %v6402_v31, %v6703_v45 }
 0x3ad   : > { %v4596_v33 = vpack.c.bf16 %v2293_v54, %v2293_v54  ;;  %v2224_v28 = vpop.permute.xlu1 %2223  ;;  %v2230_v25 = vpop.permute.xlu0 %2229  ;;  %v2265_v7 = vmul.f32 %v6407_v2, %v6706_v34 }
 0x3ae   : > { %2370 = vst [vmem:[%s5949_s13 + $0x50] sm:$0xf] %v4593_v41  ;;  %v2292_v49 = vadd.f32 %v2276_v4, %v2260_v52  ;;  %v2295_v30 = vadd.f32 %v2279_v50, %v2263_v53  ;;  %v2246_v26 = vmul.f32 %v2224_v28, %v6566_v63  ;;  %v2249_v54 = vmul.f32 %v2230_v25, %v6566_v63  ;;  %v6733_v4 = vld [vmem:[%s5942_s8 + $0x58] sm:$0xff]  ;;  %v6736_v28 = vld [vmem:[%s5942_s8 + $0x70] sm:$0xff] }
 0x3af   : > { %2373 = vst [vmem:[%s5949_s13 + $0x80] sm:$0xf] %v4596_v33 }
 0x3b0   : > { %v4595_v41 = vpack.c.bf16 %v2292_v49, %v2292_v49  ;;  %v4598_v52 = vpack.c.bf16 %v2295_v30, %v2295_v30  ;;  %v2278_v53 = vmul.f32 %v2246_v26, %v6711_v42  ;;  %v2281_v33 = vmul.f32 %v2249_v54, %v6714_v48 }
 0x3b1   : > { %v2228_v50 = vpop.permute.xlu1 %2227  ;;  %v2234_v31 = vpop.permute.xlu0 %2233  ;;  %v2264_v26 = vmul.f32 %v6414_v35, %v6725_v9  ;;  %v2267_v54 = vmul.f32 %v6419_v23, %v6728_v38 }
 0x3b2   : > { %2372 = vst [vmem:[%s5949_s13 + $0x70] sm:$0xf] %v4595_v41  ;;  %2375 = vst [vmem:[%s5949_s13 + $0xa0] sm:$0xf] %v4598_v52  ;;  %v2294_v2 = vadd.f32 %v2278_v53, %v2262_v57  ;;  %v2297_v25 = vadd.f32 %v2281_v33, %v2265_v7  ;;  %v2248_v49 = vmul.f32 %v2228_v50, %v6566_v63  ;;  %v6752_v57 = vld [vmem:[%s5942_s8 + $0x68] sm:$0xff] }
 0x3b3   : > { %v2251_v30 = vmul.f32 %v2234_v31, %v6566_v63  ;;  %v2266_v31 = vmul.f32 %v6426_v36, %v6747_v11 }
 0x3b4   : > { %v4597_v0 = vpack.c.bf16 %v2294_v2, %v2294_v2  ;;  %v4600_v47 = vpack.c.bf16 %v2297_v25, %v2297_v25  ;;  %v2280_v41 = vmul.f32 %v2248_v49, %v6733_v4  ;;  %v2557_v2 = vmul.f32 %v6431_v14, %v6575_v32 }
 0x3b5   : > { %v2283_v52 = vmul.f32 %v2251_v30, %v6736_v28  ;;  %v2232_v7 = vpop.permute.xlu1 %2231  ;;  %v2510_v53 = vpop.permute.xlu0 %2509 }
 0x3b6   : > { %2374 = vst [vmem:[%s5949_s13 + $0x90] sm:$0xf] %v4597_v0  ;;  %2377 = vst [vmem:[%s5949_s13 + $0xc0] sm:$0xf] %v4600_v47  ;;  %v2296_v35 = vadd.f32 %v2280_v41, %v2264_v26  ;;  %v2250_v33 = vmul.f32 %v2232_v7, %v6566_v63  ;;  %v2541_v50 = vmul.f32 %v2510_v53, %v6566_v63  ;;  %v6765_v0 = vld [vmem:[%s5935_s11 + $0x78] sm:$0xff] }
 0x3b7   : > { %v2299_v23 = vadd.f32 %v2283_v52, %v2267_v54  ;;  %v6768_v26 = vld [vmem:[%s5942_s8 + $0x78] sm:$0xff]  ;;  %v2268_v52 = vmul.f32 %v6438_v40, %v6765_v0 }
 0x3b8   : > { %v4599_v25 = vpack.c.bf16 %v2296_v35, %v2296_v35  ;;  %v2282_v30 = vmul.f32 %v2250_v33, %v6752_v57  ;;  %v2573_v47 = vmul.f32 %v2541_v50, %v6578_v3 }
 0x3b9   : > { %v4602_v49 = vpack.c.bf16 %v2299_v23, %v2299_v23  ;;  %v2236_v54 = vpop.permute.xlu1 %2235 }
 0x3ba   : > { %2376 = vst [vmem:[%s5949_s13 + $0xb0] sm:$0xf] %v4599_v25  ;;  %v2298_v41 = vadd.f32 %v2282_v30, %v2266_v31  ;;  %v2589_v36 = vadd.f32 %v2573_v47, %v2557_v2  ;;  %v2252_v14 = vmul.f32 %v2236_v54, %v6566_v63  ;;  %v2558_v31 = vmul.f32 %v6444_v5, %v6593_v62 }
 0x3bb   : > { %2379 = vst [vmem:[%s5949_s13 + $0xe0] sm:$0xf] %v4602_v49 }
 0x3bc   : > { %v4601_v7 = vpack.c.bf16 %v2298_v41, %v2298_v41  ;;  %v4604_v53 = vpack.c.bf16 %v2589_v36, %v2589_v36  ;;  %v2284_v35 = vmul.f32 %v2252_v14, %v6768_v26  ;;  %v2559_v41 = vmul.f32 %v6450_v22, %v6608_v61 }
 0x3bd   : > { %v2512_v23 = vpop.permute.xlu1 %2511  ;;  %v2561_v36 = vmul.f32 %v6455_v39, %v6614_v8  ;;  %v2560_v22 = vmul.f32 %v6462_v51, %v6634_v6  ;;  %v2563_v39 = vmul.f32 %v6467_v43, %v6637_v18  ;;  %v2562_v43 = vmul.f32 %v6474_v59, %v6659_v44 }
 0x3be   : > { %2378 = vst [vmem:[%s5949_s13 + $0xd0] sm:$0xf] %v4601_v7  ;;  %2669 = vst [vmem:[%s5949_s13 + $0x4] sm:$0xf] %v4604_v53  ;;  %v2300_v33 = vadd.f32 %v2284_v35, %v2268_v52  ;;  %v2542_v50 = vmul.f32 %v2512_v23, %v6566_v63 }
 0x3c0   : > { %v4603_v2 = vpack.c.bf16 %v2300_v33, %v2300_v33  ;;  %v2574_v25 = vmul.f32 %v2542_v50, %v6596_v55 }
 0x3c1   : > { %v2514_v49 = vpop.permute.xlu1 %2513  ;;  %v2518_v30 = vpop.permute.xlu0 %2517 }
 0x3c2   : > { %2380 = vst [vmem:[%s5949_s13 + $0xf0] sm:$0xf] %v4603_v2  ;;  %v2590_v40 = vadd.f32 %v2574_v25, %v2558_v31  ;;  %v2543_v47 = vmul.f32 %v2514_v49, %v6566_v63  ;;  %v2545_v54 = vmul.f32 %v2518_v30, %v6566_v63 }
 0x3c4   : > { %v4605_v14 = vpack.c.bf16 %v2590_v40, %v2590_v40  ;;  %v2575_v5 = vmul.f32 %v2543_v47, %v6617_v27  ;;  %v2577_v52 = vmul.f32 %v2545_v54, %v6620_v29 }
 0x3c5   : > { %v2516_v7 = vpop.permute.xlu1 %2515  ;;  %v2522_v53 = vpop.permute.xlu0 %2521 }
 0x3c6   : > { %2670 = vst [vmem:[%s5949_s13 + $0x14] sm:$0xf] %v4605_v14  ;;  %v2591_v35 = vadd.f32 %v2575_v5, %v2559_v41  ;;  %v2593_v23 = vadd.f32 %v2577_v52, %v2561_v36  ;;  %v2544_v33 = vmul.f32 %v2516_v7, %v6566_v63  ;;  %v2547_v50 = vmul.f32 %v2522_v53, %v6566_v63 }
 0x3c7   : > { %v2565_v36 = vmul.f32 %v6479_v20, %v6662_v58  ;;  %v2564_v20 = vmul.f32 %v6486_v1, %v6681_v37 }
 0x3c8   : > { %v4606_v31 = vpack.c.bf16 %v2591_v35, %v2591_v35  ;;  %v4608_v2 = vpack.c.bf16 %v2593_v23, %v2593_v23  ;;  %v2576_v25 = vmul.f32 %v2544_v33, %v6644_v13  ;;  %v2579_v49 = vmul.f32 %v2547_v50, %v6647_v19 }
 0x3c9   : > { %v2520_v30 = vpop.permute.xlu1 %2519  ;;  %v2526_v40 = vpop.permute.xlu0 %2525 }
 0x3ca   : > { %2671 = vst [vmem:[%s5949_s13 + $0x24] sm:$0xf] %v4606_v31  ;;  %2673 = vst [vmem:[%s5949_s13 + $0x44] sm:$0xf] %v4608_v2  ;;  %v2592_v47 = vadd.f32 %v2576_v25, %v2560_v22  ;;  %v2595_v54 = vadd.f32 %v2579_v49, %v2563_v39  ;;  %v2546_v41 = vmul.f32 %v2520_v30, %v6566_v63 }
 0x3cb   : > { %v2549_v51 = vmul.f32 %v2526_v40, %v6566_v63  ;;  %v2567_v22 = vmul.f32 %v6491_v10, %v6684_v15  ;;  %v2566_v10 = vmul.f32 %v6498_v16, %v6703_v45 }
 0x3cc   : > { %v4607_v14 = vpack.c.bf16 %v2592_v47, %v2592_v47  ;;  %v4610_v5 = vpack.c.bf16 %v2595_v54, %v2595_v54  ;;  %v2578_v52 = vmul.f32 %v2546_v41, %v6667_v17  ;;  %v2569_v41 = vmul.f32 %v6503_v56, %v6706_v34 }
 0x3cd   : > { %v2581_v7 = vmul.f32 %v2549_v51, %v6670_v12  ;;  %v2524_v53 = vpop.permute.xlu1 %2523  ;;  %v2530_v35 = vpop.permute.xlu0 %2529  ;;  %v2568_v56 = vmul.f32 %v6510_v24, %v6725_v9  ;;  %v8201_v24 = vld [vmem:[#allocation31_spill] sm:$0xff] }
 0x3ce   : > { %2672 = vst [vmem:[%s5949_s13 + $0x34] sm:$0xf] %v4607_v14  ;;  %2675 = vst [vmem:[%s5949_s13 + $0x64] sm:$0xf] %v4610_v5  ;;  %v2594_v23 = vadd.f32 %v2578_v52, %v2562_v43  ;;  %v2548_v50 = vmul.f32 %v2524_v53, %v6566_v63  ;;  %v2551_v59 = vmul.f32 %v2530_v35, %v6566_v63 }
 0x3cf   : > { %v2597_v33 = vadd.f32 %v2581_v7, %v2565_v36 }
 0x3d0   : > { %v4609_v39 = vpack.c.bf16 %v2594_v23, %v2594_v23  ;;  %v2580_v2 = vmul.f32 %v2548_v50, %v6689_v46  ;;  %v2583_v25 = vmul.f32 %v2551_v59, %v6692_v21  ;;  %v2571_v23 = vmul.f32 %v6515_v60, %v6728_v38 }
 0x3d1   : > { %v4612_v31 = vpack.c.bf16 %v2597_v33, %v2597_v33  ;;  %v2528_v49 = vpop.permute.xlu1 %2527  ;;  %v2534_v30 = vpop.permute.xlu0 %2533  ;;  %v2570_v60 = vmul.f32 %v8201_v24, %v6747_v11  ;;  %v8203_v24 = vld [vmem:[#allocation33_spill] sm:$0xff] }
 0x3d2   : > { %2674 = vst [vmem:[%s5949_s13 + $0x54] sm:$0xf] %v4609_v39  ;;  %v2596_v40 = vadd.f32 %v2580_v2, %v2564_v20  ;;  %v2599_v47 = vadd.f32 %v2583_v25, %v2567_v22  ;;  %v2550_v54 = vmul.f32 %v2528_v49, %v6566_v63  ;;  %v2553_v1 = vmul.f32 %v2534_v30, %v6566_v63 }
 0x3d3   : > { %2677 = vst [vmem:[%s5949_s13 + $0x84] sm:$0xf] %v4612_v31 }
 0x3d4   : > { %v4611_v51 = vpack.c.bf16 %v2596_v40, %v2596_v40  ;;  %v4614_v43 = vpack.c.bf16 %v2599_v47, %v2599_v47  ;;  %v2582_v36 = vmul.f32 %v2550_v54, %v6711_v42  ;;  %v2585_v14 = vmul.f32 %v2553_v1, %v6714_v48  ;;  %v8202_v1 = vld [vmem:[#allocation32_spill] sm:$0xff] }
 0x3d5   : > { %v2532_v5 = vpop.permute.xlu1 %2531  ;;  %v2538_v52 = vpop.permute.xlu0 %2537 }
 0x3d6   : > { %2676 = vst [vmem:[%s5949_s13 + $0x74] sm:$0xf] %v4611_v51  ;;  %2679 = vst [vmem:[%s5949_s13 + $0xa4] sm:$0xf] %v4614_v43  ;;  %v2598_v7 = vadd.f32 %v2582_v36, %v2566_v10  ;;  %v2601_v53 = vadd.f32 %v2585_v14, %v2569_v41  ;;  %v2552_v35 = vmul.f32 %v2532_v5, %v6566_v63 }
 0x3d7   : > { %v2555_v16 = vmul.f32 %v2538_v52, %v6566_v63  ;;  %v2572_v10 = vmul.f32 %v8202_v1, %v6765_v0 }
 0x3d8   : > { %v4613_v33 = vpack.c.bf16 %v2598_v7, %v2598_v7  ;;  %v4616_v50 = vpack.c.bf16 %v2601_v53, %v2601_v53  ;;  %v2584_v59 = vmul.f32 %v2552_v35, %v6733_v4 }
 0x3d9   : > { %v2587_v20 = vmul.f32 %v2555_v16, %v6736_v28  ;;  %v2536_v22 = vpop.permute.xlu1 %2535 }
 0x3da   : > { %2678 = vst [vmem:[%s5949_s13 + $0x94] sm:$0xf] %v4613_v33  ;;  %2681 = vst [vmem:[%s5949_s13 + $0xc4] sm:$0xf] %v4616_v50  ;;  %v2600_v39 = vadd.f32 %v2584_v59, %v2568_v56  ;;  %v2554_v2 = vmul.f32 %v2536_v22, %v6566_v63 }
 0x3db   : > { %v2603_v31 = vadd.f32 %v2587_v20, %v2571_v23 }
 0x3dc   : > { %v4615_v25 = vpack.c.bf16 %v2600_v39, %v2600_v39  ;;  %v2586_v30 = vmul.f32 %v2554_v2, %v6752_v57 }
 0x3dd   : > { %v4618_v49 = vpack.c.bf16 %v2603_v31, %v2603_v31  ;;  %v2540_v40 = vpop.permute.xlu1 %2539 }
 0x3de   : > { %2680 = vst [vmem:[%s5949_s13 + $0xb4] sm:$0xf] %v4615_v25  ;;  %v2602_v47 = vadd.f32 %v2586_v30, %v2570_v60  ;;  %v2556_v54 = vmul.f32 %v2540_v40, %v6566_v63  ;;  %v6858_v30 = vld [vmem:[%s8182_s25] ss:$0 sm:$0xff] }
 0x3df   : > { %2683 = vst [vmem:[%s5949_s13 + $0xe4] sm:$0xf] %v4618_v49 }
 0x3e0   : > { %v4617_v41 = vpack.c.bf16 %v2602_v47, %v2602_v47  ;;  %v2588_v51 = vmul.f32 %v2556_v54, %v6768_v26 }
 0x3e2   : > { %2682 = vst [vmem:[%s5949_s13 + $0xd4] sm:$0xf] %v4617_v41  ;;  %v2604_v43 = vadd.f32 %v2588_v51, %v2572_v10 }
 0x3e4   : > { %v4619_v36 = vpack.c.bf16 %v2604_v43, %v2604_v43 }
 0x3e6   : > { %2684 = vst [vmem:[%s5949_s13 + $0xf4] sm:$0xf] %v4619_v36 }
 0x40f   : > { %v2702_v14 = vpop.xlane.xlu0 %2701 }
 0x410   : > { %v2733_v5 = vmul.f32 0.0078125, %v2702_v14 }
 0x412   : > { %v2749_v52 = vadd.f32 1e-06, %v2733_v5 }
 0x413   : > { %v2706_v7 = vpop.xlane.xlu0 %2705 }
 0x414   : > { %4959 = vrsqrt.f32 %v2749_v52  ;;  %v2735_v53 = vmul.f32 0.0078125, %v2706_v7 }
 0x416   : > { %v2751_v16 = vadd.f32 1e-06, %v2735_v53 }
 0x417   : > { %v2708_v35 = vpop.xlane.xlu0 %2707 }
 0x418   : > { %v2736_v56 = vmul.f32 0.0078125, %v2708_v35  ;;  %4961 = vrsqrt.f32 %v2751_v16 }
 0x41a   : > { %v2752_v39 = vadd.f32 1e-06, %v2736_v56 }
 0x41b   : > { %v2710_v23 = vpop.xlane.xlu0 %2709 }
 0x41c   : > { %v2737_v33 = vmul.f32 0.0078125, %v2710_v23  ;;  %v2704_v50 = vpop.xlane.xlu1 %2703 }
 0x41d   : > { %v2734_v59 = vmul.f32 0.0078125, %v2704_v50  ;;  %v8204_v50 = vld [vmem:[#allocation36_spill] sm:$0xff] }
 0x41e   : > { %v4960_v20 = vpop.eup %4959  ;;  %v2753_v22 = vadd.f32 1e-06, %v2737_v33 }
 0x41f   : > { %v2750_v31 = vadd.f32 1e-06, %v2734_v59  ;;  %v2714_v2 = vpop.xlane.xlu0 %2713  ;;  %v2781_v60 = vmul.f32 %v4960_v20, %v8203_v24  ;;  %v8206_v24 = vld [vmem:[#allocation34_spill] sm:$0xff] }
 0x420   : > { %4963 = vrsqrt.f32 %v2753_v22  ;;  %v2739_v25 = vmul.f32 0.0078125, %v2714_v2  ;;  %v2712_v49 = vpop.xlane.xlu1 %2711 }
 0x421   : > { %4965 = vrsqrt.f32 %v2750_v31  ;;  %v6861_v40 = vmul.f32 %v6858_v30, %v2781_v60  ;;  %v2738_v47 = vmul.f32 0.0078125, %v2712_v49 }
 0x422   : > { %v2755_v54 = vadd.f32 1e-06, %v2739_v25  ;;  %4967 = vrsqrt.f32 %v2752_v39  ;;  %v4962_v53 = vpop.eup %4961  ;;  %v8205_v39 = vld [vmem:[#allocation37_spill] sm:$0xff] }
 0x423   : > { %2813 = vrot.lane.b32.xlu0 %v6861_v40, %s5504_s7  ;;  %v2718_v1 = vpop.xlane.xlu0 %2717  ;;  %v2754_v10 = vadd.f32 1e-06, %v2738_v47  ;;  %v2783_v60 = vmul.f32 %v4962_v53, %v8206_v24 }
 0x424   : > { %4969 = vrsqrt.f32 %v2755_v54  ;;  %v2741_v41 = vmul.f32 0.0078125, %v2718_v1  ;;  %v2716_v51 = vpop.xlane.xlu1 %2715 }
 0x425   : > { %v2740_v43 = vmul.f32 0.0078125, %v2716_v51  ;;  %4971 = vrsqrt.f32 %v2754_v10  ;;  %v8207_v51 = vld [vmem:[#allocation38_spill] sm:$0xff] }
 0x426   : > { %v2757_v36 = vadd.f32 1e-06, %v2741_v41 }
 0x427   : > { %v2722_v14 = vpop.xlane.xlu0 %2721  ;;  %v2756_v5 = vadd.f32 1e-06, %v2740_v43 }
 0x428   : > { %4973 = vrsqrt.f32 %v2757_v36  ;;  %v2743_v52 = vmul.f32 0.0078125, %v2722_v14  ;;  %v2720_v7 = vpop.xlane.xlu1 %2719 }
 0x429   : > { %v2742_v35 = vmul.f32 0.0078125, %v2720_v7  ;;  %4975 = vrsqrt.f32 %v2756_v5  ;;  %v6880_v5 = vmul.f32 %v6858_v30, %v2783_v60  ;;  %v8208_v7 = vld [vmem:[#allocation35_spill] sm:$0xff] }
 0x42a   : > { %v4964_v16 = vpop.eup %4963  ;;  %v2759_v56 = vadd.f32 1e-06, %v2743_v52 }
 0x42b   : > { %v4966_v23 = vpop.eup %4965  ;;  %v2726_v33 = vpop.xlane.xlu0 %2725  ;;  %v2785_v59 = vmul.f32 %v4964_v16, %v8204_v50  ;;  %v2758_v20 = vadd.f32 1e-06, %v2742_v35  ;;  %v8209_v50 = vld [vmem:[#allocation40_spill] sm:$0xff] }
 0x42c   : > { %4977 = vrsqrt.f32 %v2759_v56  ;;  %v2745_v22 = vmul.f32 0.0078125, %v2726_v33  ;;  %v2782_v31 = vmul.f32 %v4966_v23, %v8205_v39  ;;  %v2724_v2 = vpop.xlane.xlu1 %2723  ;;  %v4968_v25 = vpop.eup %4967 }
 0x42d   : > { %v6869_v49 = vmul.f32 %v6858_v30, %v2785_v59  ;;  %v2744_v47 = vmul.f32 0.0078125, %v2724_v2  ;;  %4979 = vrsqrt.f32 %v2758_v20  ;;  %v2784_v53 = vmul.f32 %v4968_v25, %v8208_v7 }
 0x42e   : > { %v4970_v54 = vpop.eup %4969  ;;  %v2761_v1 = vadd.f32 1e-06, %v2745_v22  ;;  %v6872_v10 = vmul.f32 %v6858_v30, %v2782_v31  ;;  %v8210_v31 = vld [vmem:[#allocation39_spill] sm:$0xff] }
 0x42f   : > { %2821 = vrot.lane.b32.xlu0 %v6869_v49, %s5504_s7  ;;  %v2787_v43 = vmul.f32 %v4970_v54, %v8207_v51  ;;  %v2760_v36 = vadd.f32 1e-06, %v2744_v47  ;;  %v4972_v35 = vpop.eup %4971  ;;  %v6892_v22 = vmul.f32 %v6858_v30, %v2784_v53  ;;  %v8211_v54 = vld [vmem:[#allocation42_spill] sm:$0xff]  ;;  %v8213_v53 = vld [vmem:[#allocation44_spill] sm:$0xff] }
 0x430   : > { %v2730_v41 = vpop.xlane.xlu0 %2729  ;;  %4981 = vrsqrt.f32 %v2761_v1  ;;  %2815 = vrot.lane.b32.xlu1 %v6872_v10, %s5504_s7  ;;  %v2728_v52 = vpop.xlane.xlu1 %2727  ;;  %v2786_v2 = vmul.f32 %v4972_v35, %v8210_v31 }
 0x431   : > { %v2747_v14 = vmul.f32 0.0078125, %v2730_v41  ;;  %v6884_v16 = vmul.f32 %v6858_v30, %v2787_v43  ;;  %v2746_v56 = vmul.f32 0.0078125, %v2728_v52  ;;  %4983 = vrsqrt.f32 %v2760_v36  ;;  %v8212_v43 = vld [vmem:[#allocation41_spill] sm:$0xff] }
 0x432   : > { %v4974_v23 = vpop.eup %4973  ;;  %v6904_v51 = vmul.f32 %v6858_v30, %v2786_v2 }
 0x433   : > { %v2763_v33 = vadd.f32 1e-06, %v2747_v14  ;;  %2825 = vrot.lane.b32.xlu0 %v6884_v16, %s5504_s7  ;;  %v2789_v59 = vmul.f32 %v4974_v23, %v8209_v50  ;;  %v2762_v20 = vadd.f32 1e-06, %v2746_v56  ;;  %v4976_v24 = vpop.eup %4975  ;;  %v8214_v23 = vld [vmem:[#allocation43_spill] sm:$0xff] }
 0x434   : > { %2817 = vrot.lane.b32.xlu1 %v6880_v5, %s5504_s7  ;;  %v2732_v39 = vpop.xlane.xlu1 %2731  ;;  %v2788_v36 = vmul.f32 %v4976_v24, %v8212_v43  ;;  %v8216_v24 = vld [vmem:[#allocation45_spill] sm:$0xff] }
 0x435   : > { %4985 = vrsqrt.f32 %v2763_v33  ;;  %v6896_v60 = vmul.f32 %v6858_v30, %v2789_v59  ;;  %v2748_v25 = vmul.f32 0.0078125, %v2732_v39  ;;  %v8215_v39 = vld [vmem:[#allocation46_spill] sm:$0xff] }
 0x436   : > { %v4978_v47 = vpop.eup %4977  ;;  %4987 = vrsqrt.f32 %v2762_v20  ;;  %v6916_v56 = vmul.f32 %v6858_v30, %v2788_v36 }
 0x437   : > { %2829 = vrot.lane.b32.xlu0 %v6896_v60, %s5504_s7  ;;  %v2791_v1 = vmul.f32 %v4978_v47, %v8211_v54  ;;  %v2764_v41 = vadd.f32 1e-06, %v2748_v25  ;;  %v4980_v14 = vpop.eup %4979 }
 0x438   : > { %2819 = vrot.lane.b32.xlu1 %v6892_v22, %s5504_s7  ;;  %v2790_v33 = vmul.f32 %v4980_v14, %v8214_v23  ;;  %v6955_v23 = vld [vmem:[#allocation2 + $0x18] sm:$0xff] }
 0x439   : > { %v6908_v52 = vmul.f32 %v6858_v30, %v2791_v1  ;;  %4989 = vrsqrt.f32 %v2764_v41  ;;  %v8217_v41 = vld [vmem:[#allocation47_spill] sm:$0xff] }
 0x43a   : > { %v4982_v7 = vpop.eup %4981  ;;  %v6928_v2 = vmul.f32 %v6858_v30, %v2790_v33  ;;  %v2989_v33 = vmul.f32 %v6955_v23, %v6955_v23 }
 0x43b   : > { %2833 = vrot.lane.b32.xlu0 %v6908_v52, %s5504_s7  ;;  %v2793_v35 = vmul.f32 %v4982_v7, %v8213_v53  ;;  %v4984_v50 = vpop.eup %4983  ;;  %v8218_v7 = vld [vmem:[#allocation48_spill] sm:$0xff] }
 0x43c   : > { %2823 = vrot.lane.b32.xlu1 %v6904_v51, %s5504_s7  ;;  %v2792_v25 = vmul.f32 %v4984_v50, %v8216_v24  ;;  %v6959_v50 = vld [vmem:[#allocation2 + $0x98] sm:$0xff] }
 0x43d   : > { %v6920_v59 = vmul.f32 %v6858_v30, %v2793_v35  ;;  %8219 = vst [vmem:[#allocation31_spill] sm:$0xff] %v6959_v50  ;;  %v6967_v24 = vld [vmem:[#allocation2 + $0x118] sm:$0xff] }
 0x43e   : > { %v6939_v1 = vmul.f32 %v6858_v30, %v2792_v25  ;;  %v2993_v25 = vmul.f32 %v6967_v24, %v6967_v24 }
 0x43f   : > { %v4986_v20 = vpop.eup %4985  ;;  %2837 = vrot.lane.b32.xlu0 %v6920_v59, %s5504_s7 }
 0x440   : > { %v2795_v31 = vmul.f32 %v4986_v20, %v8215_v39  ;;  %2827 = vrot.lane.b32.xlu1 %v6916_v56, %s5504_s7  ;;  %v4988_v47 = vpop.eup %4987  ;;  %v2991_v20 = vmul.f32 %v6959_v50, %v6959_v50  ;;  %v6963_v39 = vld [vmem:[#allocation2 + $0xd8] sm:$0xff] }
 0x441   : > { %v2794_v43 = vmul.f32 %v4988_v47, %v8217_v41  ;;  %8220 = vst [vmem:[#allocation32_spill] sm:$0xff] %v6963_v39  ;;  %v6971_v47 = vld [vmem:[#allocation2 + $0x198] sm:$0xff] }
 0x442   : > { %v6932_v54 = vmul.f32 %v6858_v30, %v2795_v31  ;;  %v2992_v31 = vmul.f32 %v6963_v39, %v6963_v39  ;;  %8221 = vst [vmem:[#allocation33_spill] sm:$0xff] %v6971_v47  ;;  %v6973_v41 = vld [vmem:[#allocation2 + $0x58] sm:$0xff] }
 0x443   : > { %v4990_v36 = vpop.eup %4989  ;;  %v6945_v14 = vmul.f32 %v6858_v30, %v2794_v43  ;;  %8222 = vst [vmem:[#allocation36_spill] sm:$0xff] %v6973_v41  ;;  %v2995_v43 = vmul.f32 %v6971_v47, %v6971_v47  ;;  %v6993_v50 = vld [vmem:[#allocation2 + $0x318] sm:$0xff] }
 0x444   : > { %2841 = vrot.lane.b32.xlu0 %v6932_v54, %s5504_s7  ;;  %2831 = vrot.lane.b32.xlu1 %v6928_v2, %s5504_s7  ;;  %v2796_v53 = vmul.f32 %v4990_v36, %v8218_v7  ;;  %v6977_v36 = vld [vmem:[#allocation2 + $0x218] sm:$0xff]  ;;  %v2990_v7 = vmul.f32 %v6973_v41, %v6973_v41  ;;  %8227 = vst [vmem:[#allocation40_spill] sm:$0xff] %v6993_v50 }
 0x445   : > { %8223 = vst [vmem:[#allocation37_spill] sm:$0xff] %v6977_v36  ;;  %v6997_v41 = vld [vmem:[#allocation2 + $0x258] sm:$0xff] }
 0x446   : > { %v6951_v35 = vmul.f32 %v6858_v30, %v2796_v53  ;;  %v6981_v53 = vld [vmem:[#allocation2 + $0x158] sm:$0xff]  ;;  %8228 = vst [vmem:[#allocation39_spill] sm:$0xff] %v6997_v41 }
 0x447   : > { %8224 = vst [vmem:[#allocation34_spill] sm:$0xff] %v6981_v53 }
 0x448   : > { %2835 = vrot.lane.b32.xlu1 %v6939_v1, %s5504_s7 }
 0x44c   : > { %2839 = vrot.lane.b32.xlu1 %v6945_v14, %s5504_s7 }
 0x450   : > { %2843 = vrot.lane.b32.xlu1 %v6951_v35, %s5504_s7 }
 0x463   : > { %3005 = vadd.xlane.f32.xlu0 %v2989_v33  ;;  %v2997_v33 = vmul.f32 %v6977_v36, %v6977_v36  ;;  %v7001_v36 = vld [vmem:[#allocation2 + $0x398] sm:$0xff] }
 0x464   : > { %8229 = vst [vmem:[#allocation42_spill] sm:$0xff] %v7001_v36 }
 0x467   : > { %3009 = vadd.xlane.f32.xlu0 %v2991_v20  ;;  %v6985_v20 = vld [vmem:[#allocation2 + $0x298] sm:$0xff] }
 0x468   : > { %8225 = vst [vmem:[#allocation38_spill] sm:$0xff] %v6985_v20  ;;  %v2999_v39 = vmul.f32 %v6985_v20, %v6985_v20 }
 0x46b   : > { %3011 = vadd.xlane.f32.xlu0 %v2992_v31  ;;  %v2994_v31 = vmul.f32 %v6981_v53, %v6981_v53  ;;  %v7005_v53 = vld [vmem:[#allocation2 + $0x2d8] sm:$0xff] }
 0x46c   : > { %8230 = vst [vmem:[#allocation41_spill] sm:$0xff] %v7005_v53 }
 0x46f   : > { %3013 = vadd.xlane.f32.xlu0 %v2993_v25  ;;  %v6989_v25 = vld [vmem:[#allocation2 + $0x1d8] sm:$0xff] }
 0x470   : > { %8226 = vst [vmem:[#allocation35_spill] sm:$0xff] %v6989_v25 }
 0x473   : > { %3017 = vadd.xlane.f32.xlu0 %v2995_v43  ;;  %v2996_v43 = vmul.f32 %v6989_v25, %v6989_v25  ;;  %v7011_v25 = vld [vmem:[#allocation2 + $0x358] sm:$0xff] }
 0x474   : > { %3007 = vadd.xlane.f32.xlu1 %v2990_v7  ;;  %v3001_v7 = vmul.f32 %v6993_v50, %v6993_v50  ;;  %8231 = vst [vmem:[#allocation44_spill] sm:$0xff] %v7011_v25  ;;  %v7015_v50 = vld [vmem:[#allocation2 + $0x3d8] sm:$0xff] }
 0x475   : > { %8232 = vst [vmem:[#allocation43_spill] sm:$0xff] %v7015_v50 }
 0x477   : > { %3021 = vadd.xlane.f32.xlu0 %v2997_v33  ;;  %v2998_v33 = vmul.f32 %v6997_v41, %v6997_v41 }
 0x478   : > { %3015 = vadd.xlane.f32.xlu1 %v2994_v31  ;;  %v3003_v31 = vmul.f32 %v7001_v36, %v7001_v36 }
 0x47b   : > { %3025 = vadd.xlane.f32.xlu0 %v2999_v39  ;;  %v3000_v39 = vmul.f32 %v7005_v53, %v7005_v53  ;;  %v2861_v53 = vmul.f32 %v6861_v40, %v6575_v32  ;;  %v2862_v32 = vmul.f32 %v6872_v10, %v6593_v62  ;;  %v2863_v62 = vmul.f32 %v6880_v5, %v6608_v61 }
 0x47c   : > { %3019 = vadd.xlane.f32.xlu1 %v2996_v43  ;;  %v3002_v43 = vmul.f32 %v7011_v25, %v7011_v25 }
 0x47f   : > { %3029 = vadd.xlane.f32.xlu0 %v3001_v7  ;;  %v3004_v7 = vmul.f32 %v7015_v50, %v7015_v50 }
 0x480   : > { %3023 = vadd.xlane.f32.xlu1 %v2998_v33 }
 0x483   : > { %3033 = vadd.xlane.f32.xlu0 %v3003_v31 }
 0x484   : > { %3027 = vadd.xlane.f32.xlu1 %v3000_v39 }
 0x488   : > { %3031 = vadd.xlane.f32.xlu1 %v3002_v43 }
 0x48c   : > { %3035 = vadd.xlane.f32.xlu1 %v3004_v7  ;;  %v2865_v7 = vmul.f32 %v6869_v49, %v6614_v8  ;;  %v2867_v8 = vmul.f32 %v6884_v16, %v6637_v18 }
 0x495   : > { %v2814_v41 = vpop.permute.xlu0 %2813 }
 0x496   : > { %v2845_v33 = vmul.f32 %v2814_v41, %v6566_v63 }
 0x498   : > { %v2877_v36 = vmul.f32 %v2845_v33, %v6578_v3 }
 0x49a   : > { %v2893_v31 = vadd.f32 %v2877_v36, %v2861_v53 }
 0x49c   : > { %v4620_v39 = vpack.c.bf16 %v2893_v31, %v2893_v31 }
 0x49e   : > { %2973 = vst [vmem:[%s5949_s13 + $0x8] sm:$0xf] %v4620_v39 }
 0x4a1   : > { %v2822_v20 = vpop.permute.xlu0 %2821 }
 0x4a2   : > { %v2849_v25 = vmul.f32 %v2822_v20, %v6566_v63  ;;  %v2816_v47 = vpop.permute.xlu1 %2815 }
 0x4a3   : > { %v2846_v43 = vmul.f32 %v2816_v47, %v6566_v63 }
 0x4a4   : > { %v2881_v50 = vmul.f32 %v2849_v25, %v6620_v29 }
 0x4a5   : > { %v2878_v3 = vmul.f32 %v2846_v43, %v6596_v55  ;;  %v2826_v40 = vpop.permute.xlu0 %2825 }
 0x4a6   : > { %v2897_v41 = vadd.f32 %v2881_v50, %v2865_v7  ;;  %v2851_v36 = vmul.f32 %v2826_v40, %v6566_v63  ;;  %v2818_v53 = vpop.permute.xlu1 %2817 }
 0x4a7   : > { %v2894_v20 = vadd.f32 %v2878_v3, %v2862_v32  ;;  %v2847_v47 = vmul.f32 %v2818_v53, %v6566_v63 }
 0x4a8   : > { %v4624_v49 = vpack.c.bf16 %v2897_v41, %v2897_v41  ;;  %v2883_v29 = vmul.f32 %v2851_v36, %v6647_v19  ;;  %v2869_v19 = vmul.f32 %v6896_v60, %v6662_v58 }
 0x4a9   : > { %v4621_v10 = vpack.c.bf16 %v2894_v20, %v2894_v20  ;;  %v2879_v55 = vmul.f32 %v2847_v47, %v6617_v27  ;;  %v2830_v50 = vpop.permute.xlu0 %2829  ;;  %v2864_v27 = vmul.f32 %v6892_v22, %v6634_v6 }
 0x4aa   : > { %2977 = vst [vmem:[%s5949_s13 + $0x48] sm:$0xf] %v4624_v49  ;;  %v2899_v25 = vadd.f32 %v2883_v29, %v2867_v8  ;;  %v2853_v33 = vmul.f32 %v2830_v50, %v6566_v63  ;;  %v2820_v31 = vpop.permute.xlu1 %2819 }
 0x4ab   : > { %2974 = vst [vmem:[%s5949_s13 + $0x18] sm:$0xf] %v4621_v10  ;;  %v2895_v39 = vadd.f32 %v2879_v55, %v2863_v62  ;;  %v2848_v18 = vmul.f32 %v2820_v31, %v6566_v63 }
 0x4ac   : > { %v4626_v16 = vpack.c.bf16 %v2899_v25, %v2899_v25  ;;  %v2885_v61 = vmul.f32 %v2853_v33, %v6670_v12  ;;  %v2871_v12 = vmul.f32 %v6908_v52, %v6684_v15 }
 0x4ad   : > { %v4622_v5 = vpack.c.bf16 %v2895_v39, %v2895_v39  ;;  %v2880_v43 = vmul.f32 %v2848_v18, %v6644_v13  ;;  %v2834_v7 = vpop.permute.xlu0 %2833  ;;  %v2866_v13 = vmul.f32 %v6904_v51, %v6659_v44 }
 0x4ae   : > { %2979 = vst [vmem:[%s5949_s13 + $0x68] sm:$0xf] %v4626_v16  ;;  %v2901_v32 = vadd.f32 %v2885_v61, %v2869_v19  ;;  %v2855_v3 = vmul.f32 %v2834_v7, %v6566_v63  ;;  %v2824_v40 = vpop.permute.xlu1 %2823  ;;  %v2874_v61 = vmul.f32 %v6945_v14, %v6747_v11 }
 0x4af   : > { %2975 = vst [vmem:[%s5949_s13 + $0x28] sm:$0xf] %v4622_v5  ;;  %v2896_v41 = vadd.f32 %v2880_v43, %v2864_v27  ;;  %v2850_v58 = vmul.f32 %v2824_v40, %v6566_v63 }
 0x4b0   : > { %v4628_v60 = vpack.c.bf16 %v2901_v32, %v2901_v32  ;;  %v2887_v6 = vmul.f32 %v2855_v3, %v6692_v21  ;;  %v2873_v21 = vmul.f32 %v6920_v59, %v6706_v34 }
 0x4b1   : > { %v4623_v22 = vpack.c.bf16 %v2896_v41, %v2896_v41  ;;  %v2882_v36 = vmul.f32 %v2850_v58, %v6667_v17  ;;  %v2838_v53 = vpop.permute.xlu0 %2837  ;;  %v2868_v17 = vmul.f32 %v6916_v56, %v6681_v37 }
 0x4b2   : > { %2981 = vst [vmem:[%s5949_s13 + $0x88] sm:$0xf] %v4628_v60  ;;  %v2903_v20 = vadd.f32 %v2887_v6, %v2871_v12  ;;  %v2857_v47 = vmul.f32 %v2838_v53, %v6566_v63  ;;  %v2828_v8 = vpop.permute.xlu1 %2827 }
 0x4b3   : > { %2976 = vst [vmem:[%s5949_s13 + $0x38] sm:$0xf] %v4623_v22  ;;  %v2898_v49 = vadd.f32 %v2882_v36, %v2866_v13  ;;  %v2852_v15 = vmul.f32 %v2828_v8, %v6566_v63 }
 0x4b4   : > { %v4630_v52 = vpack.c.bf16 %v2903_v20, %v2903_v20  ;;  %v2889_v44 = vmul.f32 %v2857_v47, %v6714_v48  ;;  %v2875_v48 = vmul.f32 %v6932_v54, %v6728_v38  ;;  %v2872_v54 = vmul.f32 %v6939_v1, %v6725_v9 }
 0x4b5   : > { %v4625_v51 = vpack.c.bf16 %v2898_v49, %v2898_v49  ;;  %v2884_v29 = vmul.f32 %v2852_v15, %v6689_v46  ;;  %v2870_v46 = vmul.f32 %v6928_v2, %v6703_v45 }
 0x4b6   : > { %v2842_v62 = vpop.permute.xlu0 %2841  ;;  %2983 = vst [vmem:[%s5949_s13 + $0xa8] sm:$0xf] %v4630_v52  ;;  %v2905_v10 = vadd.f32 %v2889_v44, %v2873_v21  ;;  %v2832_v50 = vpop.permute.xlu1 %2831 }
 0x4b7   : > { %v2859_v55 = vmul.f32 %v2842_v62, %v6566_v63  ;;  %2978 = vst [vmem:[%s5949_s13 + $0x58] sm:$0xf] %v4625_v51  ;;  %v2900_v25 = vadd.f32 %v2884_v29, %v2868_v17  ;;  %v2854_v34 = vmul.f32 %v2832_v50, %v6566_v63 }
 0x4b8   : > { %v4632_v37 = vpack.c.bf16 %v2905_v10, %v2905_v10 }
 0x4b9   : > { %v2891_v56 = vmul.f32 %v2859_v55, %v6736_v28  ;;  %v4627_v59 = vpack.c.bf16 %v2900_v25, %v2900_v25  ;;  %v2886_v33 = vmul.f32 %v2854_v34, %v6711_v42 }
 0x4ba   : > { %2985 = vst [vmem:[%s5949_s13 + $0xc8] sm:$0xf] %v4632_v37  ;;  %v2836_v39 = vpop.permute.xlu1 %2835 }
 0x4bb   : > { %v2907_v31 = vadd.f32 %v2891_v56, %v2875_v48  ;;  %2980 = vst [vmem:[%s5949_s13 + $0x78] sm:$0xf] %v4627_v59  ;;  %v2902_v18 = vadd.f32 %v2886_v33, %v2870_v46  ;;  %v2856_v19 = vmul.f32 %v2836_v39, %v6566_v63 }
 0x4bd   : > { %v4634_v38 = vpack.c.bf16 %v2907_v31, %v2907_v31  ;;  %v4629_v28 = vpack.c.bf16 %v2902_v18, %v2902_v18  ;;  %v2888_v16 = vmul.f32 %v2856_v19, %v6733_v4  ;;  %v2876_v4 = vmul.f32 %v6951_v35, %v6765_v0 }
 0x4be   : > { %v2840_v45 = vpop.permute.xlu1 %2839 }
 0x4bf   : > { %2987 = vst [vmem:[%s5949_s13 + $0xe8] sm:$0xf] %v4634_v38  ;;  %2982 = vst [vmem:[%s5949_s13 + $0x98] sm:$0xf] %v4629_v28  ;;  %v2904_v42 = vadd.f32 %v2888_v16, %v2872_v54  ;;  %v2858_v2 = vmul.f32 %v2840_v45, %v6566_v63  ;;  %v8233_v54 = vld [vmem:[#allocation33_spill] sm:$0xff] }
 0x4c1   : > { %v4631_v27 = vpack.c.bf16 %v2904_v42, %v2904_v42  ;;  %v2890_v5 = vmul.f32 %v2858_v2, %v6752_v57 }
 0x4c2   : > { %v2844_v43 = vpop.permute.xlu1 %2843 }
 0x4c3   : > { %2984 = vst [vmem:[%s5949_s13 + $0xb8] sm:$0xf] %v4631_v27  ;;  %v2906_v9 = vadd.f32 %v2890_v5, %v2874_v61  ;;  %v2860_v1 = vmul.f32 %v2844_v43, %v6566_v63  ;;  %v8234_v61 = vld [vmem:[#allocation36_spill] sm:$0xff]  ;;  %v8235_v43 = vld [vmem:[#allocation31_spill] sm:$0xff] }
 0x4c5   : > { %v4633_v7 = vpack.c.bf16 %v2906_v9, %v2906_v9  ;;  %v2892_v32 = vmul.f32 %v2860_v1, %v6768_v26 }
 0x4c7   : > { %2986 = vst [vmem:[%s5949_s13 + $0xd8] sm:$0xf] %v4633_v7  ;;  %v2908_v3 = vadd.f32 %v2892_v32, %v2876_v4 }
 0x4c9   : > { %v4635_v40 = vpack.c.bf16 %v2908_v3, %v2908_v3  ;;  %v8236_v3 = vld [vmem:[#allocation37_spill] sm:$0xff] }
 0x4cb   : > { %2988 = vst [vmem:[%s5949_s13 + $0xf8] sm:$0xf] %v4635_v40 }
 0x4f0   : > { %v3006_v41 = vpop.xlane.xlu0 %3005 }
 0x4f1   : > { %v3037_v11 = vmul.f32 0.0078125, %v3006_v41 }
 0x4f3   : > { %v3053_v14 = vadd.f32 1e-06, %v3037_v11 }
 0x4f4   : > { %v3010_v58 = vpop.xlane.xlu0 %3009 }
 0x4f5   : > { %4991 = vrsqrt.f32 %v3053_v14  ;;  %v3039_v12 = vmul.f32 0.0078125, %v3010_v58 }
 0x4f7   : > { %v3055_v36 = vadd.f32 1e-06, %v3039_v12  ;;  %v8237_v12 = vld [vmem:[#allocation32_spill] sm:$0xff] }
 0x4f8   : > { %v3012_v57 = vpop.xlane.xlu0 %3011 }
 0x4f9   : > { %v3040_v0 = vmul.f32 0.0078125, %v3012_v57 }
 0x4fb   : > { %v3056_v15 = vadd.f32 1e-06, %v3040_v0 }
 0x4fc   : > { %v3014_v60 = vpop.xlane.xlu0 %3013 }
 0x4fd   : > { %v3041_v6 = vmul.f32 0.0078125, %v3014_v60 }
 0x4ff   : > { %v4992_v13 = vpop.eup %4991  ;;  %v3057_v22 = vadd.f32 1e-06, %v3041_v6 }
 0x500   : > { %v3018_v35 = vpop.xlane.xlu0 %3017  ;;  %v3085_v26 = vmul.f32 %v4992_v13, %v6955_v23 }
 0x501   : > { %4993 = vrsqrt.f32 %v3057_v22  ;;  %v3043_v53 = vmul.f32 0.0078125, %v3018_v35  ;;  %v3008_v20 = vpop.xlane.xlu1 %3007  ;;  %v8238_v22 = vld [vmem:[#allocation38_spill] sm:$0xff] }
 0x502   : > { %v7101_v47 = vmul.f32 %v6858_v30, %v3085_v26  ;;  %v3038_v49 = vmul.f32 0.0078125, %v3008_v20  ;;  %4995 = vrsqrt.f32 %v3055_v36 }
 0x503   : > { %v3059_v8 = vadd.f32 1e-06, %v3043_v53 }
 0x504   : > { %3117 = vrot.lane.b32.xlu0 %v7101_v47, %s5504_s7  ;;  %v3022_v21 = vpop.xlane.xlu0 %3021  ;;  %v3054_v52 = vadd.f32 1e-06, %v3038_v49 }
 0x505   : > { %4997 = vrsqrt.f32 %v3059_v8  ;;  %v3045_v44 = vmul.f32 0.0078125, %v3022_v21  ;;  %v3016_v17 = vpop.xlane.xlu1 %3015  ;;  %v8239_v8 = vld [vmem:[#allocation34_spill] sm:$0xff] }
 0x506   : > { %4999 = vrsqrt.f32 %v3054_v52  ;;  %v3042_v51 = vmul.f32 0.0078125, %v3016_v17  ;;  %v8240_v52 = vld [vmem:[#allocation40_spill] sm:$0xff] }
 0x507   : > { %v3061_v23 = vadd.f32 1e-06, %v3045_v44  ;;  %5001 = vrsqrt.f32 %v3056_v15 }
 0x508   : > { %v3026_v29 = vpop.xlane.xlu0 %3025  ;;  %v3058_v10 = vadd.f32 1e-06, %v3042_v51 }
 0x509   : > { %5003 = vrsqrt.f32 %v3061_v23  ;;  %v3047_v62 = vmul.f32 0.0078125, %v3026_v29  ;;  %v3020_v55 = vpop.xlane.xlu1 %3019 }
 0x50a   : > { %v3044_v34 = vmul.f32 0.0078125, %v3020_v55  ;;  %5005 = vrsqrt.f32 %v3058_v10 }
 0x50b   : > { %v4994_v50 = vpop.eup %4993  ;;  %v3063_v25 = vadd.f32 1e-06, %v3047_v62  ;;  %v8241_v62 = vld [vmem:[#allocation35_spill] sm:$0xff] }
 0x50c   : > { %v3030_v48 = vpop.xlane.xlu0 %3029  ;;  %v3089_v37 = vmul.f32 %v4994_v50, %v6967_v24  ;;  %v3060_v46 = vadd.f32 1e-06, %v3044_v34  ;;  %v4996_v59 = vpop.eup %4995  ;;  %v8242_v50 = vld [vmem:[#allocation42_spill] sm:$0xff] }
 0x50d   : > { %5007 = vrsqrt.f32 %v3063_v25  ;;  %v3049_v56 = vmul.f32 0.0078125, %v3030_v48  ;;  %v3024_v31 = vpop.xlane.xlu1 %3023  ;;  %v3087_v9 = vmul.f32 %v4996_v59, %v8235_v43 }
 0x50e   : > { %v7107_v33 = vmul.f32 %v6858_v30, %v3089_v37  ;;  %v3046_v19 = vmul.f32 0.0078125, %v3024_v31  ;;  %5009 = vrsqrt.f32 %v3060_v46  ;;  %v8243_v37 = vld [vmem:[#allocation39_spill] sm:$0xff]  ;;  %v8244_v31 = vld [vmem:[#allocation41_spill] sm:$0xff] }
 0x50f   : > { %v4998_v39 = vpop.eup %4997  ;;  %v3065_v18 = vadd.f32 1e-06, %v3049_v56  ;;  %v7129_v58 = vmul.f32 %v6858_v30, %v3087_v9  ;;  %v7203_v9 = vld [vmem:[#allocation2 + $0xe0] sm:$0xff] }
 0x510   : > { %3125 = vrot.lane.b32.xlu0 %v7107_v33, %s5504_s7  ;;  %v3034_v38 = vpop.xlane.xlu0 %3033  ;;  %v3091_v28 = vmul.f32 %v4998_v39, %v8233_v54  ;;  %v5000_v16 = vpop.eup %4999  ;;  %v3062_v45 = vadd.f32 1e-06, %v3046_v19 }
 0x511   : > { %5011 = vrsqrt.f32 %v3065_v18  ;;  %v3051_v24 = vmul.f32 0.0078125, %v3034_v38  ;;  %v5002_v42 = vpop.eup %5001  ;;  %v3086_v27 = vmul.f32 %v5000_v16, %v8234_v61  ;;  %v3028_v5 = vpop.xlane.xlu1 %3027  ;;  %v8245_v38 = vld [vmem:[#allocation44_spill] sm:$0xff]  ;;  %v7195_v61 = vld [vmem:[#allocation2 + $0x20] sm:$0xff] }
 0x512   : > { %v7113_v2 = vmul.f32 %v6858_v30, %v3091_v28  ;;  %v3048_v7 = vmul.f32 0.0078125, %v3028_v5  ;;  %5013 = vrsqrt.f32 %v3062_v45  ;;  %v3088_v60 = vmul.f32 %v5002_v42, %v8237_v12  ;;  %v7199_v5 = vld [vmem:[#allocation2 + $0xa0] sm:$0xff] }
 0x513   : > { %v5004_v1 = vpop.eup %5003  ;;  %v3067_v4 = vadd.f32 1e-06, %v3051_v24  ;;  %v7120_v32 = vmul.f32 %v6858_v30, %v3086_v27  ;;  %v8246_v24 = vld [vmem:[#allocation43_spill] sm:$0xff]  ;;  %v3293_v27 = vmul.f32 %v7195_v61, %v7195_v61  ;;  %v3295_v43 = vmul.f32 %v7199_v5, %v7199_v5 }
 0x514   : > { %3129 = vrot.lane.b32.xlu0 %v7113_v2, %s5504_s7  ;;  %v3093_v40 = vmul.f32 %v5004_v1, %v8236_v3  ;;  %v3064_v41 = vadd.f32 1e-06, %v3048_v7  ;;  %v5006_v11 = vpop.eup %5005  ;;  %v7141_v53 = vmul.f32 %v6858_v30, %v3088_v60  ;;  %v7207_v1 = vld [vmem:[#allocation2 + $0x120] sm:$0xff] }
 0x515   : > { %5015 = vrsqrt.f32 %v3067_v4  ;;  %3119 = vrot.lane.b32.xlu1 %v7120_v32, %s5504_s7  ;;  %v3032_v57 = vpop.xlane.xlu1 %3031  ;;  %v3090_v49 = vmul.f32 %v5006_v11, %v8239_v8  ;;  %v3297_v4 = vmul.f32 %v7207_v1, %v7207_v1  ;;  %v7211_v7 = vld [vmem:[#allocation2 + $0x1a0] sm:$0xff] }
 0x516   : > { %v7126_v14 = vmul.f32 %v6858_v30, %v3093_v40  ;;  %v3050_v13 = vmul.f32 0.0078125, %v3032_v57  ;;  %5017 = vrsqrt.f32 %v3064_v41  ;;  %v3299_v3 = vmul.f32 %v7211_v7, %v7211_v7  ;;  %v7215_v40 = vld [vmem:[#allocation2 + $0x220] sm:$0xff] }
 0x517   : > { %v5008_v6 = vpop.eup %5007  ;;  %v7153_v29 = vmul.f32 %v6858_v30, %v3090_v49  ;;  %v3301_v41 = vmul.f32 %v7215_v40, %v7215_v40  ;;  %v7219_v11 = vld [vmem:[#allocation2 + $0x60] sm:$0xff] }
 0x518   : > { %3133 = vrot.lane.b32.xlu0 %v7126_v14, %s5504_s7  ;;  %v3095_v36 = vmul.f32 %v5008_v6, %v8238_v22  ;;  %v3066_v0 = vadd.f32 1e-06, %v3050_v13  ;;  %v5010_v35 = vpop.eup %5009  ;;  %v7221_v57 = vld [vmem:[#allocation2 + $0x2a0] sm:$0xff]  ;;  %v3294_v12 = vmul.f32 %v7219_v11, %v7219_v11 }
 0x519   : > { %3121 = vrot.lane.b32.xlu1 %v7129_v58, %s5504_s7  ;;  %v3036_v20 = vpop.xlane.xlu1 %3035  ;;  %v3092_v10 = vmul.f32 %v5010_v35, %v8241_v62  ;;  %v3303_v60 = vmul.f32 %v7221_v57, %v7221_v57  ;;  %v7227_v6 = vld [vmem:[#allocation2 + $0x160] sm:$0xff] }
 0x51a   : > { %v7138_v26 = vmul.f32 %v6858_v30, %v3095_v36  ;;  %v3052_v21 = vmul.f32 0.0078125, %v3036_v20  ;;  %5019 = vrsqrt.f32 %v3066_v0  ;;  %v7229_v13 = vld [vmem:[#allocation2 + $0x320] sm:$0xff]  ;;  %v3298_v22 = vmul.f32 %v7227_v6, %v7227_v6 }
 0x51b   : > { %v5012_v15 = vpop.eup %5011  ;;  %v7165_v48 = vmul.f32 %v6858_v30, %v3092_v10  ;;  %v3305_v36 = vmul.f32 %v7229_v13, %v7229_v13  ;;  %v7235_v0 = vld [vmem:[#allocation2 + $0x1e0] sm:$0xff] }
 0x51c   : > { %3137 = vrot.lane.b32.xlu0 %v7138_v26, %s5504_s7  ;;  %v3097_v44 = vmul.f32 %v5012_v15, %v8240_v52  ;;  %v3068_v17 = vadd.f32 1e-06, %v3052_v21  ;;  %v5014_v23 = vpop.eup %5013  ;;  %v7237_v35 = vld [vmem:[#allocation2 + $0x3a0] sm:$0xff]  ;;  %v3300_v20 = vmul.f32 %v7235_v0, %v7235_v0  ;;  %v7245_v15 = vld [vmem:[#allocation2 + $0x28] sm:$0xff] }
 0x51d   : > { %3123 = vrot.lane.b32.xlu1 %v7141_v53, %s5504_s7  ;;  %v3094_v56 = vmul.f32 %v5014_v23, %v8243_v37  ;;  %v3307_v8 = vmul.f32 %v7237_v35, %v7237_v35  ;;  %v7243_v49 = vld [vmem:[#allocation2 + $0x260] sm:$0xff]  ;;  %v3683_v52 = vmul.f32 %v7245_v15, %v7245_v15 }
 0x51e   : > { %v7150_v51 = vmul.f32 %v6858_v30, %v3097_v44  ;;  %5021 = vrsqrt.f32 %v3068_v17  ;;  %v3302_v21 = vmul.f32 %v7243_v49, %v7243_v49  ;;  %v7251_v44 = vld [vmem:[#allocation2 + $0x2e0] sm:$0xff]  ;;  %v7253_v17 = vld [vmem:[#allocation2 + $0xa8] sm:$0xff] }
 0x51f   : > { %v5016_v55 = vpop.eup %5015  ;;  %v7173_v59 = vmul.f32 %v6858_v30, %v3094_v56  ;;  %v3304_v23 = vmul.f32 %v7251_v44, %v7251_v44  ;;  %v3685_v62 = vmul.f32 %v7253_v17, %v7253_v17  ;;  %v7259_v10 = vld [vmem:[#allocation2 + $0x360] sm:$0xff]  ;;  %v7269_v56 = vld [vmem:[#allocation2 + $0x1a8] sm:$0xff] }
 0x520   : > { %3141 = vrot.lane.b32.xlu0 %v7150_v51, %s5504_s7  ;;  %v3099_v25 = vmul.f32 %v5016_v55, %v8242_v50  ;;  %v5018_v46 = vpop.eup %5017  ;;  %v7261_v55 = vld [vmem:[#allocation2 + $0x128] sm:$0xff]  ;;  %v3306_v50 = vmul.f32 %v7259_v10, %v7259_v10  ;;  %v7267_v37 = vld [vmem:[#allocation2 + $0x3e0] sm:$0xff] }
 0x521   : > { %3127 = vrot.lane.b32.xlu1 %v7153_v29, %s5504_s7  ;;  %v3096_v39 = vmul.f32 %v5018_v46, %v8244_v31  ;;  %v3308_v46 = vmul.f32 %v7267_v37, %v7267_v37  ;;  %v3689_v31 = vmul.f32 %v7269_v56, %v7269_v56 }
 0x522   : > { %v7162_v34 = vmul.f32 %v6858_v30, %v3099_v25  ;;  %v3687_v25 = vmul.f32 %v7261_v55, %v7261_v55 }
 0x523   : > { %v7179_v19 = vmul.f32 %v6858_v30, %v3096_v39  ;;  %v7275_v39 = vld [vmem:[#allocation2 + $0x68] sm:$0xff] }
 0x524   : > { %3145 = vrot.lane.b32.xlu0 %v7162_v34, %s5504_s7  ;;  %v5020_v18 = vpop.eup %5019 }
 0x525   : > { %3131 = vrot.lane.b32.xlu1 %v7165_v48, %s5504_s7  ;;  %v3098_v54 = vmul.f32 %v5020_v18, %v8245_v38  ;;  %v7277_v18 = vld [vmem:[#allocation2 + $0x228] sm:$0xff]  ;;  %v3684_v38 = vmul.f32 %v7275_v39, %v7275_v39 }
 0x527   : > { %v7185_v16 = vmul.f32 %v6858_v30, %v3098_v54  ;;  %v3691_v54 = vmul.f32 %v7277_v18, %v7277_v18 }
 0x528   : > { %v5022_v28 = vpop.eup %5021 }
 0x529   : > { %3135 = vrot.lane.b32.xlu1 %v7173_v59, %s5504_s7  ;;  %v3100_v45 = vmul.f32 %v5022_v28, %v8246_v24  ;;  %v7283_v28 = vld [vmem:[#allocation2 + $0xe8] sm:$0xff] }
 0x52a   : > { %v7285_v24 = vld [vmem:[#allocation2 + $0x2a8] sm:$0xff] }
 0x52b   : > { %v7191_v42 = vmul.f32 %v6858_v30, %v3100_v45  ;;  %v3296_v30 = vmul.f32 %v7203_v9, %v7203_v9 }
 0x52d   : > { %3139 = vrot.lane.b32.xlu1 %v7179_v19, %s5504_s7 }
 0x531   : > { %3143 = vrot.lane.b32.xlu1 %v7185_v16, %s5504_s7 }
 0x535   : > { %3147 = vrot.lane.b32.xlu1 %v7191_v42, %s5504_s7 }
 0x543   : > { %3309 = vadd.xlane.f32.xlu0 %v3293_v27  ;;  %v3686_v27 = vmul.f32 %v7283_v28, %v7283_v28 }
 0x547   : > { %3313 = vadd.xlane.f32.xlu0 %v3295_v43 }
 0x54b   : > { %3315 = vadd.xlane.f32.xlu0 %v3296_v30  ;;  %v3693_v30 = vmul.f32 %v7285_v24, %v7285_v24 }
 0x54f   : > { %3317 = vadd.xlane.f32.xlu0 %v3297_v4  ;;  %v7292_v4 = vld [vmem:[#allocation2 + $0x168] sm:$0xff] }
 0x553   : > { %3321 = vadd.xlane.f32.xlu0 %v3299_v3  ;;  %v7294_v3 = vld [vmem:[#allocation2 + $0x328] sm:$0xff] }
 0x557   : > { %3325 = vadd.xlane.f32.xlu0 %v3301_v41  ;;  %v7297_v41 = vld [vmem:[%s5935_s11] sm:$0xff] }
 0x559   : > { %3311 = vadd.xlane.f32.xlu1 %v3294_v12  ;;  %v3165_v12 = vmul.f32 %v7297_v41, %v7101_v47 }
 0x55b   : > { %3329 = vadd.xlane.f32.xlu0 %v3303_v60  ;;  %v7302_v60 = vld [vmem:[%s5942_s8] sm:$0xff] }
 0x55d   : > { %3319 = vadd.xlane.f32.xlu1 %v3298_v22 }
 0x55f   : > { %3333 = vadd.xlane.f32.xlu0 %v3305_v36  ;;  %v3688_v36 = vmul.f32 %v7292_v4, %v7292_v4 }
 0x561   : > { %3323 = vadd.xlane.f32.xlu1 %v3300_v20 }
 0x563   : > { %3337 = vadd.xlane.f32.xlu0 %v3307_v8  ;;  %v3695_v8 = vmul.f32 %v7294_v3, %v7294_v3 }
 0x565   : > { %3327 = vadd.xlane.f32.xlu1 %v3302_v21  ;;  %v7309_v21 = vld [vmem:[#allocation2 + $0x1e8] sm:$0xff] }
 0x567   : > { %3699 = vadd.xlane.f32.xlu0 %v3683_v52  ;;  %v7311_v52 = vld [vmem:[#allocation2 + $0x3a8] sm:$0xff] }
 0x569   : > { %3331 = vadd.xlane.f32.xlu1 %v3304_v23  ;;  %v3690_v23 = vmul.f32 %v7309_v21, %v7309_v21 }
 0x56b   : > { %3703 = vadd.xlane.f32.xlu0 %v3685_v62  ;;  %v3697_v62 = vmul.f32 %v7311_v52, %v7311_v52 }
 0x56d   : > { %3335 = vadd.xlane.f32.xlu1 %v3306_v50  ;;  %v7318_v50 = vld [vmem:[#allocation2 + $0x268] sm:$0xff] }
 0x56f   : > { %3707 = vadd.xlane.f32.xlu0 %v3687_v25 }
 0x571   : > { %3339 = vadd.xlane.f32.xlu1 %v3308_v46  ;;  %v3692_v46 = vmul.f32 %v7318_v50, %v7318_v50 }
 0x573   : > { %3711 = vadd.xlane.f32.xlu0 %v3689_v31 }
 0x575   : > { %3701 = vadd.xlane.f32.xlu1 %v3684_v38  ;;  %v7323_v38 = vld [vmem:[#allocation2 + $0x2e8] sm:$0xff] }
 0x576   : > { %v3118_v45 = vpop.permute.xlu0 %3117 }
 0x577   : > { %v3149_v43 = vmul.f32 %v3118_v45, %v6566_v63  ;;  %3715 = vadd.xlane.f32.xlu0 %v3691_v54  ;;  %v7326_v54 = vld [vmem:[%s5935_s11 + $0x20] sm:$0xff] }
 0x578   : > { %v3169_v45 = vmul.f32 %v7326_v54, %v7107_v33  ;;  %v7340_v33 = vld [vmem:[%s5935_s11 + $0x30] sm:$0xff] }
 0x579   : > { %v3181_v22 = vmul.f32 %v7302_v60, %v3149_v43  ;;  %3705 = vadd.xlane.f32.xlu1 %v3686_v27  ;;  %v7331_v27 = vld [vmem:[%s5942_s8 + $0x20] sm:$0xff]  ;;  %8248 = vst [vmem:[#allocation45_spill] sm:$0xff] %v7340_v33 }
 0x57a   : > { %8247 = vst [vmem:[#allocation46_spill] sm:$0xff] %v7331_v27 }
 0x57b   : > { %v3197_v20 = vadd.f32 %v3181_v22, %v3165_v12  ;;  %3719 = vadd.xlane.f32.xlu0 %v3693_v30  ;;  %v3694_v12 = vmul.f32 %v7323_v38, %v7323_v38 }
 0x57d   : > { %v4636_v47 = vpack.c.bf16 %v3197_v20, %v3197_v20  ;;  %3709 = vadd.xlane.f32.xlu1 %v3688_v36  ;;  %v7337_v20 = vld [vmem:[#allocation2 + $0x368] sm:$0xff] }
 0x57f   : > { %3277 = vst [vmem:[%s5949_s13 + $0xc] sm:$0xf] %v4636_v47  ;;  %3723 = vadd.xlane.f32.xlu0 %v3695_v8 }
 0x581   : > { %3713 = vadd.xlane.f32.xlu1 %v3690_v23  ;;  %v3171_v23 = vmul.f32 %v7340_v33, %v7113_v2 }
 0x582   : > { %v3126_v25 = vpop.permute.xlu0 %3125 }
 0x583   : > { %v3153_v31 = vmul.f32 %v3126_v25, %v6566_v63  ;;  %3727 = vadd.xlane.f32.xlu0 %v3697_v62  ;;  %v7345_v62 = vld [vmem:[%s5942_s8 + $0x30] sm:$0xff] }
 0x584   : > { %8249 = vst [vmem:[#allocation47_spill] sm:$0xff] %v7345_v62 }
 0x585   : > { %v3185_v43 = vmul.f32 %v7331_v27, %v3153_v31  ;;  %3717 = vadd.xlane.f32.xlu1 %v3692_v46 }
 0x586   : > { %v3130_v30 = vpop.permute.xlu0 %3129 }
 0x587   : > { %v3201_v22 = vadd.f32 %v3185_v43, %v3169_v45  ;;  %v3155_v36 = vmul.f32 %v3130_v30, %v6566_v63  ;;  %v3120_v8 = vpop.permute.xlu1 %3119  ;;  %v3696_v45 = vmul.f32 %v7337_v20, %v7337_v20  ;;  %v7353_v30 = vld [vmem:[%s5935_s11 + $0x8] sm:$0xff] }
 0x588   : > { %v3150_v46 = vmul.f32 %v3120_v8, %v6566_v63  ;;  %8250 = vst [vmem:[#allocation48_spill] sm:$0xff] %v7353_v30  ;;  %v3166_v2 = vmul.f32 %v7353_v30, %v7120_v32  ;;  %v7370_v32 = vld [vmem:[%s5942_s8 + $0x40] sm:$0xff] }
 0x589   : > { %v4640_v47 = vpack.c.bf16 %v3201_v22, %v3201_v22  ;;  %v3187_v25 = vmul.f32 %v7345_v62, %v3155_v36  ;;  %3721 = vadd.xlane.f32.xlu1 %v3694_v12  ;;  %v7358_v22 = vld [vmem:[%s5942_s8 + $0x8] sm:$0xff]  ;;  %v7365_v12 = vld [vmem:[%s5935_s11 + $0x40] sm:$0xff]  ;;  %8252 = vst [vmem:[#allocation36_spill] sm:$0xff] %v7370_v32 }
 0x58a   : > { %v3134_v31 = vpop.permute.xlu0 %3133  ;;  %8251 = vst [vmem:[#allocation33_spill] sm:$0xff] %v7358_v22  ;;  %v3182_v36 = vmul.f32 %v7358_v22, %v3150_v46  ;;  %v7362_v62 = vld [vmem:[#allocation2 + $0x3e8] sm:$0xff] }
 0x58b   : > { %3281 = vst [vmem:[%s5949_s13 + $0x4c] sm:$0xf] %v4640_v47  ;;  %v3203_v43 = vadd.f32 %v3187_v25, %v3171_v23  ;;  %v3157_v8 = vmul.f32 %v3134_v31, %v6566_v63  ;;  %v3173_v47 = vmul.f32 %v7365_v12, %v7126_v14  ;;  %v3122_v23 = vpop.permute.xlu1 %3121  ;;  %v7375_v31 = vld [vmem:[%s5935_s11 + $0x10] sm:$0xff]  ;;  %v3698_v14 = vmul.f32 %v7362_v62, %v7362_v62 }
 0x58c   : > { %v3198_v33 = vadd.f32 %v3182_v36, %v3166_v2  ;;  %v3151_v46 = vmul.f32 %v3122_v23, %v6566_v63  ;;  %8253 = vst [vmem:[#allocation31_spill] sm:$0xff] %v7375_v31  ;;  %v3167_v22 = vmul.f32 %v7375_v31, %v7129_v58  ;;  %v7383_v36 = vld [vmem:[%s5942_s8 + $0x10] sm:$0xff] }
 0x58d   : > { %v4642_v25 = vpack.c.bf16 %v3203_v43, %v3203_v43  ;;  %v3189_v30 = vmul.f32 %v7370_v32, %v3157_v8  ;;  %3725 = vadd.xlane.f32.xlu1 %v3696_v45  ;;  %8254 = vst [vmem:[#allocation37_spill] sm:$0xff] %v7383_v36  ;;  %v7388_v32 = vld [vmem:[%s5935_s11 + $0x50] sm:$0xff] }
 0x58e   : > { %v3138_v27 = vpop.permute.xlu0 %3137  ;;  %v4637_v43 = vpack.c.bf16 %v3198_v33, %v3198_v33  ;;  %v3183_v8 = vmul.f32 %v7383_v36, %v3151_v46  ;;  %v3175_v58 = vmul.f32 %v7388_v32, %v7138_v26  ;;  %v7394_v33 = vld [vmem:[%s5942_s8 + $0x50] sm:$0xff]  ;;  %v7399_v46 = vld [vmem:[%s5935_s11 + $0x18] sm:$0xff] }
 0x58f   : > { %3283 = vst [vmem:[%s5949_s13 + $0x6c] sm:$0xf] %v4642_v25  ;;  %v3205_v2 = vadd.f32 %v3189_v30, %v3173_v47  ;;  %v3159_v23 = vmul.f32 %v3138_v27, %v6566_v63  ;;  %v3124_v45 = vpop.permute.xlu1 %3123  ;;  %v3168_v27 = vmul.f32 %v7399_v46, %v7141_v53 }
 0x590   : > { %3278 = vst [vmem:[%s5949_s13 + $0x1c] sm:$0xf] %v4637_v43  ;;  %v3199_v25 = vadd.f32 %v3183_v8, %v3167_v22  ;;  %v3152_v47 = vmul.f32 %v3124_v45, %v6566_v63  ;;  %v7405_v22 = vld [vmem:[%s5942_s8 + $0x18] sm:$0xff] }
 0x591   : > { %v4644_v31 = vpack.c.bf16 %v3205_v2, %v3205_v2  ;;  %v3191_v30 = vmul.f32 %v7394_v33, %v3159_v23  ;;  %3729 = vadd.xlane.f32.xlu1 %v3698_v14  ;;  %8255 = vst [vmem:[#allocation32_spill] sm:$0xff] %v7405_v22  ;;  %v7410_v23 = vld [vmem:[%s5935_s11 + $0x60] sm:$0xff] }
 0x592   : > { %v3142_v36 = vpop.permute.xlu0 %3141  ;;  %v4638_v26 = vpack.c.bf16 %v3199_v25, %v3199_v25  ;;  %v3184_v2 = vmul.f32 %v7405_v22, %v3152_v47  ;;  %v3177_v45 = vmul.f32 %v7410_v23, %v7150_v51 }
 0x593   : > { %3285 = vst [vmem:[%s5949_s13 + $0x8c] sm:$0xf] %v4644_v31  ;;  %v3207_v43 = vadd.f32 %v3191_v30, %v3175_v58  ;;  %v3161_v8 = vmul.f32 %v3142_v36, %v6566_v63  ;;  %v3128_v53 = vpop.permute.xlu1 %3127  ;;  %v7416_v58 = vld [vmem:[%s5942_s8 + $0x60] sm:$0xff]  ;;  %v7421_v36 = vld [vmem:[%s5935_s11 + $0x28] sm:$0xff] }
 0x594   : > { %3279 = vst [vmem:[%s5949_s13 + $0x2c] sm:$0xf] %v4638_v26  ;;  %v3200_v31 = vadd.f32 %v3184_v2, %v3168_v27  ;;  %v3154_v30 = vmul.f32 %v3128_v53, %v6566_v63  ;;  %8256 = vst [vmem:[#allocation38_spill] sm:$0xff] %v7421_v36  ;;  %v3170_v47 = vmul.f32 %v7421_v36, %v7153_v29  ;;  %v7427_v27 = vld [vmem:[%s5942_s8 + $0x28] sm:$0xff] }
 0x595   : > { %v4646_v14 = vpack.c.bf16 %v3207_v43, %v3207_v43  ;;  %v3193_v25 = vmul.f32 %v7416_v58, %v3161_v8  ;;  %8257 = vst [vmem:[#allocation34_spill] sm:$0xff] %v7427_v27  ;;  %v7432_v8 = vld [vmem:[%s5935_s11 + $0x70] sm:$0xff] }
 0x596   : > { %v3146_v22 = vpop.permute.xlu0 %3145  ;;  %v4639_v51 = vpack.c.bf16 %v3200_v31, %v3200_v31  ;;  %v3186_v43 = vmul.f32 %v7427_v27, %v3154_v30  ;;  %v3179_v53 = vmul.f32 %v7432_v8, %v7162_v34  ;;  %v7444_v27 = vld [vmem:[%s5935_s11 + $0x38] sm:$0xff] }
 0x597   : > { %3287 = vst [vmem:[%s5949_s13 + $0xac] sm:$0xf] %v4646_v14  ;;  %v3209_v26 = vadd.f32 %v3193_v25, %v3177_v45  ;;  %v3163_v2 = vmul.f32 %v3146_v22, %v6566_v63  ;;  %v3132_v29 = vpop.permute.xlu1 %3131  ;;  %v7438_v45 = vld [vmem:[%s5942_s8 + $0x70] sm:$0xff]  ;;  %8258 = vst [vmem:[#allocation40_spill] sm:$0xff] %v7444_v27  ;;  %v3172_v34 = vmul.f32 %v7444_v27, %v7165_v48 }
 0x598   : > { %3280 = vst [vmem:[%s5949_s13 + $0x3c] sm:$0xf] %v4639_v51  ;;  %v3202_v14 = vadd.f32 %v3186_v43, %v3170_v47  ;;  %v3156_v25 = vmul.f32 %v3132_v29, %v6566_v63  ;;  %v7449_v51 = vld [vmem:[%s5942_s8 + $0x38] sm:$0xff]  ;;  %v7456_v29 = vld [vmem:[%s5935_s11 + $0x48] sm:$0xff] }
 0x599   : > { %v4648_v36 = vpack.c.bf16 %v3209_v26, %v3209_v26  ;;  %v3195_v31 = vmul.f32 %v7438_v45, %v3163_v2  ;;  %8259 = vst [vmem:[#allocation35_spill] sm:$0xff] %v7449_v51  ;;  %8260 = vst [vmem:[#allocation42_spill] sm:$0xff] %v7456_v29  ;;  %v3174_v48 = vmul.f32 %v7456_v29, %v7173_v59 }
 0x59a   : > { %v4641_v22 = vpack.c.bf16 %v3202_v14, %v3202_v14  ;;  %v3188_v47 = vmul.f32 %v7449_v51, %v3156_v25  ;;  %v7461_v14 = vld [vmem:[%s5942_s8 + $0x48] sm:$0xff] }
 0x59b   : > { %3289 = vst [vmem:[%s5949_s13 + $0xcc] sm:$0xf] %v4648_v36  ;;  %v3211_v30 = vadd.f32 %v3195_v31, %v3179_v53  ;;  %v3136_v26 = vpop.permute.xlu1 %3135  ;;  %8261 = vst [vmem:[#allocation39_spill] sm:$0xff] %v7461_v14 }
 0x59c   : > { %3282 = vst [vmem:[%s5949_s13 + $0x5c] sm:$0xf] %v4641_v22  ;;  %v3204_v2 = vadd.f32 %v3188_v47, %v3172_v34  ;;  %v3158_v36 = vmul.f32 %v3136_v26, %v6566_v63  ;;  %v7467_v47 = vld [vmem:[%s5935_s11 + $0x58] sm:$0xff] }
 0x59d   : > { %v4650_v43 = vpack.c.bf16 %v3211_v30, %v3211_v30  ;;  %8262 = vst [vmem:[#allocation41_spill] sm:$0xff] %v7467_v47  ;;  %v3176_v26 = vmul.f32 %v7467_v47, %v7179_v19  ;;  %v7483_v19 = vld [vmem:[%s5942_s8 + $0x68] sm:$0xff] }
 0x59e   : > { %v4643_v53 = vpack.c.bf16 %v3204_v2, %v3204_v2  ;;  %v3190_v31 = vmul.f32 %v7461_v14, %v3158_v36  ;;  %8265 = vst [vmem:[#allocation49_spill] sm:$0xff] %v7483_v19 }
 0x59f   : > { %3291 = vst [vmem:[%s5949_s13 + $0xec] sm:$0xf] %v4650_v43  ;;  %v3140_v25 = vpop.permute.xlu1 %3139  ;;  %v7472_v43 = vld [vmem:[%s5942_s8 + $0x58] sm:$0xff] }
 0x5a0   : > { %3284 = vst [vmem:[%s5949_s13 + $0x7c] sm:$0xf] %v4643_v53  ;;  %v3206_v22 = vadd.f32 %v3190_v31, %v3174_v48  ;;  %v3160_v30 = vmul.f32 %v3140_v25, %v6566_v63  ;;  %8263 = vst [vmem:[#allocation44_spill] sm:$0xff] %v7472_v43  ;;  %v7478_v31 = vld [vmem:[%s5935_s11 + $0x68] sm:$0xff] }
 0x5a1   : > { %8264 = vst [vmem:[#allocation43_spill] sm:$0xff] %v7478_v31  ;;  %v3178_v25 = vmul.f32 %v7478_v31, %v7185_v16 }
 0x5a2   : > { %v4645_v34 = vpack.c.bf16 %v3206_v22, %v3206_v22  ;;  %v3192_v59 = vmul.f32 %v7472_v43, %v3160_v30 }
 0x5a3   : > { %v3144_v2 = vpop.permute.xlu1 %3143 }
 0x5a4   : > { %3286 = vst [vmem:[%s5949_s13 + $0x9c] sm:$0xf] %v4645_v34  ;;  %v3208_v36 = vadd.f32 %v3192_v59, %v3176_v26  ;;  %v3162_v53 = vmul.f32 %v3144_v2, %v6566_v63  ;;  %v7489_v59 = vld [vmem:[%s5935_s11 + $0x78] sm:$0xff] }
 0x5a5   : > { %8266 = vst [vmem:[#allocation50_spill] sm:$0xff] %v7489_v59  ;;  %v3180_v2 = vmul.f32 %v7489_v59, %v7191_v42  ;;  %v7502_v42 = vld [vmem:[%s8268_s20] ss:$0 sm:$0xff] }
 0x5a6   : > { %v4647_v48 = vpack.c.bf16 %v3208_v36, %v3208_v36  ;;  %v3194_v22 = vmul.f32 %v7483_v19, %v3162_v53  ;;  %v7494_v36 = vld [vmem:[%s5942_s8 + $0x78] sm:$0xff] }
 0x5a7   : > { %v3148_v47 = vpop.permute.xlu1 %3147  ;;  %8267 = vst [vmem:[#allocation51_spill] sm:$0xff] %v7494_v36 }
 0x5a8   : > { %3288 = vst [vmem:[%s5949_s13 + $0xbc] sm:$0xf] %v4647_v48  ;;  %v3210_v30 = vadd.f32 %v3194_v22, %v3178_v25  ;;  %v3164_v34 = vmul.f32 %v3148_v47, %v6566_v63 }
 0x5aa   : > { %v4649_v26 = vpack.c.bf16 %v3210_v30, %v3210_v30  ;;  %v3196_v43 = vmul.f32 %v7494_v36, %v3164_v34 }
 0x5ac   : > { %3290 = vst [vmem:[%s5949_s13 + $0xdc] sm:$0xf] %v4649_v26  ;;  %v3212_v16 = vadd.f32 %v3196_v43, %v3180_v2 }
 0x5ae   : > { %v4651_v31 = vpack.c.bf16 %v3212_v16, %v3212_v16 }
 0x5b0   : > { %3292 = vst [vmem:[%s5949_s13 + $0xfc] sm:$0xf] %v4651_v31 }
 0x5d0   : > { %v3310_v53 = vpop.xlane.xlu0 %3309 }
 0x5d1   : > { %v3341_v19 = vmul.f32 0.0078125, %v3310_v53 }
 0x5d3   : > { %v3357_v48 = vadd.f32 1e-06, %v3341_v19 }
 0x5d4   : > { %v3314_v25 = vpop.xlane.xlu0 %3313 }
 0x5d5   : > { %5023 = vrsqrt.f32 %v3357_v48  ;;  %v3343_v26 = vmul.f32 0.0078125, %v3314_v25 }
 0x5d7   : > { %v3359_v48 = vadd.f32 1e-06, %v3343_v26 }
 0x5d8   : > { %v3316_v47 = vpop.xlane.xlu0 %3315 }
 0x5dc   : > { %v3318_v22 = vpop.xlane.xlu0 %3317 }
 0x5dd   : > { %v3345_v30 = vmul.f32 0.0078125, %v3318_v22  ;;  %v3344_v22 = vmul.f32 0.0078125, %v3316_v47 }
 0x5df   : > { %v5024_v14 = vpop.eup %5023  ;;  %v3361_v29 = vadd.f32 1e-06, %v3345_v30 }
 0x5e0   : > { %v3322_v34 = vpop.xlane.xlu0 %3321  ;;  %v3389_v43 = vmul.f32 %v5024_v14, %v7195_v61 }
 0x5e1   : > { %5025 = vrsqrt.f32 %v3361_v29  ;;  %v3347_v31 = vmul.f32 0.0078125, %v3322_v34  ;;  %v3360_v29 = vadd.f32 1e-06, %v3344_v22 }
 0x5e2   : > { %v7506_v19 = vmul.f32 %v7502_v42, %v3389_v43 }
 0x5e3   : > { %v3363_v2 = vadd.f32 1e-06, %v3347_v31 }
 0x5e4   : > { %3427 = vrot.lane.b32.xlu0 %v7506_v19, %s5504_s7  ;;  %v3326_v16 = vpop.xlane.xlu0 %3325 }
 0x5e5   : > { %5027 = vrsqrt.f32 %v3363_v2  ;;  %v3349_v53 = vmul.f32 0.0078125, %v3326_v16 }
 0x5e6   : > { %v3312_v36 = vpop.xlane.xlu1 %3311 }
 0x5e7   : > { %v3365_v30 = vadd.f32 1e-06, %v3349_v53  ;;  %v3342_v59 = vmul.f32 0.0078125, %v3312_v36 }
 0x5e8   : > { %v3330_v51 = vpop.xlane.xlu0 %3329 }
 0x5e9   : > { %5029 = vrsqrt.f32 %v3365_v30  ;;  %v3351_v61 = vmul.f32 0.0078125, %v3330_v51  ;;  %v3358_v14 = vadd.f32 1e-06, %v3342_v59 }
 0x5ea   : > { %5031 = vrsqrt.f32 %v3359_v48  ;;  %v3320_v43 = vpop.xlane.xlu1 %3319 }
 0x5eb   : > { %v5026_v25 = vpop.eup %5025  ;;  %v3367_v34 = vadd.f32 1e-06, %v3351_v61  ;;  %5033 = vrsqrt.f32 %v3358_v14  ;;  %v3346_v2 = vmul.f32 0.0078125, %v3320_v43 }
 0x5ec   : > { %v3334_v31 = vpop.xlane.xlu0 %3333  ;;  %v3393_v27 = vmul.f32 %v5026_v25, %v7207_v1 }
 0x5ed   : > { %5035 = vrsqrt.f32 %v3367_v34  ;;  %v3353_v26 = vmul.f32 0.0078125, %v3334_v31  ;;  %v3362_v36 = vadd.f32 1e-06, %v3346_v2 }
 0x5ee   : > { %5037 = vrsqrt.f32 %v3360_v29  ;;  %v7512_v47 = vmul.f32 %v7502_v42, %v3393_v27  ;;  %v3324_v53 = vpop.xlane.xlu1 %3323 }
 0x5ef   : > { %v5028_v16 = vpop.eup %5027  ;;  %v3369_v51 = vadd.f32 1e-06, %v3353_v26  ;;  %v3348_v22 = vmul.f32 0.0078125, %v3324_v53 }
 0x5f0   : > { %3435 = vrot.lane.b32.xlu0 %v7512_v47, %s5504_s7  ;;  %v3338_v59 = vpop.xlane.xlu0 %3337  ;;  %v3395_v48 = vmul.f32 %v5028_v16, %v7211_v7 }
 0x5f1   : > { %5039 = vrsqrt.f32 %v3369_v51  ;;  %v3355_v1 = vmul.f32 0.0078125, %v3338_v59  ;;  %v3364_v61 = vadd.f32 1e-06, %v3348_v22 }
 0x5f2   : > { %5041 = vrsqrt.f32 %v3362_v36  ;;  %v7518_v30 = vmul.f32 %v7502_v42, %v3395_v48  ;;  %v3328_v14 = vpop.xlane.xlu1 %3327 }
 0x5f3   : > { %v5030_v27 = vpop.eup %5029  ;;  %v3371_v29 = vadd.f32 1e-06, %v3355_v1  ;;  %v3350_v31 = vmul.f32 0.0078125, %v3328_v14 }
 0x5f4   : > { %v5032_v25 = vpop.eup %5031  ;;  %3439 = vrot.lane.b32.xlu0 %v7518_v30, %s5504_s7  ;;  %v3700_v34 = vpop.xlane.xlu0 %3699  ;;  %v3397_v43 = vmul.f32 %v5030_v27, %v7215_v40 }
 0x5f5   : > { %5043 = vrsqrt.f32 %v3371_v29  ;;  %v3731_v7 = vmul.f32 0.0078125, %v3700_v34  ;;  %v5034_v2 = vpop.eup %5033  ;;  %v3366_v36 = vadd.f32 1e-06, %v3350_v31  ;;  %v3391_v48 = vmul.f32 %v5032_v25, %v7199_v5 }
 0x5f6   : > { %5045 = vrsqrt.f32 %v3364_v61  ;;  %v7524_v26 = vmul.f32 %v7502_v42, %v3397_v43  ;;  %v3390_v53 = vmul.f32 %v5034_v2, %v7219_v11  ;;  %v3332_v59 = vpop.xlane.xlu1 %3331 }
 0x5f7   : > { %v5036_v16 = vpop.eup %5035  ;;  %v3747_v51 = vadd.f32 1e-06, %v3731_v7  ;;  %v3352_v27 = vmul.f32 0.0078125, %v3332_v59  ;;  %v7540_v25 = vmul.f32 %v7502_v42, %v3391_v48 }
 0x5f8   : > { %v5038_v22 = vpop.eup %5037  ;;  %3443 = vrot.lane.b32.xlu0 %v7524_v26, %s5504_s7  ;;  %v3704_v40 = vpop.xlane.xlu0 %3703  ;;  %v3399_v1 = vmul.f32 %v5036_v16, %v7221_v57  ;;  %v7532_v29 = vmul.f32 %v7502_v42, %v3390_v53 }
 0x5f9   : > { %5047 = vrsqrt.f32 %v3747_v51  ;;  %v3733_v61 = vmul.f32 0.0078125, %v3704_v40  ;;  %v3368_v11 = vadd.f32 1e-06, %v3352_v27  ;;  %v3392_v43 = vmul.f32 %v5038_v22, %v7203_v9 }
 0x5fa   : > { %5049 = vrsqrt.f32 %v3366_v36  ;;  %v7535_v14 = vmul.f32 %v7502_v42, %v3399_v1  ;;  %3429 = vrot.lane.b32.xlu1 %v7532_v29, %s5504_s7  ;;  %v3336_v57 = vpop.xlane.xlu1 %3335 }
 0x5fb   : > { %v5040_v34 = vpop.eup %5039  ;;  %v3749_v5 = vadd.f32 1e-06, %v3733_v61  ;;  %v3354_v36 = vmul.f32 0.0078125, %v3336_v57  ;;  %v7552_v9 = vmul.f32 %v7502_v42, %v3392_v43 }
 0x5fc   : > { %v5042_v31 = vpop.eup %5041  ;;  %3447 = vrot.lane.b32.xlu0 %v7535_v14, %s5504_s7  ;;  %v3708_v7 = vpop.xlane.xlu0 %3707  ;;  %v3401_v2 = vmul.f32 %v5040_v34, %v7229_v13 }
 0x5fd   : > { %5051 = vrsqrt.f32 %v3749_v5  ;;  %v3735_v16 = vmul.f32 0.0078125, %v3708_v7  ;;  %v3370_v53 = vadd.f32 1e-06, %v3354_v36  ;;  %v3394_v40 = vmul.f32 %v5042_v31, %v7227_v6 }
 0x5fe   : > { %5053 = vrsqrt.f32 %v3368_v11  ;;  %v7547_v51 = vmul.f32 %v7502_v42, %v3401_v2  ;;  %3431 = vrot.lane.b32.xlu1 %v7540_v25, %s5504_s7  ;;  %v3340_v22 = vpop.xlane.xlu1 %3339 }
 0x5ff   : > { %v5044_v59 = vpop.eup %5043  ;;  %v3751_v48 = vadd.f32 1e-06, %v3735_v16  ;;  %v3356_v61 = vmul.f32 0.0078125, %v3340_v22  ;;  %v7564_v6 = vmul.f32 %v7502_v42, %v3394_v40 }
 0x600   : > { %v5046_v13 = vpop.eup %5045  ;;  %3451 = vrot.lane.b32.xlu0 %v7547_v51, %s5504_s7  ;;  %v3712_v1 = vpop.xlane.xlu0 %3711  ;;  %v3403_v27 = vmul.f32 %v5044_v59, %v7237_v35 }
 0x601   : > { %5055 = vrsqrt.f32 %v3751_v48  ;;  %v3737_v11 = vmul.f32 0.0078125, %v3712_v1  ;;  %v3372_v5 = vadd.f32 1e-06, %v3356_v61  ;;  %v3396_v7 = vmul.f32 %v5046_v13, %v7235_v0 }
 0x602   : > { %5057 = vrsqrt.f32 %v3370_v53  ;;  %v7559_v34 = vmul.f32 %v7502_v42, %v3403_v27  ;;  %3433 = vrot.lane.b32.xlu1 %v7552_v9, %s5504_s7  ;;  %v3702_v31 = vpop.xlane.xlu1 %3701 }
 0x603   : > { %v5048_v57 = vpop.eup %5047  ;;  %v3753_v43 = vadd.f32 1e-06, %v3737_v11  ;;  %v3732_v16 = vmul.f32 0.0078125, %v3702_v31  ;;  %v7576_v0 = vmul.f32 %v7502_v42, %v3396_v7 }
 0x604   : > { %v5050_v35 = vpop.eup %5049  ;;  %3455 = vrot.lane.b32.xlu0 %v7559_v34, %s5504_s7  ;;  %v3716_v2 = vpop.xlane.xlu0 %3715  ;;  %v3779_v36 = vmul.f32 %v5048_v57, %v7245_v15 }
 0x605   : > { %5059 = vrsqrt.f32 %v3753_v43  ;;  %v3739_v53 = vmul.f32 0.0078125, %v3716_v2  ;;  %v3748_v48 = vadd.f32 1e-06, %v3732_v16  ;;  %v3398_v1 = vmul.f32 %v5050_v35, %v7243_v49 }
 0x606   : > { %5061 = vrsqrt.f32 %v3372_v5  ;;  %v7571_v59 = vmul.f32 %v7502_v42, %v3779_v36  ;;  %3437 = vrot.lane.b32.xlu1 %v7564_v6, %s5504_s7  ;;  %v3706_v13 = vpop.xlane.xlu1 %3705 }
 0x607   : > { %v5052_v22 = vpop.eup %5051  ;;  %v3755_v40 = vadd.f32 1e-06, %v3739_v53  ;;  %v3734_v11 = vmul.f32 0.0078125, %v3706_v13  ;;  %v7588_v49 = vmul.f32 %v7502_v42, %v3398_v1 }
 0x608   : > { %v5054_v15 = vpop.eup %5053  ;;  %3811 = vrot.lane.b32.xlu0 %v7571_v59, %s5504_s7  ;;  %v3720_v27 = vpop.xlane.xlu0 %3719  ;;  %v3781_v61 = vmul.f32 %v5052_v22, %v7253_v17 }
 0x609   : > { %5063 = vrsqrt.f32 %v3755_v40  ;;  %v3741_v5 = vmul.f32 0.0078125, %v3720_v27  ;;  %v3750_v43 = vadd.f32 1e-06, %v3734_v11  ;;  %v3400_v2 = vmul.f32 %v5054_v15, %v7251_v44 }
 0x60a   : > { %5065 = vrsqrt.f32 %v3748_v48  ;;  %v7583_v57 = vmul.f32 %v7502_v42, %v3781_v61  ;;  %3441 = vrot.lane.b32.xlu1 %v7576_v0, %s5504_s7  ;;  %v3710_v35 = vpop.xlane.xlu1 %3709 }
 0x60b   : > { %v5056_v31 = vpop.eup %5055  ;;  %v3757_v7 = vadd.f32 1e-06, %v3741_v5  ;;  %v3736_v53 = vmul.f32 0.0078125, %v3710_v35  ;;  %v7600_v44 = vmul.f32 %v7502_v42, %v3400_v2 }
 0x60c   : > { %v5058_v17 = vpop.eup %5057  ;;  %3815 = vrot.lane.b32.xlu0 %v7583_v57, %s5504_s7  ;;  %v3724_v36 = vpop.xlane.xlu0 %3723  ;;  %v3783_v16 = vmul.f32 %v5056_v31, %v7261_v55 }
 0x60d   : > { %5067 = vrsqrt.f32 %v3757_v7  ;;  %v3743_v48 = vmul.f32 0.0078125, %v3724_v36  ;;  %v3752_v40 = vadd.f32 1e-06, %v3736_v53  ;;  %v3402_v27 = vmul.f32 %v5058_v17, %v7259_v10 }
 0x60e   : > { %5069 = vrsqrt.f32 %v3750_v43  ;;  %v7595_v22 = vmul.f32 %v7502_v42, %v3783_v16  ;;  %3445 = vrot.lane.b32.xlu1 %v7588_v49, %s5504_s7  ;;  %v3714_v15 = vpop.xlane.xlu1 %3713 }
 0x60f   : > { %v5060_v13 = vpop.eup %5059  ;;  %v3759_v1 = vadd.f32 1e-06, %v3743_v48  ;;  %v3738_v5 = vmul.f32 0.0078125, %v3714_v15  ;;  %v7612_v10 = vmul.f32 %v7502_v42, %v3402_v27 }
 0x610   : > { %v5062_v55 = vpop.eup %5061  ;;  %3819 = vrot.lane.b32.xlu0 %v7595_v22, %s5504_s7  ;;  %v3728_v61 = vpop.xlane.xlu0 %3727  ;;  %v3785_v11 = vmul.f32 %v5060_v13, %v7269_v56 }
 0x611   : > { %5071 = vrsqrt.f32 %v3759_v1  ;;  %v3745_v43 = vmul.f32 0.0078125, %v3728_v61  ;;  %v3754_v7 = vadd.f32 1e-06, %v3738_v5  ;;  %v3404_v36 = vmul.f32 %v5062_v55, %v7267_v37 }
 0x612   : > { %5073 = vrsqrt.f32 %v3752_v40  ;;  %v7607_v31 = vmul.f32 %v7502_v42, %v3785_v11  ;;  %3449 = vrot.lane.b32.xlu1 %v7600_v44, %s5504_s7  ;;  %v3718_v17 = vpop.xlane.xlu1 %3717 }
 0x613   : > { %v5064_v35 = vpop.eup %5063  ;;  %v3761_v2 = vadd.f32 1e-06, %v3745_v43  ;;  %v3740_v53 = vmul.f32 0.0078125, %v3718_v17  ;;  %v7624_v1 = vmul.f32 %v7502_v42, %v3404_v36 }
 0x614   : > { %v5066_v56 = vpop.eup %5065  ;;  %3823 = vrot.lane.b32.xlu0 %v7607_v31, %s5504_s7  ;;  %v3787_v16 = vmul.f32 %v5064_v35, %v7277_v18 }
 0x615   : > { %5075 = vrsqrt.f32 %v3761_v2  ;;  %v3756_v40 = vadd.f32 1e-06, %v3740_v53  ;;  %v3780_v15 = vmul.f32 %v5066_v56, %v7275_v39 }
 0x616   : > { %5077 = vrsqrt.f32 %v3754_v7  ;;  %v7619_v48 = vmul.f32 %v7502_v42, %v3787_v16  ;;  %3453 = vrot.lane.b32.xlu1 %v7612_v10, %s5504_s7  ;;  %v3722_v37 = vpop.xlane.xlu1 %3721 }
 0x617   : > { %v5068_v13 = vpop.eup %5067  ;;  %v3742_v55 = vmul.f32 0.0078125, %v3722_v37  ;;  %5079 = vrsqrt.f32 %v3756_v40  ;;  %v7636_v43 = vmul.f32 %v7502_v42, %v3780_v15 }
 0x618   : > { %v5070_v27 = vpop.eup %5069  ;;  %3827 = vrot.lane.b32.xlu0 %v7619_v48, %s5504_s7  ;;  %v3789_v18 = vmul.f32 %v5068_v13, %v7285_v24 }
 0x619   : > { %v3758_v11 = vadd.f32 1e-06, %v3742_v55  ;;  %v3782_v7 = vmul.f32 %v5070_v27, %v7283_v28 }
 0x61a   : > { %v7631_v61 = vmul.f32 %v7502_v42, %v3789_v18  ;;  %3457 = vrot.lane.b32.xlu1 %v7624_v1, %s5504_s7  ;;  %v3726_v39 = vpop.xlane.xlu1 %3725 }
 0x61b   : > { %v5072_v5 = vpop.eup %5071  ;;  %v3744_v2 = vmul.f32 0.0078125, %v3726_v39  ;;  %5081 = vrsqrt.f32 %v3758_v11  ;;  %v7648_v16 = vmul.f32 %v7502_v42, %v3782_v7 }
 0x61c   : > { %v5074_v35 = vpop.eup %5073  ;;  %3831 = vrot.lane.b32.xlu0 %v7631_v61, %s5504_s7  ;;  %v3791_v24 = vmul.f32 %v5072_v5, %v7294_v3 }
 0x61d   : > { %v3760_v36 = vadd.f32 1e-06, %v3744_v2  ;;  %v3784_v53 = vmul.f32 %v5074_v35, %v7292_v4 }
 0x61e   : > { %v7643_v17 = vmul.f32 %v7502_v42, %v3791_v24  ;;  %3813 = vrot.lane.b32.xlu1 %v7636_v43, %s5504_s7  ;;  %v3730_v28 = vpop.xlane.xlu1 %3729 }
 0x61f   : > { %v5076_v56 = vpop.eup %5075  ;;  %v3746_v13 = vmul.f32 0.0078125, %v3730_v28  ;;  %5083 = vrsqrt.f32 %v3760_v36  ;;  %v7660_v27 = vmul.f32 %v7502_v42, %v3784_v53  ;;  %v1910_v36 = vld [vmem:[#allocation2 + $0x30] sm:$0xff]  ;;  %v1919_v28 = vld [vmem:[#allocation2 + $0x78] sm:$0xff] }
 0x620   : > { %v5078_v40 = vpop.eup %5077  ;;  %3835 = vrot.lane.b32.xlu0 %v7643_v17, %s5504_s7  ;;  %v3793_v3 = vmul.f32 %v5076_v56, %v7311_v52  ;;  %v1918_v56 = vld [vmem:[#allocation2 + $0x70] sm:$0xff] }
 0x621   : > { %v3762_v15 = vadd.f32 1e-06, %v3746_v13  ;;  %v3786_v4 = vmul.f32 %v5078_v40, %v7309_v21  ;;  %v5080_v18 = vpop.eup %5079  ;;  %v1926_v53 = vld [vmem:[#allocation2 + $0xb0] sm:$0xff]  ;;  %v1927_v40 = vld [vmem:[#allocation2 + $0xb8] sm:$0xff]  ;;  %v4669_v13 = vpack.c.bf16 %v1918_v56, %v1918_v56 }
 0x622   : > { %v7655_v37 = vmul.f32 %v7502_v42, %v3793_v3  ;;  %3817 = vrot.lane.b32.xlu1 %v7648_v16, %s5504_s7  ;;  %v3788_v55 = vmul.f32 %v5080_v18, %v7318_v50  ;;  %v4668_v3 = vpack.c.bf16 %v1910_v36, %v1910_v36  ;;  %v1942_v18 = vld [vmem:[#allocation2 + $0x130] sm:$0xff] }
 0x623   : > { %5085 = vrsqrt.f32 %v3762_v15  ;;  %v7668_v52 = vmul.f32 %v7502_v42, %v3786_v4  ;;  %v1934_v15 = vld [vmem:[#allocation2 + $0xf0] sm:$0xff]  ;;  %v1935_v4 = vld [vmem:[#allocation2 + $0xf8] sm:$0xff]  ;;  %3668 = vst [vmem:[%s5953_s23 + $0x8] sm:$0xf] %v4669_v13 }
 0x624   : > { %3839 = vrot.lane.b32.xlu0 %v7655_v37, %s5504_s7  ;;  %v7674_v5 = vmul.f32 %v7502_v42, %v3788_v55  ;;  %v4670_v55 = vpack.c.bf16 %v1926_v53, %v1926_v53  ;;  %3667 = vst [vmem:[%s5953_s23] sm:$0xf] %v4668_v3  ;;  %v4703_v36 = vpack.c.bf16 %v1935_v4, %v1935_v4  ;;  %v1958_v56 = vld [vmem:[#allocation2 + $0x1b0] sm:$0xff]  ;;  %v1967_v3 = vld [vmem:[#allocation2 + $0x1f8] sm:$0xff] }
 0x625   : > { %v5082_v11 = vpop.eup %5081  ;;  %v1966_v53 = vld [vmem:[#allocation2 + $0x1f0] sm:$0xff]  ;;  %v4674_v4 = vpack.c.bf16 %v1958_v56, %v1958_v56 }
 0x626   : > { %3821 = vrot.lane.b32.xlu1 %v7660_v27, %s5504_s7  ;;  %v3790_v21 = vmul.f32 %v5082_v11, %v7323_v38  ;;  %v1911_v38 = vld [vmem:[#allocation2 + $0x38] sm:$0xff]  ;;  %v4701_v11 = vpack.c.bf16 %v1919_v28, %v1919_v28  ;;  %3669 = vst [vmem:[%s5953_s23 + $0x10] sm:$0xf] %v4670_v55  ;;  %v1974_v13 = vld [vmem:[#allocation2 + $0x230] sm:$0xff]  ;;  %4054 = vst [vmem:[%s5953_s23 + $0x1c] sm:$0xf] %v4703_v36 }
 0x627   : > { %v1959_v28 = vld [vmem:[#allocation2 + $0x1b8] sm:$0xff]  ;;  %v1998_v56 = vld [vmem:[#allocation2 + $0x2f0] sm:$0xff]  ;;  %3673 = vst [vmem:[%s5953_s23 + $0x30] sm:$0xf] %v4674_v4 }
 0x628   : > { %v7680_v7 = vmul.f32 %v7502_v42, %v3790_v21  ;;  %v4702_v21 = vpack.c.bf16 %v1927_v40, %v1927_v40  ;;  %4052 = vst [vmem:[%s5953_s23 + $0xc] sm:$0xf] %v4701_v11  ;;  %v1983_v55 = vld [vmem:[#allocation2 + $0x278] sm:$0xff]  ;;  %v4707_v11 = vpack.c.bf16 %v1967_v3, %v1967_v3  ;;  %v2022_v4 = vld [vmem:[#allocation2 + $0x3b0] sm:$0xff] }
 0x629   : > { %v5084_v39 = vpop.eup %5083  ;;  %v4709_v36 = vpack.c.bf16 %v1983_v55, %v1983_v55 }
 0x62a   : > { %3825 = vrot.lane.b32.xlu1 %v7668_v52, %s5504_s7  ;;  %8269 = vst [vmem:[#allocation52_spill] sm:$0xff] %v7680_v7  ;;  %v3792_v35 = vmul.f32 %v5084_v39, %v7337_v20  ;;  %v4700_v20 = vpack.c.bf16 %v1911_v38, %v1911_v38  ;;  %v1950_v39 = vld [vmem:[#allocation2 + $0x170] sm:$0xff]  ;;  %4053 = vst [vmem:[%s5953_s23 + $0x14] sm:$0xf] %v4702_v21 }
 0x62b   : > { %v4673_v40 = vpack.c.bf16 %v1950_v39, %v1950_v39  ;;  %v1982_v39 = vld [vmem:[#allocation2 + $0x270] sm:$0xff]  ;;  %4058 = vst [vmem:[%s5953_s23 + $0x3c] sm:$0xf] %v4707_v11  ;;  %4060 = vst [vmem:[%s5953_s23 + $0x4c] sm:$0xf] %v4709_v36  ;;  %v3475_v36 = vmul.f32 %v7297_v41, %v7506_v19 }
 0x62c   : > { %v7686_v50 = vmul.f32 %v7502_v42, %v3792_v35  ;;  %v1951_v35 = vld [vmem:[#allocation2 + $0x178] sm:$0xff]  ;;  %4051 = vst [vmem:[%s5953_s23 + $0x4] sm:$0xf] %v4700_v20  ;;  %v8272_v19 = vld [vmem:[#allocation45_spill] sm:$0xff] }
 0x62d   : > { %v5086_v24 = vpop.eup %5085  ;;  %v1975_v20 = vld [vmem:[#allocation2 + $0x238] sm:$0xff]  ;;  %3672 = vst [vmem:[%s5953_s23 + $0x28] sm:$0xf] %v4673_v40 }
 0x62e   : > { %3829 = vrot.lane.b32.xlu1 %v7674_v5, %s5504_s7  ;;  %8270 = vst [vmem:[#allocation53_spill] sm:$0xff] %v7686_v50  ;;  %v3794_v2 = vmul.f32 %v5086_v24, %v7362_v62  ;;  %v1943_v62 = vld [vmem:[#allocation2 + $0x138] sm:$0xff]  ;;  %v4671_v24 = vpack.c.bf16 %v1934_v15, %v1934_v15  ;;  %v4708_v21 = vpack.c.bf16 %v1975_v20, %v1975_v20 }
 0x62f   : > { %v4704_v15 = vpack.c.bf16 %v1943_v62, %v1943_v62  ;;  %v1990_v62 = vld [vmem:[#allocation2 + $0x2b0] sm:$0xff]  ;;  %v2007_v40 = vld [vmem:[#allocation2 + $0x338] sm:$0xff] }
 0x630   : > { %v7695_v38 = vmul.f32 %v7502_v42, %v3794_v2  ;;  %v4675_v42 = vpack.c.bf16 %v1966_v53, %v1966_v53  ;;  %3670 = vst [vmem:[%s5953_s23 + $0x18] sm:$0xf] %v4671_v24  ;;  %v4706_v2 = vpack.c.bf16 %v1959_v28, %v1959_v28  ;;  %v1999_v24 = vld [vmem:[#allocation2 + $0x2f8] sm:$0xff]  ;;  %v4678_v28 = vpack.c.bf16 %v1990_v62, %v1990_v62  ;;  %v2006_v53 = vld [vmem:[#allocation2 + $0x330] sm:$0xff] }
 0x631   : > { %4055 = vst [vmem:[%s5953_s23 + $0x24] sm:$0xf] %v4704_v15  ;;  %v2014_v15 = vld [vmem:[#allocation2 + $0x370] sm:$0xff]  ;;  %4059 = vst [vmem:[%s5953_s23 + $0x44] sm:$0xf] %v4708_v21  ;;  %v2015_v20 = vld [vmem:[#allocation2 + $0x378] sm:$0xff]  ;;  %v4712_v55 = vpack.c.bf16 %v2007_v40, %v2007_v40 }
 0x632   : > { %3833 = vrot.lane.b32.xlu1 %v7680_v7, %s5504_s7  ;;  %v4672_v7 = vpack.c.bf16 %v1942_v18, %v1942_v18  ;;  %v4705_v18 = vpack.c.bf16 %v1951_v35, %v1951_v35  ;;  %v4676_v35 = vpack.c.bf16 %v1974_v13, %v1974_v13  ;;  %3674 = vst [vmem:[%s5953_s23 + $0x38] sm:$0xf] %v4675_v42  ;;  %4057 = vst [vmem:[%s5953_s23 + $0x34] sm:$0xf] %v4706_v2  ;;  %v2023_v42 = vld [vmem:[#allocation2 + $0x3b8] sm:$0xff] }
 0x633   : > { %v4711_v13 = vpack.c.bf16 %v1999_v24, %v1999_v24  ;;  %v4680_v2 = vpack.c.bf16 %v2006_v53, %v2006_v53  ;;  %3677 = vst [vmem:[%s5953_s23 + $0x50] sm:$0xf] %v4678_v28  ;;  %v2031_v62 = vld [vmem:[#allocation2 + $0x3f8] sm:$0xff]  ;;  %v4713_v11 = vpack.c.bf16 %v2015_v20, %v2015_v20  ;;  %v4714_v21 = vpack.c.bf16 %v2023_v42, %v2023_v42 }
 0x634   : > { %3671 = vst [vmem:[%s5953_s23 + $0x20] sm:$0xf] %v4672_v7  ;;  %4056 = vst [vmem:[%s5953_s23 + $0x2c] sm:$0xf] %v4705_v18  ;;  %v4677_v7 = vpack.c.bf16 %v1982_v39, %v1982_v39  ;;  %v4679_v18 = vpack.c.bf16 %v1998_v56, %v1998_v56  ;;  %v4681_v39 = vpack.c.bf16 %v2014_v15, %v2014_v15  ;;  %v8271_v20 = vld [vmem:[#allocation46_spill] sm:$0xff] }
 0x635   : > { %3675 = vst [vmem:[%s5953_s23 + $0x40] sm:$0xf] %v4676_v35  ;;  %v4682_v35 = vpack.c.bf16 %v2022_v4, %v2022_v4  ;;  %4062 = vst [vmem:[%s5953_s23 + $0x5c] sm:$0xf] %v4711_v13  ;;  %v4715_v24 = vpack.c.bf16 %v2031_v62, %v2031_v62  ;;  %v3479_v13 = vmul.f32 %v7326_v54, %v7512_v47  ;;  %v8274_v47 = vld [vmem:[#allocation36_spill] sm:$0xff] }
 0x636   : > { %3837 = vrot.lane.b32.xlu1 %v7686_v50, %s5504_s7  ;;  %v1991_v50 = vld [vmem:[#allocation2 + $0x2b8] sm:$0xff]  ;;  %3676 = vst [vmem:[%s5953_s23 + $0x48] sm:$0xf] %v4677_v7  ;;  %3678 = vst [vmem:[%s5953_s23 + $0x58] sm:$0xf] %v4679_v18  ;;  %v3483_v54 = vmul.f32 %v7365_v12, %v7524_v26  ;;  %v3485_v12 = vmul.f32 %v7388_v32, %v7535_v14 }
 0x637   : > { %v4710_v3 = vpack.c.bf16 %v1991_v50, %v1991_v50  ;;  %v2030_v50 = vld [vmem:[#allocation2 + $0x3f0] sm:$0xff]  ;;  %3679 = vst [vmem:[%s5953_s23 + $0x60] sm:$0xf] %v4680_v2  ;;  %3680 = vst [vmem:[%s5953_s23 + $0x68] sm:$0xf] %v4681_v39 }
 0x638   : > { %v4683_v56 = vpack.c.bf16 %v2030_v50, %v2030_v50  ;;  %4063 = vst [vmem:[%s5953_s23 + $0x64] sm:$0xf] %v4712_v55  ;;  %3681 = vst [vmem:[%s5953_s23 + $0x70] sm:$0xf] %v4682_v35  ;;  %v8273_v55 = vld [vmem:[#allocation47_spill] sm:$0xff] }
 0x639   : > { %4061 = vst [vmem:[%s5953_s23 + $0x54] sm:$0xf] %v4710_v3  ;;  %4064 = vst [vmem:[%s5953_s23 + $0x6c] sm:$0xf] %v4713_v11 }
 0x63a   : > { %3841 = vrot.lane.b32.xlu1 %v7695_v38, %s5504_s7  ;;  %4065 = vst [vmem:[%s5953_s23 + $0x74] sm:$0xf] %v4714_v21  ;;  %3682 = vst [vmem:[%s5953_s23 + $0x78] sm:$0xf] %v4683_v56 }
 0x63b   : > { %4066 = vst [vmem:[%s5953_s23 + $0x7c] sm:$0xf] %v4715_v24 }
 0x656   : > { %v3428_v7 = vpop.permute.xlu0 %3427 }
 0x657   : > { %v3459_v28 = vmul.f32 %v3428_v7, %v6566_v63 }
 0x659   : > { %v3491_v53 = vmul.f32 %v7302_v60, %v3459_v28  ;;  %v3481_v60 = vmul.f32 %v8272_v19, %v7518_v30 }
 0x65b   : > { %v3507_v40 = vadd.f32 %v3491_v53, %v3475_v36  ;;  %v8275_v53 = vld [vmem:[#allocation48_spill] sm:$0xff] }
 0x65d   : > { %v4652_v15 = vpack.c.bf16 %v3507_v40, %v3507_v40  ;;  %v3476_v40 = vmul.f32 %v8275_v53, %v7532_v29 }
 0x65f   : > { %3587 = vst [vmem:[%s5951_s26] sm:$0xf] %v4652_v15  ;;  %v8276_v15 = vld [vmem:[#allocation33_spill] sm:$0xff] }
 0x662   : > { %v3436_v18 = vpop.permute.xlu0 %3435 }
 0x663   : > { %v3463_v3 = vmul.f32 %v3436_v18, %v6566_v63 }
 0x665   : > { %v3495_v4 = vmul.f32 %v8271_v20, %v3463_v3 }
 0x666   : > { %v3440_v42 = vpop.permute.xlu0 %3439 }
 0x667   : > { %v3511_v2 = vadd.f32 %v3495_v4, %v3479_v13  ;;  %v3465_v39 = vmul.f32 %v3440_v42, %v6566_v63 }
 0x669   : > { %v4656_v41 = vpack.c.bf16 %v3511_v2, %v3511_v2  ;;  %v3497_v50 = vmul.f32 %v8273_v55, %v3465_v39 }
 0x66a   : > { %v3444_v62 = vpop.permute.xlu0 %3443 }
 0x66b   : > { %3591 = vst [vmem:[%s5951_s26 + $0x20] sm:$0xf] %v4656_v41  ;;  %v3513_v35 = vadd.f32 %v3497_v50, %v3481_v60  ;;  %v3467_v11 = vmul.f32 %v3444_v62, %v6566_v63  ;;  %v8277_v41 = vld [vmem:[#allocation31_spill] sm:$0xff]  ;;  %v8278_v60 = vld [vmem:[#allocation37_spill] sm:$0xff] }
 0x66c   : > { %v3430_v24 = vpop.permute.xlu1 %3429  ;;  %v3477_v19 = vmul.f32 %v8277_v41, %v7540_v25 }
 0x66d   : > { %v4658_v21 = vpack.c.bf16 %v3513_v35, %v3513_v35  ;;  %v3499_v56 = vmul.f32 %v8274_v47, %v3467_v11  ;;  %v3460_v7 = vmul.f32 %v3430_v24, %v6566_v63  ;;  %v3478_v47 = vmul.f32 %v7399_v46, %v7552_v9 }
 0x66e   : > { %v3448_v28 = vpop.permute.xlu0 %3447 }
 0x66f   : > { %3593 = vst [vmem:[%s5951_s26 + $0x30] sm:$0xf] %v4658_v21  ;;  %v3515_v30 = vadd.f32 %v3499_v56, %v3483_v54  ;;  %v3469_v36 = vmul.f32 %v3448_v28, %v6566_v63  ;;  %v3492_v18 = vmul.f32 %v8276_v15, %v3460_v7  ;;  %v8279_v56 = vld [vmem:[#allocation32_spill] sm:$0xff] }
 0x670   : > { %v3432_v13 = vpop.permute.xlu1 %3431 }
 0x671   : > { %v4660_v3 = vpack.c.bf16 %v3515_v30, %v3515_v30  ;;  %v3501_v26 = vmul.f32 %v7394_v33, %v3469_v36  ;;  %v3508_v20 = vadd.f32 %v3492_v18, %v3476_v40  ;;  %v3461_v4 = vmul.f32 %v3432_v13, %v6566_v63  ;;  %v8280_v40 = vld [vmem:[#allocation38_spill] sm:$0xff] }
 0x672   : > { %v3452_v42 = vpop.permute.xlu0 %3451  ;;  %v3487_v33 = vmul.f32 %v7410_v23, %v7547_v51  ;;  %v3489_v51 = vmul.f32 %v7432_v8, %v7559_v34  ;;  %v3480_v15 = vmul.f32 %v8280_v40, %v7564_v6  ;;  %v8281_v8 = vld [vmem:[#allocation34_spill] sm:$0xff]  ;;  %v8286_v40 = vld [vmem:[#allocation41_spill] sm:$0xff] }
 0x673   : > { %3595 = vst [vmem:[%s5951_s26 + $0x40] sm:$0xf] %v4660_v3  ;;  %v3517_v2 = vadd.f32 %v3501_v26, %v3485_v12  ;;  %v3471_v39 = vmul.f32 %v3452_v42, %v6566_v63  ;;  %v4653_v29 = vpack.c.bf16 %v3508_v20, %v3508_v20  ;;  %v3493_v55 = vmul.f32 %v8278_v60, %v3461_v4  ;;  %v5121_v12 = vld [vmem:[%s5942_s8] sm:$0xff] }
 0x674   : > { %v3434_v50 = vpop.permute.xlu1 %3433 }
 0x675   : > { %v4662_v32 = vpack.c.bf16 %v3517_v2, %v3517_v2  ;;  %v3503_v14 = vmul.f32 %v7416_v58, %v3471_v39  ;;  %3588 = vst [vmem:[%s5951_s26 + $0x8] sm:$0xf] %v4653_v29  ;;  %v3509_v62 = vadd.f32 %v3493_v55, %v3477_v19  ;;  %v3462_v35 = vmul.f32 %v3434_v50, %v6566_v63  ;;  %v8282_v29 = vld [vmem:[#allocation40_spill] sm:$0xff]  ;;  %v5122_v55 = vld [vmem:[%s5935_s11 + $0x10] sm:$0xff] }
 0x676   : > { %v3456_v11 = vpop.permute.xlu0 %3455  ;;  %v3482_v41 = vmul.f32 %v8282_v29, %v7576_v0 }
 0x677   : > { %3597 = vst [vmem:[%s5951_s26 + $0x50] sm:$0xf] %v4662_v32  ;;  %v3519_v21 = vadd.f32 %v3503_v14, %v3487_v33  ;;  %v3473_v25 = vmul.f32 %v3456_v11, %v6566_v63  ;;  %v4654_v54 = vpack.c.bf16 %v3509_v62, %v3509_v62  ;;  %v3494_v23 = vmul.f32 %v8279_v56, %v3462_v35  ;;  %v5123_v33 = vld [vmem:[%s5942_s8 + $0x10] sm:$0xff] }
 0x678   : > { %v3438_v7 = vpop.permute.xlu1 %3437  ;;  %v3861_v32 = vmul.f32 %v5122_v55, %v7583_v57  ;;  %v8285_v57 = vld [vmem:[#allocation39_spill] sm:$0xff] }
 0x679   : > { %v4664_v58 = vpack.c.bf16 %v3519_v21, %v3519_v21  ;;  %v3505_v24 = vmul.f32 %v7438_v45, %v3473_v25  ;;  %3589 = vst [vmem:[%s5951_s26 + $0x10] sm:$0xf] %v4654_v54  ;;  %v3510_v28 = vadd.f32 %v3494_v23, %v3478_v47  ;;  %v3464_v30 = vmul.f32 %v3438_v7, %v6566_v63  ;;  %v5120_v45 = vld [vmem:[%s5935_s11] sm:$0xff]  ;;  %v8284_v54 = vld [vmem:[#allocation42_spill] sm:$0xff] }
 0x67a   : > { %v3812_v36 = vpop.permute.xlu0 %3811  ;;  %v3859_v3 = vmul.f32 %v5120_v45, %v7571_v59  ;;  %v8283_v59 = vld [vmem:[#allocation35_spill] sm:$0xff]  ;;  %v3484_v47 = vmul.f32 %v8284_v54, %v7588_v49  ;;  %v5130_v54 = vld [vmem:[%s5935_s11 + $0x50] sm:$0xff] }
 0x67b   : > { %3599 = vst [vmem:[%s5951_s26 + $0x60] sm:$0xf] %v4664_v58  ;;  %v3521_v46 = vadd.f32 %v3505_v24, %v3489_v51  ;;  %v3843_v9 = vmul.f32 %v3812_v36, %v6566_v63  ;;  %v4655_v53 = vpack.c.bf16 %v3510_v28, %v3510_v28  ;;  %v3496_v34 = vmul.f32 %v8281_v8, %v3464_v30  ;;  %v5124_v58 = vld [vmem:[%s5935_s11 + $0x20] sm:$0xff] }
 0x67c   : > { %v3442_v13 = vpop.permute.xlu1 %3441  ;;  %v3863_v51 = vmul.f32 %v5124_v58, %v7595_v22  ;;  %v5125_v24 = vld [vmem:[%s5942_s8 + $0x20] sm:$0xff]  ;;  %v8287_v22 = vld [vmem:[#allocation44_spill] sm:$0xff] }
 0x67d   : > { %v4666_v18 = vpack.c.bf16 %v3521_v46, %v3521_v46  ;;  %v3875_v26 = vmul.f32 %v5121_v12, %v3843_v9  ;;  %3590 = vst [vmem:[%s5951_s26 + $0x18] sm:$0xf] %v4655_v53  ;;  %v3512_v20 = vadd.f32 %v3496_v34, %v3480_v15  ;;  %v3466_v4 = vmul.f32 %v3442_v13, %v6566_v63 }
 0x67e   : > { %v3816_v42 = vpop.permute.xlu0 %3815  ;;  %v3486_v15 = vmul.f32 %v8286_v40, %v7600_v44  ;;  %v5135_v40 = vld [vmem:[%s5942_s8 + $0x60] sm:$0xff] }
 0x67f   : > { %3601 = vst [vmem:[%s5951_s26 + $0x70] sm:$0xf] %v4666_v18  ;;  %v3891_v6 = vadd.f32 %v3875_v26, %v3859_v3  ;;  %v3845_v2 = vmul.f32 %v3816_v42, %v6566_v63  ;;  %v4657_v39 = vpack.c.bf16 %v3512_v20, %v3512_v20  ;;  %v3498_v19 = vmul.f32 %v8283_v59, %v3466_v4  ;;  %v5126_v18 = vld [vmem:[%s5935_s11 + $0x30] sm:$0xff]  ;;  %v5128_v59 = vld [vmem:[%s5935_s11 + $0x40] sm:$0xff] }
 0x680   : > { %v3446_v50 = vpop.permute.xlu1 %3445  ;;  %v3865_v45 = vmul.f32 %v5126_v18, %v7607_v31  ;;  %v5127_v3 = vld [vmem:[%s5942_s8 + $0x30] sm:$0xff] }
 0x681   : > { %v4684_v60 = vpack.c.bf16 %v3891_v6, %v3891_v6  ;;  %v3877_v14 = vmul.f32 %v5123_v33, %v3845_v2  ;;  %3592 = vst [vmem:[%s5951_s26 + $0x28] sm:$0xf] %v4657_v39  ;;  %v3514_v62 = vadd.f32 %v3498_v19, %v3482_v41  ;;  %v3468_v35 = vmul.f32 %v3446_v50, %v6566_v63  ;;  %v8288_v2 = vld [vmem:[#allocation43_spill] sm:$0xff]  ;;  %v8289_v31 = vld [vmem:[#allocation49_spill] sm:$0xff] }
 0x682   : > { %v3820_v11 = vpop.permute.xlu0 %3819  ;;  %v3488_v39 = vmul.f32 %v8288_v2, %v7612_v10  ;;  %v3867_v19 = vmul.f32 %v5128_v59, %v7619_v48  ;;  %v8291_v48 = vld [vmem:[#allocation51_spill] sm:$0xff] }
 0x683   : > { %3971 = vst [vmem:[%s5951_s26 + $0x4] sm:$0xf] %v4684_v60  ;;  %v3893_v0 = vadd.f32 %v3877_v14, %v3861_v32  ;;  %v3847_v21 = vmul.f32 %v3820_v11, %v6566_v63  ;;  %v4659_v25 = vpack.c.bf16 %v3514_v62, %v3514_v62  ;;  %v3500_v56 = vmul.f32 %v8285_v57, %v3468_v35  ;;  %v5129_v60 = vld [vmem:[%s5942_s8 + $0x40] sm:$0xff]  ;;  %v8290_v11 = vld [vmem:[#allocation50_spill] sm:$0xff]  ;;  %v5131_v57 = vld [vmem:[%s5942_s8 + $0x50] sm:$0xff] }
 0x684   : > { %v3450_v28 = vpop.permute.xlu1 %3449 }
 0x685   : > { %v4686_v23 = vpack.c.bf16 %v3893_v0, %v3893_v0  ;;  %v3879_v7 = vmul.f32 %v5125_v24, %v3847_v21  ;;  %3594 = vst [vmem:[%s5951_s26 + $0x38] sm:$0xf] %v4659_v25  ;;  %v3516_v30 = vadd.f32 %v3500_v56, %v3484_v47  ;;  %v3470_v36 = vmul.f32 %v3450_v28, %v6566_v63 }
 0x686   : > { %v3824_v46 = vpop.permute.xlu0 %3823  ;;  %v3490_v0 = vmul.f32 %v8290_v11, %v7624_v1  ;;  %v3869_v47 = vmul.f32 %v5130_v54, %v7631_v61  ;;  %v5145_v54 = vld [vmem:[%s5942_s8 + $0x48] sm:$0xff] }
 0x687   : > { %3973 = vst [vmem:[%s5951_s26 + $0x14] sm:$0xf] %v4686_v23  ;;  %v3895_v49 = vadd.f32 %v3879_v7, %v3863_v51  ;;  %v3849_v9 = vmul.f32 %v3824_v46, %v6566_v63  ;;  %v4661_v53 = vpack.c.bf16 %v3516_v30, %v3516_v30  ;;  %v3502_v8 = vmul.f32 %v8287_v22, %v3470_v36  ;;  %v5132_v30 = vld [vmem:[%s5935_s11 + $0x8] sm:$0xff] }
 0x688   : > { %v3454_v26 = vpop.permute.xlu1 %3453  ;;  %v3860_v61 = vmul.f32 %v5132_v30, %v7636_v43  ;;  %v5133_v36 = vld [vmem:[%s5942_s8 + $0x8] sm:$0xff] }
 0x689   : > { %v4688_v34 = vpack.c.bf16 %v3895_v49, %v3895_v49  ;;  %v3881_v12 = vmul.f32 %v5127_v3, %v3849_v9  ;;  %3596 = vst [vmem:[%s5951_s26 + $0x48] sm:$0xf] %v4661_v53  ;;  %v3518_v13 = vadd.f32 %v3502_v8, %v3486_v15  ;;  %v3472_v20 = vmul.f32 %v3454_v26, %v6566_v63  ;;  %v5134_v9 = vld [vmem:[%s5935_s11 + $0x60] sm:$0xff]  ;;  %v5137_v26 = vld [vmem:[%s5942_s8 + $0x18] sm:$0xff] }
 0x68a   : > { %v3828_v4 = vpop.permute.xlu0 %3827  ;;  %v3871_v53 = vmul.f32 %v5134_v9, %v7643_v17  ;;  %v5149_v9 = vld [vmem:[%s5942_s8 + $0x68] sm:$0xff] }
 0x68b   : > { %3975 = vst [vmem:[%s5951_s26 + $0x24] sm:$0xf] %v4688_v34  ;;  %v3897_v44 = vadd.f32 %v3881_v12, %v3865_v45  ;;  %v3851_v42 = vmul.f32 %v3828_v4, %v6566_v63  ;;  %v4663_v6 = vpack.c.bf16 %v3518_v13, %v3518_v13  ;;  %v3504_v29 = vmul.f32 %v8289_v31, %v3472_v20  ;;  %v5136_v12 = vld [vmem:[%s5935_s11 + $0x18] sm:$0xff]  ;;  %v5138_v4 = vld [vmem:[%s5935_s11 + $0x70] sm:$0xff] }
 0x68c   : > { %v3458_v32 = vpop.permute.xlu1 %3457  ;;  %v3862_v17 = vmul.f32 %v5136_v12, %v7648_v16 }
 0x68d   : > { %v4690_v41 = vpack.c.bf16 %v3897_v44, %v3897_v44  ;;  %v3883_v55 = vmul.f32 %v5129_v60, %v3851_v42  ;;  %3598 = vst [vmem:[%s5951_s26 + $0x58] sm:$0xf] %v4663_v6  ;;  %v3520_v33 = vadd.f32 %v3504_v29, %v3488_v39  ;;  %v3474_v14 = vmul.f32 %v3458_v32, %v6566_v63  ;;  %v5139_v42 = vld [vmem:[%s5942_s8 + $0x70] sm:$0xff] }
 0x68e   : > { %v3832_v50 = vpop.permute.xlu0 %3831  ;;  %v3873_v44 = vmul.f32 %v5138_v4, %v7655_v37 }
 0x68f   : > { %3977 = vst [vmem:[%s5951_s26 + $0x34] sm:$0xf] %v4690_v41  ;;  %v3899_v10 = vadd.f32 %v3883_v55, %v3867_v19  ;;  %v3853_v62 = vmul.f32 %v3832_v50, %v6566_v63  ;;  %v4665_v35 = vpack.c.bf16 %v3520_v33, %v3520_v33  ;;  %v3506_v21 = vmul.f32 %v8291_v48, %v3474_v14  ;;  %v5140_v41 = vld [vmem:[%s5935_s11 + $0x28] sm:$0xff]  ;;  %v5142_v50 = vld [vmem:[%s5935_s11 + $0x38] sm:$0xff] }
 0x690   : > { %v3814_v23 = vpop.permute.xlu1 %3813  ;;  %v3864_v59 = vmul.f32 %v5140_v41, %v7660_v27  ;;  %v5141_v19 = vld [vmem:[%s5942_s8 + $0x28] sm:$0xff] }
 0x691   : > { %v4692_v25 = vpack.c.bf16 %v3899_v10, %v3899_v10  ;;  %v3885_v56 = vmul.f32 %v5131_v57, %v3853_v62  ;;  %3600 = vst [vmem:[%s5951_s26 + $0x68] sm:$0xf] %v4665_v35  ;;  %v3522_v58 = vadd.f32 %v3506_v21, %v3490_v0  ;;  %v3844_v51 = vmul.f32 %v3814_v23, %v6566_v63  ;;  %v5143_v62 = vld [vmem:[%s5942_s8 + $0x38] sm:$0xff]  ;;  %v5144_v21 = vld [vmem:[%s5935_s11 + $0x48] sm:$0xff] }
 0x692   : > { %v3836_v24 = vpop.permute.xlu0 %3835  ;;  %v3866_v10 = vmul.f32 %v5142_v50, %v7668_v52 }
 0x693   : > { %3979 = vst [vmem:[%s5951_s26 + $0x44] sm:$0xf] %v4692_v25  ;;  %v3901_v1 = vadd.f32 %v3885_v56, %v3869_v47  ;;  %v3855_v7 = vmul.f32 %v3836_v24, %v6566_v63  ;;  %v4667_v28 = vpack.c.bf16 %v3522_v58, %v3522_v58  ;;  %v3876_v46 = vmul.f32 %v5133_v36, %v3844_v51  ;;  %v5146_v58 = vld [vmem:[%s5935_s11 + $0x58] sm:$0xff]  ;;  %v8292_v51 = vld [vmem:[#allocation52_spill] sm:$0xff] }
 0x694   : > { %v3818_v22 = vpop.permute.xlu1 %3817  ;;  %v3868_v25 = vmul.f32 %v5144_v21, %v7674_v5  ;;  %v3870_v24 = vmul.f32 %v5146_v58, %v8292_v51  ;;  %v5148_v36 = vld [vmem:[%s5935_s11 + $0x68] sm:$0xff] }
 0x695   : > { %v4694_v49 = vpack.c.bf16 %v3901_v1, %v3901_v1  ;;  %v3887_v15 = vmul.f32 %v5135_v40, %v3855_v7  ;;  %3602 = vst [vmem:[%s5951_s26 + $0x78] sm:$0xf] %v4667_v28  ;;  %v3892_v8 = vadd.f32 %v3876_v46, %v3860_v61  ;;  %v3846_v34 = vmul.f32 %v3818_v22, %v6566_v63  ;;  %v5147_v1 = vld [vmem:[%s5942_s8 + $0x58] sm:$0xff]  ;;  %v8293_v46 = vld [vmem:[#allocation53_spill] sm:$0xff] }
 0x696   : > { %v3840_v18 = vpop.permute.xlu0 %3839 }
 0x697   : > { %3981 = vst [vmem:[%s5951_s26 + $0x54] sm:$0xf] %v4694_v49  ;;  %v3903_v43 = vadd.f32 %v3887_v15, %v3871_v53  ;;  %v3857_v45 = vmul.f32 %v3840_v18, %v6566_v63  ;;  %v4685_v3 = vpack.c.bf16 %v3892_v8, %v3892_v8  ;;  %v3878_v13 = vmul.f32 %v5137_v26, %v3846_v34  ;;  %v5150_v34 = vld [vmem:[%s5935_s11 + $0x78] sm:$0xff] }
 0x698   : > { %v3822_v2 = vpop.permute.xlu1 %3821  ;;  %v3872_v49 = vmul.f32 %v5148_v36, %v8293_v46  ;;  %v3874_v18 = vmul.f32 %v5150_v34, %v7695_v38 }
 0x699   : > { %v4696_v20 = vpack.c.bf16 %v3903_v43, %v3903_v43  ;;  %v3889_v6 = vmul.f32 %v5139_v42, %v3857_v45  ;;  %3972 = vst [vmem:[%s5951_s26 + $0xc] sm:$0xf] %v4685_v3  ;;  %v3894_v39 = vadd.f32 %v3878_v13, %v3862_v17  ;;  %v3848_v31 = vmul.f32 %v3822_v2, %v6566_v63  ;;  %v5151_v43 = vld [vmem:[%s5942_s8 + $0x78] sm:$0xff] }
 0x69b   : > { %3983 = vst [vmem:[%s5951_s26 + $0x64] sm:$0xf] %v4696_v20  ;;  %v3905_v16 = vadd.f32 %v3889_v6, %v3873_v44  ;;  %v4687_v29 = vpack.c.bf16 %v3894_v39, %v3894_v39  ;;  %v3880_v37 = vmul.f32 %v5141_v19, %v3848_v31 }
 0x69c   : > { %v3826_v55 = vpop.permute.xlu1 %3825 }
 0x69d   : > { %v4698_v60 = vpack.c.bf16 %v3905_v16, %v3905_v16  ;;  %3974 = vst [vmem:[%s5951_s26 + $0x1c] sm:$0xf] %v4687_v29  ;;  %v3896_v32 = vadd.f32 %v3880_v37, %v3864_v59  ;;  %v3850_v33 = vmul.f32 %v3826_v55, %v6566_v63 }
 0x69f   : > { %3985 = vst [vmem:[%s5951_s26 + $0x74] sm:$0xf] %v4698_v60  ;;  %v4689_v14 = vpack.c.bf16 %v3896_v32, %v3896_v32  ;;  %v3882_v35 = vmul.f32 %v5143_v62, %v3850_v33 }
 0x6a0   : > { %v3830_v27 = vpop.permute.xlu1 %3829 }
 0x6a1   : > { %3976 = vst [vmem:[%s5951_s26 + $0x2c] sm:$0xf] %v4689_v14  ;;  %v3898_v11 = vadd.f32 %v3882_v35, %v3866_v10  ;;  %v3852_v0 = vmul.f32 %v3830_v27, %v6566_v63 }
 0x6a3   : > { %v4691_v48 = vpack.c.bf16 %v3898_v11, %v3898_v11  ;;  %v3884_v47 = vmul.f32 %v5145_v54, %v3852_v0 }
 0x6a4   : > { %v3834_v57 = vpop.permute.xlu1 %3833 }
 0x6a5   : > { %3978 = vst [vmem:[%s5951_s26 + $0x3c] sm:$0xf] %v4691_v48  ;;  %v3900_v52 = vadd.f32 %v3884_v47, %v3868_v25  ;;  %v3854_v56 = vmul.f32 %v3834_v57, %v6566_v63 }
 0x6a7   : > { %v4693_v23 = vpack.c.bf16 %v3900_v52, %v3900_v52  ;;  %v3886_v7 = vmul.f32 %v5147_v1, %v3854_v56 }
 0x6a8   : > { %v3838_v28 = vpop.permute.xlu1 %3837 }
 0x6a9   : > { %3980 = vst [vmem:[%s5951_s26 + $0x4c] sm:$0xf] %v4693_v23  ;;  %v3902_v5 = vadd.f32 %v3886_v7, %v3870_v24  ;;  %v3856_v30 = vmul.f32 %v3838_v28, %v6566_v63 }
 0x6ab   : > { %v4695_v61 = vpack.c.bf16 %v3902_v5, %v3902_v5  ;;  %v3888_v53 = vmul.f32 %v5149_v9, %v3856_v30 }
 0x6ac   : > { %v3842_v40 = vpop.permute.xlu1 %3841 }
 0x6ad   : > { %3982 = vst [vmem:[%s5951_s26 + $0x5c] sm:$0xf] %v4695_v61  ;;  %v3904_v15 = vadd.f32 %v3888_v53, %v3872_v49  ;;  %v3858_v22 = vmul.f32 %v3842_v40, %v6566_v63 }
 0x6af   : > { %v4697_v8 = vpack.c.bf16 %v3904_v15, %v3904_v15  ;;  %v3890_v45 = vmul.f32 %v5151_v43, %v3858_v22 }
 0x6b1   : > { %3984 = vst [vmem:[%s5951_s26 + $0x6c] sm:$0xf] %v4697_v8  ;;  %v3906_v3 = vadd.f32 %v3890_v45, %v3874_v18 }
 0x6b3   : > { %v4699_v12 = vpack.c.bf16 %v3906_v3, %v3906_v3 }
 0x6b5   : > { %3986 = vst [vmem:[%s5951_s26 + $0x7c] sm:$0xf] %v4699_v12 }
 0x6b6 PF: > { %s8294_s0 = sld [smem:[#allocation23_spill]]  ;;  %s8295_s14 = sld [smem:[#allocation60_spill]] }
 0x6b7   : > { %s4109_s11 = sshll.u32 %s5951_s26, 4  ;;  %s8297_s1 = sld [smem:[#allocation61_spill]]  ;;  %s7895_s11 = int_to_ptr.vmem [resolvable:$true] %s4109_s11 }
 0x6b8   : > { %s7904_s15 = scalar_lea.sflag [#allocation13], %s396_s4  ;;  %s5272_s22 = scalar_lea.vmem %s7895_s11, 2048 }
 0x6b9   : > { %p5273_p1 = scmp.ne.s32.totalorder %s7895_s11, %s5272_s22  ;;  %p8298_p5 = scmp.ne.s32.totalorder %s8169_s10, 0 }
 0x6ba   : > { %s5506_s20 = smov [#allocation12]  }
 0x6bb   : > { %p5274_p0 = pnand %p5273_p1, %p8298_p5  ;;  %s5276_s26 = sshll.u32 %s5506_s20, 4  ;;  %s5277_s26 = int_to_ptr.vmem [resolvable:$false] %s5276_s26 }
 0x6bc   : > { %s4719_s6 = sshll.u32 %s8294_s0, 11  ;;  %s8296_s24 = smov %s8295_s14 }
 0x6bd   : > { %s7892_s16 = scalar_lea.hbm %s8295_s14, %s4719_s6  ;;  %s7900_s3 = scalar_lea.hbm %s8297_s1, %s4719_s6 }
 0x6be   : > { %p5275_p9 = pneg %p5274_p0  ;;  %s5278_s21 = scalar_lea.vmem %s5277_s26, 4096 }
 0x6bf   : > { %p5279_p10 = scmp.lt.s32.totalorder %s7895_s11, %s5277_s26  ;;  %p5280_p2 = scmp.lt.s32.totalorder %s5278_s21, %s5272_s22 }
 0x6c1   : > { %p5281_p3 = por %p5280_p2, %p5279_p10 }
 0x6c3   : > { %p5282_p6 = pnand %p5281_p3, %p5275_p9 }
 0x6c5   : > { %5285 = shalt.err (!%p5282_p6)
}
 0x6c6   : > { %s5286_s19 = scalar_lea.hbm %s7892_s16, 2048  ;;  %s5290_s30 = scalar_lea.hbm %s8296_s24, 4096 }
 0x6c7   : > { %p5287_p11 = scmp.ne.s32.totalorder %s7892_s16, %s5286_s19  ;;  %p5291_p13 = scmp.lt.u32.totalorder %s7892_s16, %s8296_s24 }
 0x6c8   : > { %p5292_p12 = scmp.lt.u32.totalorder %s5290_s30, %s5286_s19  ;;  %p5294_p1 = scmp.lt.u32.totalorder %s5286_s19, %s7892_s16 }
 0x6c9   : > { %p5288_p7 = pnand %p5287_p11, %p8298_p5 }
 0x6ca   : > { %p5293_p4 = por %p5292_p12, %p5291_p13 }
 0x6cb   : > { %p5289_p8 = pneg %p5288_p7 }
 0x6cc   : > { %p5295_p0 = por %p5294_p1, %p5293_p4 }
 0x6ce   : > { %p5296_p9 = pnand %p5295_p0, %p5289_p8 }
 0x6d0   : > { %5299 = shalt.err (!%p5296_p9)
}
 0x6d1   : > { %s5507_s7 = smov 128   ;;  %s5508_s22 = smov 8  }
 0x6d2   : > { %4731 = dma.vmem_to_hbm [thread:$0]  (%p8298_p5), %s7895_s11, 2048, %s7892_s16, %s7904_s15, %s5507_s7, %s5507_s7, %s5508_s22  }
 0x6d3   : > { %s4717_s20 = sshll.u32 %s8294_s0, 12  ;;  %s8299_s19 = sld [smem:[#allocation59_spill]] }
 0x6d4   : > { %s4092_s6 = sshll.u32 %s5949_s13, 4  ;;  %s4126_s30 = sshll.u32 %s5953_s23, 4  ;;  %s7938_s6 = int_to_ptr.vmem [resolvable:$true] %s4092_s6  ;;  %s7967_s30 = int_to_ptr.vmem [resolvable:$true] %s4126_s30 }
 0x6d5   : > { %s4068_s14 = scalar_lea.sflag [#allocation5], %s5932_s2  ;;  %s5300_s8 = scalar_lea.vmem %s7938_s6, 4096 }
 0x6d6   : > { %p5301_p10 = scmp.ne.s32.totalorder %s7938_s6, %s5300_s8  ;;  %s5509_s16 = smov [#allocation11]  }
 0x6d7   : > { %s5304_s0 = sshll.u32 %s5509_s16, 4  ;;  %s5305_s0 = int_to_ptr.vmem [resolvable:$false] %s5304_s0 }
 0x6d8   : > { %p5302_p2 = pnand %p5301_p10, %p8298_p5  ;;  %s5306_s11 = scalar_lea.vmem %s5305_s0, 8192 }
 0x6d9   : > { %s7935_s4 = scalar_lea.hbm %s8299_s19, %s4717_s20  ;;  %p5307_p6 = scmp.lt.s32.totalorder %s7938_s6, %s5305_s0 }
 0x6da   : > { %p5303_p3 = pneg %p5302_p2  ;;  %p5308_p11 = scmp.lt.s32.totalorder %s5306_s11, %s5300_s8 }
 0x6dc   : > { %p5309_p7 = por %p5308_p11, %p5307_p6 }
 0x6de   : > { %p5310_p8 = pnand %p5309_p7, %p5303_p3 }
 0x6e0   : > { %5313 = shalt.err (!%p5310_p8)
}
 0x6e1   : > { %s5314_s13 = scalar_lea.hbm %s7935_s4, 4096  ;;  %s5318_s21 = scalar_lea.hbm %s8299_s19, 8192 }
 0x6e2   : > { %p5315_p13 = scmp.ne.s32.totalorder %s7935_s4, %s5314_s13  ;;  %p5319_p1 = scmp.lt.u32.totalorder %s7935_s4, %s8299_s19 }
 0x6e3   : > { %p5320_p0 = scmp.lt.u32.totalorder %s5318_s21, %s5314_s13  ;;  %p5322_p10 = scmp.lt.u32.totalorder %s5314_s13, %s7935_s4 }
 0x6e4   : > { %p5316_p12 = pnand %p5315_p13, %p8298_p5 }
 0x6e5   : > { %p5321_p9 = por %p5320_p0, %p5319_p1 }
 0x6e6   : > { %p5317_p4 = pneg %p5316_p12 }
 0x6e7   : > { %p5323_p2 = por %p5322_p10, %p5321_p9 }
 0x6e9   : > { %p5324_p3 = pnand %p5323_p2, %p5317_p4 }
 0x6eb   : > { %5327 = shalt.err (!%p5324_p3)
}
 0x6ec   : > { %s5510_s8 = smov 256   ;;  %s5511_s11 = smov 16  }
 0x6ed   : > { %4730 = dma.vmem_to_hbm [thread:$0]  (%p8298_p5), %s7938_s6, 4096, %s7935_s4, %s4068_s14, %s5510_s8, %s5510_s8, %s5511_s11  }
 0x6ee   : > { %s5328_s13 = scalar_lea.vmem %s7967_s30, 2048  ;;  %s5512_s20 = smov [#allocation14]  }
 0x6ef   : > { %p5329_p6 = scmp.ne.s32.totalorder %s7967_s30, %s5328_s13  ;;  %s5332_s26 = sshll.u32 %s5512_s20, 4  ;;  %s5333_s26 = int_to_ptr.vmem [resolvable:$false] %s5332_s26 }
 0x6f0   : > { %s5334_s21 = scalar_lea.vmem %s5333_s26, 4096  ;;  %p5335_p8 = scmp.lt.s32.totalorder %s7967_s30, %s5333_s26 }
 0x6f1   : > { %p5330_p11 = pnand %p5329_p6, %p8298_p5  ;;  %p5336_p13 = scmp.lt.s32.totalorder %s5334_s21, %s5328_s13 }
 0x6f3   : > { %p5331_p7 = pneg %p5330_p11  ;;  %p5337_p12 = por %p5336_p13, %p5335_p8 }
 0x6f5   : > { %p5338_p4 = pnand %p5337_p12, %p5331_p7 }
 0x6f7   : > { %5341 = shalt.err (!%p5338_p4)
}
 0x6f8   : > { %s5342_s2 = scalar_lea.hbm %s7900_s3, 2048  ;;  %s5346_s6 = scalar_lea.hbm %s8297_s1, 4096 }
 0x6f9   : > { %p5343_p1 = scmp.ne.s32.totalorder %s7900_s3, %s5342_s2  ;;  %p5347_p10 = scmp.lt.u32.totalorder %s7900_s3, %s8297_s1 }
 0x6fa   : > { %p5348_p2 = scmp.lt.u32.totalorder %s5346_s6, %s5342_s2  ;;  %p5350_p6 = scmp.lt.u32.totalorder %s5342_s2, %s7900_s3 }
 0x6fb   : > { %p5344_p0 = pnand %p5343_p1, %p8298_p5 }
 0x6fc   : > { %p5349_p3 = por %p5348_p2, %p5347_p10 }
 0x6fd   : > { %p5345_p9 = pneg %p5344_p0 }
 0x6fe   : > { %p5351_p11 = por %p5350_p6, %p5349_p3 }
 0x700   : > { %p5352_p7 = pnand %p5351_p11, %p5345_p9 }
 0x702   : > { %5355 = shalt.err (!%p5352_p7)
}
 0x703   : > { %4732 = dma.vmem_to_hbm [thread:$0]  (%p8298_p5), %s7967_s30, 2048, %s7900_s3, %s7904_s15, %s5507_s7, %s5507_s7, %s5508_s22  }
 0x704 PF: > { %s8300_s0 = sld [smem:[#allocation30_spill]]  ;;  %p4760_p8 = scmp.ge.s32.totalorder %s5490_s18, 2 }
 0x705   : > { %s4141_s8 = sand.u32 1, %s5438_s27  }
 0x706   : > { %s4142_s11 = scalar_lea.sflag [#allocation5], %s4141_s8 }
 0x70a   : > { %p8301_p13 = scmp.ne.s32.totalorder %s8300_s0, 0 }
 0x70c   : > { %p4750_p12 = pnand %p4760_p8, %p8301_p13 }
 0x70e   : > { %5429 = dma.done.wait (!%p4750_p12), %s4142_s11, 4096  }
 0x70f   : > { %5431 = vsyncadd (!%p4750_p12), %s4142_s11, 4294963200  ;;  %s8302_s10 = sadd.s32 4294967294, %s5490_s18  }
 0x710   : > { %s4150_s13 = sand.u32 1, %s8302_s10  }
 0x711   : > { %s4151_s20 = scalar_lea.sflag [#allocation13], %s4150_s13 }
 0x712   : > { %5433 = dma.done.wait (!%p4750_p12), %s4151_s20, 4096  }
 0x713   : > { %5435 = vsyncadd (!%p4750_p12), %s4151_s20, 4294963200  ;;  %s34_s18 = sadd.s32 1, %s5490_s18   ;;  %s8304_s15 = sld [smem:[#allocation29_spill]] }
 0x714   : > { %p8001_p5 = scmp.ge.s32.totalorder %s34_s18, 6   ;;  %s8305_s7 = sld [smem:[#allocation21_spill]] }
 0x715   : > { %s8306_s10 = sld [smem:[#allocation27_spill]]  ;;  %s8307_s22 = sld [smem:[#allocation22_spill]] }
 0x716   : > { %s8308_s13 = sld [smem:[#allocation28_spill]]  ;;  %s8309_s14 = sld [smem:[#allocation24_spill]] }
 0x717   : > { %s8310_s16 = sld [smem:[#allocation25_spill]]  ;;  %s8311_s26 = sld [smem:[#allocation26_spill]] }
 0x718   : > { %s8312_s27 = smov %s5442_s28  ;;  %s8313_s28 = smov %s5446_s29 }
 0x719   : > { %s8314_s29 = smov %s8304_s15  ;;  %s8315_s30 = smov %s5454_s9 }
 0x71a   : > { %s8316_s9 = smov %s8305_s7  ;;  %s8317_s11 = smov %s5466_s12 }
 0x71b   : > { %s8318_s12 = smov %s8307_s22  ;;  %s8319_s15 = smov %s5486_s17 }
 0x71c   :  { %33 = sbr.rel (!%p8001_p5) target bundleno = 25 (0x19), region = 166 }
 0x71d   : > { %s8320_s17 = smov %s8311_s26 }
 0x723   :  { %4165 = vsyncpa [#allocation4], 1 }
 0x724   :  { %4167 = vsyncpa [#allocation4 + $0x1], 1 }
 0x725   :  { %4168 = vsyncpa [#allocation7], 1 }
 0x726   :  { %4170 = vsyncpa [#allocation7 + $0x1], 1 }
 0x727   :  { %4171 = vsyncpa [#allocation10], 1 }
 0x728   :  { %4173 = vsyncpa [#allocation10 + $0x1], 1 }
 0x729   :  { %4174 = vsyncpa [#allocation5], 1 }
 0x72a   :  { %4176 = vsyncpa [#allocation5 + $0x1], 1 }
 0x72b   :  { %4177 = vsyncpa [#allocation13], 1 }
 0x72c   :  { %4179 = vsyncpa [#allocation13 + $0x1], 1 }

</bundles_post_ra>
